<compile_context>
chip_gen: v7x
topology: tpu7x:2x2x1
jax: 0.10.0
libtpu: 0.0.40
codegen_flags: <defaults>
</compile_context>

<pallas_src>
import functools

import numpy as np
import jax
import jax.numpy as jnp
from jax.experimental import pallas as pl
from jax.experimental.pallas import tpu as pltpu


# Per-layer attention weight matrices, packed along dim 1 of (L, 8, D, D).
ATTN_W_ORDER = ('wq1', 'wk1', 'wv1', 'wo1', 'wq2', 'wk2', 'wv2', 'wo2')

# Small per-layer (1, d_model) vectors, packed into one (L, 15, d_model) slab.
VEC_ORDER = ('bq1', 'bk1', 'bv1', 'bo1', 'g1', 'be1',
             'bq2', 'bk2', 'bv2', 'bo2', 'g2', 'be2',
             'fb2', 'g3', 'be3')
VEC_IDX = {n: i for i, n in enumerate(VEC_ORDER)}


# ----------------------------------------------------------------------------
# Fused decoder-stack kernel: grid = (batch_tiles, num_layers)
# ----------------------------------------------------------------------------

def decoder_kernel(x0_ref, enc_ref, la_ref, pad_ref,
                   w_ref, fw1_ref, fw2_ref, vec_ref, fb1_ref,
                   x_out_ref, attn1_ref, attn2_ref,
                   x_scr, *, num_heads, num_layers):
    layer = pl.program_id(1)

    Bt, S, D = x_scr.shape
    Se = enc_ref.shape[1]
    H = num_heads
    dk = D // H
    M = Bt * S

    # Layer 0: load the already embedded + scaled + position-encoded input.
    @pl.when(layer == 0)
    def _():
        x_scr[...] = x0_ref[...]
        # TODO(synk): nn.Dropout(0.1) is identity here (eval-mode inference).

    x = x_scr[...]                                   # (Bt, S, D) f32, VMEM-resident
    x_flat = x.reshape(M, D)
    enc_flat = enc_ref[...].reshape(Bt * Se, D)      # bf16
    neg_la = la_ref[...]                             # (S, S)    pre-scaled by -1e9
    neg_pad = pad_ref[...]                           # (Bt, 1, Se) pre-scaled by -1e9
    vecs = vec_ref[...]                              # (15, D) f32
    fb1 = fb1_ref[...]                               # (1, d_middle) f32

    def vec(name):
        i = VEC_IDX[name]
        return vecs[i:i + 1, :]                      # (1, D) static slice

    def mm(a_bf16, b_bf16):
        # MXU matmul: bf16 operands, f32 accumulation.
        return jnp.dot(a_bf16, b_bf16, preferred_element_type=jnp.float32)

    def add_ln(y, gamma, beta, eps=1e-5):
        mu = jnp.mean(y, axis=-1, keepdims=True)
        var = jnp.mean((y - mu) ** 2, axis=-1, keepdims=True)
        return (y - mu) * jax.lax.rsqrt(var + eps) * gamma + beta

    def mha(xq_flat, kv_flat_bf16, Skv, neg_mask, w_base, b_names, attn_ref):
        """Multi-head attention for the whole batch tile.

        xq_flat: (M, D) f32 queries (flattened batch tile), kv_flat_bf16:
        (Bt*Skv, D) bf16 keys/values source, neg_mask broadcastable to
        (Bt, S, Skv) (already scaled by -1e9).  Writes attention weights per
        head into attn_ref (H, Bt, S, Skv) and returns the (M, D) f32 output.
        """
        wq = w_ref[w_base + 0]
        wk = w_ref[w_base + 1]
        wv = w_ref[w_base + 2]
        wo = w_ref[w_base + 3]

        # Full-width projections: single fat MXU matmuls, f32 accumulate.
        q = (mm(xq_flat.astype(jnp.bfloat16), wq) + vec(b_names[0])).astype(jnp.bfloat16)
        k = (mm(kv_flat_bf16, wk) + vec(b_names[1])).astype(jnp.bfloat16)
        v = (mm(kv_flat_bf16, wv) + vec(b_names[2])).astype(jnp.bfloat16)

        inv_sqrt_dk = 1.0 / float(np.sqrt(dk))
        mask_b = jnp.broadcast_to(neg_mask, (Bt, S, Skv))   # hoisted out of head loop

        ctx_heads = []
        for h in range(H):                      # static unrolled head loop
            lo = h * dk
            qh = q[:, lo:lo + dk].reshape(Bt, S, dk)
            kh = k[:, lo:lo + dk].reshape(Bt, Skv, dk)
            vh = v[:, lo:lo + dk].reshape(Bt, Skv, dk)
            s = jnp.einsum('bqd,bkd->bqk', qh, kh,
                           preferred_element_type=jnp.float32)   # (Bt, S, Skv) f32
            s = s * inv_sqrt_dk + mask_b
            smax = jnp.max(s, axis=-1, keepdims=True)
            e = jnp.exp(s - smax)
            a = e * pl.reciprocal(jnp.sum(e, axis=-1, keepdims=True), approx=True)
            attn_ref[h] = a.astype(attn_ref.dtype)               # (Bt, S, Skv) store
            ctx = jnp.einsum('bqk,bkd->bqd', a.astype(jnp.bfloat16), vh,
                             preferred_element_type=jnp.float32) # (Bt, S, dk)
            ctx_heads.append(ctx.reshape(M, dk))

        ctx_all = jnp.concatenate(ctx_heads, axis=-1)            # (M, D) f32
        return mm(ctx_all.astype(jnp.bfloat16), wo) + vec(b_names[3])

    # ---- block 1: masked self-attention + Add&Norm -------------------------
    a1 = mha(x_flat, x_flat.astype(jnp.bfloat16), S, neg_la[None, :, :],
             0, ('bq1', 'bk1', 'bv1', 'bo1'), attn1_ref)
    out1 = add_ln(a1 + x_flat, vec('g1'), vec('be1'))

    # ---- block 2: cross-attention over encoder output + Add&Norm -----------
    a2 = mha(out1, enc_flat, Se, neg_pad,
             4, ('bq2', 'bk2', 'bv2', 'bo2'), attn2_ref)
    out2 = add_ln(a2 + out1, vec('g2'), vec('be2'))

    # ---- FFN + Add&Norm -----------------------------------------------------
    hmid = jnp.maximum(mm(out2.astype(jnp.bfloat16), fw1_ref[...]) + fb1, 0.0)
    ffn = mm(hmid.astype(jnp.bfloat16), fw2_ref[...]) + vec('fb2')
    x_new = add_ln(ffn + out2, vec('g3'), vec('be3'))

    x_scr[...] = x_new.reshape(Bt, S, D)         # carry to next layer (VMEM only)

    @pl.when(layer == num_layers - 1)
    def _():
        x_out_ref[...] = x_new.reshape(Bt, S, D)


# ----------------------------------------------------------------------------
# Wrapper
# ----------------------------------------------------------------------------

def _pick_batch_tile(B, S, target_rows=256):
    """Largest divisor of B whose tile presents <= target_rows matmul rows.

    Bigger tiles fatten the MXU M dim and amortize per-layer weight DMA.
    """
    best = 1
    for t in range(1, B + 1):
        if B % t == 0 and t * S <= max(S, target_rows):
            best = t
    return best


@functools.partial(jax.jit,
                   static_argnames=('d_model', 'num_heads', 'num_layers',
                                    'batch_tile'))
def decoder_forward(params, ids, enc_output, look_ahead_mask, padding_mask,
                    *, d_model, num_heads, num_layers, batch_tile=None):
    """Mirrors Decoder.forward: returns (x, attention_weights dict)."""
    B, S = ids.shape
    Se = enc_output.shape[1]
    D, L, H = d_model, num_layers, num_heads
    dm = params['fw1'].shape[-1]
    assert params['embedding'].shape[1] == D

    Bt = batch_tile if batch_tile is not None else _pick_batch_tile(B, S)
    assert B % Bt == 0
    nBT = B // Bt

    # Embedding + sqrt(d_model) scale + positional encoding in plain XLA:
    # keeps the (V, D) table out of VMEM and removes the one-hot matmul.
    pos = params['pos_encoding'][0, :S, :]
    x0 = (jnp.take(params['embedding'], ids.astype(jnp.int32), axis=0)
          * np.float32(np.sqrt(D)) + pos).astype(jnp.float32)
    # TODO(synk): Decoder.dropout(0.1) is identity (eval-mode inference).

    enc_bf = enc_output.astype(jnp.bfloat16)
    neg_la = look_ahead_mask.astype(jnp.float32) * (-1e9)      # pre-scaled masks
    neg_pad = padding_mask.reshape(B, 1, Se).astype(jnp.float32) * (-1e9)

    # Pack per-layer parameters: bf16 weights, one slab for the 8 attention
    # matrices, one slab for the 15 small vectors -> few fat DMAs per layer.
    attn_w = jnp.stack([params[n] for n in ATTN_W_ORDER], axis=1).astype(jnp.bfloat16)
    fw1 = params['fw1'].astype(jnp.bfloat16)
    fw2 = params['fw2'].astype(jnp.bfloat16)
    vecs = jnp.concatenate([params[n] for n in VEC_ORDER], axis=1).astype(jnp.float32)
    fb1 = params['fb1'].astype(jnp.float32)

    in_specs = [
        pl.BlockSpec((Bt, S, D), lambda bt, l: (bt, 0, 0)),          # x0
        pl.BlockSpec((Bt, Se, D), lambda bt, l: (bt, 0, 0)),         # encoder output (bf16)
        pl.BlockSpec((S, S), lambda bt, l: (0, 0)),                  # -1e9 * look-ahead mask
        pl.BlockSpec((Bt, 1, Se), lambda bt, l: (bt, 0, 0)),         # -1e9 * padding mask
        pl.BlockSpec((None, 8, D, D), lambda bt, l: (l, 0, 0, 0)),   # packed attn weights
        pl.BlockSpec((None, D, dm), lambda bt, l: (l, 0, 0)),        # fw1
        pl.BlockSpec((None, dm, D), lambda bt, l: (l, 0, 0)),        # fw2
        pl.BlockSpec((None, len(VEC_ORDER), D), lambda bt, l: (l, 0, 0)),  # packed vectors
        pl.BlockSpec((None, 1, dm), lambda bt, l: (l, 0, 0)),        # fb1
    ]
    out_shapes = (
        jax.ShapeDtypeStruct((B, S, D), jnp.float32),                # final activations
        jax.ShapeDtypeStruct((L * nBT, H, Bt, S, S), jnp.float32),   # self-attn weights
        jax.ShapeDtypeStruct((L * nBT, H, Bt, S, Se), jnp.float32),  # cross-attn weights
    )
    out_specs = (
        pl.BlockSpec((Bt, S, D), lambda bt, l: (bt, 0, 0)),
        pl.BlockSpec((None, H, Bt, S, S), lambda bt, l: (l * nBT + bt, 0, 0, 0, 0)),
        pl.BlockSpec((None, H, Bt, S, Se), lambda bt, l: (l * nBT + bt, 0, 0, 0, 0)),
    )

    kernel = functools.partial(decoder_kernel, num_heads=H, num_layers=L)
    x, attn1_all, attn2_all = pl.pallas_call(
        kernel,
        out_shape=out_shapes,
        grid_spec=pltpu.PrefetchScalarGridSpec(
            num_scalar_prefetch=0,
            grid=(nBT, L),                                  # batch-tiles outer, layers inner
            in_specs=in_specs,
            out_specs=out_specs,
            scratch_shapes=[pltpu.VMEM((Bt, S, D), jnp.float32)],   # carried activations
        ),
        compiler_params=pltpu.CompilerParams(
            dimension_semantics=("parallel", "arbitrary"),  # batch tiles -> megacore on v7x
            vmem_limit_bytes=64 * 1024 * 1024),
    )(x0, enc_bf, neg_la, neg_pad, attn_w, fw1, fw2, vecs, fb1)

    # (L*nBT, H, Bt, S, Sk) -> (L, B, H, S, Sk)
    attn1_all = attn1_all.reshape(L, nBT, H, Bt, S, S)
    attn1_all = attn1_all.transpose(0, 1, 3, 2, 4, 5).reshape(L, B, H, S, S)
    attn2_all = attn2_all.reshape(L, nBT, H, Bt, S, Se)
    attn2_all = attn2_all.transpose(0, 1, 3, 2, 4, 5).reshape(L, B, H, S, Se)

    attention_weights = {}
    for i in range(L):
        attention_weights['Decoder_{}_block_1'.format(i + 1)] = attn1_all[i]
        attention_weights['Decoder_{}_block_2'.format(i + 1)] = attn2_all[i]
    return x, attention_weights


# ----------------------------------------------------------------------------
# Parameters
# ----------------------------------------------------------------------------

def positional_encoding(max_pos, d_model):
    pos = np.arange(max_pos)[:, None].astype(np.float32)
    i = np.arange(d_model)[None, :].astype(np.float32)
    angle_rates = 1.0 / np.power(10000.0, (2.0 * (i // 2)) / np.float32(d_model))
    angle_rads = pos * angle_rates
    angle_rads[:, 0::2] = np.sin(angle_rads[:, 0::2])
    angle_rads[:, 1::2] = np.cos(angle_rads[:, 1::2])
    return jnp.asarray(angle_rads[None, ...], dtype=jnp.float32)   # (1, max_pos, D)


def init_params(key, num_layers, d_model, num_heads, d_middle, vocab, max_pos):
    del num_heads
    L = num_layers
    keys = jax.random.split(key, 12)

    def dense(k, shape):
        return (0.02 * jax.random.normal(k, shape)).astype(jnp.float32)

    p = {
        'embedding': dense(keys[0], (vocab, d_model)),
        'pos_encoding': positional_encoding(max_pos, d_model),
    }
    for i, name in enumerate(ATTN_W_ORDER):
        p[name] = dense(keys[1 + i], (L, d_model, d_model))
    p['fw1'] = dense(keys[9], (L, d_model, d_middle))
    p['fw2'] = dense(keys[10], (L, d_middle, d_model))

    zeros_d = jnp.zeros((L, 1, d_model), jnp.float32)
    for name in ('bq1', 'bk1', 'bv1', 'bo1', 'bq2', 'bk2', 'bv2', 'bo2',
                 'fb2', 'be1', 'be2', 'be3'):
        p[name] = zeros_d
    p['fb1'] = jnp.zeros((L, 1, d_middle), jnp.float32)
    ones_d = jnp.ones((L, 1, d_model), jnp.float32)
    for name in ('g1', 'g2', 'g3'):
        p[name] = ones_d
    return p


# ----------------------------------------------------------------------------
# Demo
# ----------------------------------------------------------------------------

if __name__ == "__main__":
    num_layers = 2
    d_model = 32
    num_heads = 4
    d_middle = 64
    target_vocab_size = 50
    maximum_position_encoding = 16

    B, S_dec, S_enc = 2, 8, 8

    key = jax.random.PRNGKey(0)
    k_params, k_ids, k_enc = jax.random.split(key, 3)

    params = init_params(k_params, num_layers, d_model, num_heads, d_middle,
                         target_vocab_size, maximum_position_encoding)

    ids = jax.random.randint(k_ids, (B, S_dec), 0, target_vocab_size, dtype=jnp.int32)
    enc_output = jax.random.normal(k_enc, (B, S_enc, d_model), jnp.float32)

    # 1.0 == masked. Causal look-ahead mask + pad-out last two encoder tokens.
    look_ahead_mask = 1.0 - jnp.tril(jnp.ones((S_dec, S_dec), jnp.float32))
    padding_mask = jnp.zeros((B, S_enc), jnp.float32).at[:, S_enc - 2:].set(1.0)

    x, attn_w = decoder_forward(params, ids, enc_output, look_ahead_mask,
                                padding_mask, d_model=d_model,
                                num_heads=num_heads, num_layers=num_layers)

    jax.block_until_ready(x)
    for v in attn_w.values():
        jax.block_until_ready(v)

    assert x.shape == (B, S_dec, d_model)
    assert bool(jnp.all(jnp.isfinite(x)))
    for i in range(num_layers):
        a1 = attn_w['Decoder_{}_block_1'.format(i + 1)]
        a2 = attn_w['Decoder_{}_block_2'.format(i + 1)]
        assert a1.shape == (B, num_heads, S_dec, S_dec)
        assert a2.shape == (B, num_heads, S_dec, S_enc)
        assert bool(jnp.all(jnp.isfinite(a1))) and bool(jnp.all(jnp.isfinite(a2)))
        # Softmax rows must sum to ~1 (approx reciprocal tolerance).
        assert bool(jnp.all(jnp.abs(jnp.sum(a1, axis=-1) - 1.0) < 5e-2))
        assert bool(jnp.all(jnp.abs(jnp.sum(a2, axis=-1) - 1.0) < 5e-2))

    print("KERNEL_OK")
</pallas_src>

<mosaic_0001>
module attributes {stable_mosaic.version = 11 : i64} {
  func.func @decoder_kernel(%arg0: i32, %arg1: i32, %arg2: memref<2x8x32xf32, #tpu.memory_space<vmem>>, %arg3: memref<2x8x32xbf16, #tpu.memory_space<vmem>>, %arg4: memref<8x8xf32, #tpu.memory_space<vmem>>, %arg5: memref<2x1x8xf32, #tpu.memory_space<vmem>>, %arg6: memref<1x8x32x32xbf16, #tpu.memory_space<vmem>>, %arg7: memref<1x32x64xbf16, #tpu.memory_space<vmem>>, %arg8: memref<1x64x32xbf16, #tpu.memory_space<vmem>>, %arg9: memref<1x15x32xf32, #tpu.memory_space<vmem>>, %arg10: memref<1x1x64xf32, #tpu.memory_space<vmem>>, %arg11: memref<2x8x32xf32, #tpu.memory_space<vmem>>, %arg12: memref<1x4x2x8x8xf32, #tpu.memory_space<vmem>>, %arg13: memref<1x4x2x8x8xf32, #tpu.memory_space<vmem>>, %arg14: memref<2x8x32xf32, #tpu.memory_space<vmem>>) attributes {dimension_semantics = [#tpu.dimension_semantics<parallel>, #tpu.dimension_semantics<arbitrary>], iteration_bounds = array<i64: 1, 2>, scalar_prefetch = 0 : i64, scratch_operands = 1 : i64, tpu.core_type = #tpu.core_type<tc>, window_params = [{transform_indices = @transform_0, window_bounds = array<i64: 2, 8, 32>}, {transform_indices = @transform_1, window_bounds = array<i64: 2, 8, 32>}, {pipeline_mode = #tpu.pipeline_mode<synchronous>, transform_indices = @transform_2, window_bounds = array<i64: 8, 8>}, {transform_indices = @transform_3, window_bounds = array<i64: 2, 1, 8>}, {transform_indices = @transform_4, window_bounds = array<i64: 1, 8, 32, 32>}, {transform_indices = @transform_5, window_bounds = array<i64: 1, 32, 64>}, {transform_indices = @transform_6, window_bounds = array<i64: 1, 64, 32>}, {transform_indices = @transform_7, window_bounds = array<i64: 1, 15, 32>}, {transform_indices = @transform_8, window_bounds = array<i64: 1, 1, 64>}, {transform_indices = @transform_9, window_bounds = array<i64: 2, 8, 32>}, {transform_indices = @transform_10, window_bounds = array<i64: 1, 4, 2, 8, 8>}, {transform_indices = @transform_11, window_bounds = array<i64: 1, 4, 2, 8, 8>}]} {
    %c0_i32 = arith.constant 0 : i32
    %0 = arith.cmpi eq, %arg1, %c0_i32 : i32
    %1 = arith.extui %0 : i1 to i32
    %c0_i32_0 = arith.constant 0 : i32
    %2 = arith.cmpi ne, %1, %c0_i32_0 : i32
    scf.if %2 {
      %c0_157 = arith.constant 0 : index
      %c0_158 = arith.constant 0 : index
      %c0_159 = arith.constant 0 : index
      %382 = vector.load %arg2[%c0_157, %c0_158, %c0_159] : memref<2x8x32xf32, #tpu.memory_space<vmem>>, vector<2x8x32xf32>
      %c0_160 = arith.constant 0 : index
      %c0_161 = arith.constant 0 : index
      %c0_162 = arith.constant 0 : index
      %383 = vector.load %arg14[%c0_160, %c0_161, %c0_162] : memref<2x8x32xf32, #tpu.memory_space<vmem>>, vector<2x8x32xf32>
      tpu.vector_store %arg14[%c0_160, %c0_161, %c0_162], %382 {strides = array<i32>} : memref<2x8x32xf32, #tpu.memory_space<vmem>>, vector<2x8x32xf32>,
    } else {
    }
    %c0 = arith.constant 0 : index
    %c0_1 = arith.constant 0 : index
    %c0_2 = arith.constant 0 : index
    %3 = vector.load %arg14[%c0, %c0_1, %c0_2] : memref<2x8x32xf32, #tpu.memory_space<vmem>>, vector<2x8x32xf32>
    %4 = vector.shape_cast %3 : vector<2x8x32xf32> to vector<16x32xf32>
    %c0_3 = arith.constant 0 : index
    %c0_4 = arith.constant 0 : index
    %c0_5 = arith.constant 0 : index
    %5 = vector.load %arg3[%c0_3, %c0_4, %c0_5] : memref<2x8x32xbf16, #tpu.memory_space<vmem>>, vector<2x8x32xbf16>
    %6 = vector.shape_cast %5 : vector<2x8x32xbf16> to vector<16x32xbf16>
    %c0_6 = arith.constant 0 : index
    %c0_7 = arith.constant 0 : index
    %7 = vector.load %arg4[%c0_6, %c0_7] : memref<8x8xf32, #tpu.memory_space<vmem>>, vector<8x8xf32>
    %c0_8 = arith.constant 0 : index
    %c0_9 = arith.constant 0 : index
    %c0_10 = arith.constant 0 : index
    %8 = vector.load %arg5[%c0_8, %c0_9, %c0_10] : memref<2x1x8xf32, #tpu.memory_space<vmem>>, vector<2x1x8xf32>
    %c0_11 = arith.constant 0 : index
    %c0_12 = arith.constant 0 : index
    %c0_13 = arith.constant 0 : index
    %9 = vector.load %arg9[%c0_11, %c0_12, %c0_13] : memref<1x15x32xf32, #tpu.memory_space<vmem>>, vector<1x15x32xf32>
    %10 = vector.shape_cast %9 : vector<1x15x32xf32> to vector<15x32xf32>
    %c0_14 = arith.constant 0 : index
    %c0_15 = arith.constant 0 : index
    %c0_16 = arith.constant 0 : index
    %11 = vector.load %arg10[%c0_14, %c0_15, %c0_16] : memref<1x1x64xf32, #tpu.memory_space<vmem>>, vector<1x1x64xf32>
    %12 = vector.shape_cast %11 : vector<1x1x64xf32> to vector<1x64xf32>
    %13 = arith.truncf %4 : vector<16x32xf32> to vector<16x32xbf16>
    %14 = vector.shape_cast %7 : vector<8x8xf32> to vector<1x8x8xf32>
    %c0_17 = arith.constant 0 : index
    %c0_18 = arith.constant 0 : index
    %c0_19 = arith.constant 0 : index
    %c0_20 = arith.constant 0 : index
    %15 = vector.load %arg6[%c0_17, %c0_18, %c0_19, %c0_20] : memref<1x8x32x32xbf16, #tpu.memory_space<vmem>>, vector<1x1x32x32xbf16>
    %16 = vector.shape_cast %15 : vector<1x1x32x32xbf16> to vector<32x32xbf16>
    %c0_21 = arith.constant 0 : index
    %c1 = arith.constant 1 : index
    %c0_22 = arith.constant 0 : index
    %c0_23 = arith.constant 0 : index
    %17 = vector.load %arg6[%c0_21, %c1, %c0_22, %c0_23] : memref<1x8x32x32xbf16, #tpu.memory_space<vmem>>, vector<1x1x32x32xbf16>
    %18 = vector.shape_cast %17 : vector<1x1x32x32xbf16> to vector<32x32xbf16>
    %c0_24 = arith.constant 0 : index
    %c2 = arith.constant 2 : index
    %c0_25 = arith.constant 0 : index
    %c0_26 = arith.constant 0 : index
    %19 = vector.load %arg6[%c0_24, %c2, %c0_25, %c0_26] : memref<1x8x32x32xbf16, #tpu.memory_space<vmem>>, vector<1x1x32x32xbf16>
    %20 = vector.shape_cast %19 : vector<1x1x32x32xbf16> to vector<32x32xbf16>
    %c0_27 = arith.constant 0 : index
    %c3 = arith.constant 3 : index
    %c0_28 = arith.constant 0 : index
    %c0_29 = arith.constant 0 : index
    %21 = vector.load %arg6[%c0_27, %c3, %c0_28, %c0_29] : memref<1x8x32x32xbf16, #tpu.memory_space<vmem>>, vector<1x1x32x32xbf16>
    %22 = vector.shape_cast %21 : vector<1x1x32x32xbf16> to vector<32x32xbf16>
    %23 = arith.truncf %4 : vector<16x32xf32> to vector<16x32xbf16>
    %cst = arith.constant dense<0.000000e+00> : vector<16x32xf32>
    %24 = tpu.matmul %23, %16, %cst {dimension_numbers = #tpu.dot_dimension_numbers<[1], [0], [0], [1], [0, 0, 1, 1], [], []>} : vector<16x32xbf16>, vector<32x32xbf16>, vector<16x32xf32> -> vector<16x32xf32>
    %25 = vector.extract_strided_slice %10 {offsets = [0, 0], sizes = [1, 32], strides = [1, 1]} : vector<15x32xf32> to vector<1x32xf32>
    %26 = vector.broadcast %25 : vector<1x32xf32> to vector<16x32xf32>
    %27 = arith.addf %24, %26 : vector<16x32xf32>
    %28 = arith.truncf %27 : vector<16x32xf32> to vector<16x32xbf16>
    %cst_30 = arith.constant dense<0.000000e+00> : vector<16x32xf32>
    %29 = tpu.matmul %13, %18, %cst_30 {dimension_numbers = #tpu.dot_dimension_numbers<[1], [0], [0], [1], [0, 0, 1, 1], [], []>} : vector<16x32xbf16>, vector<32x32xbf16>, vector<16x32xf32> -> vector<16x32xf32>
    %30 = vector.extract_strided_slice %10 {offsets = [1, 0], sizes = [1, 32], strides = [1, 1]} : vector<15x32xf32> to vector<1x32xf32>
    %31 = vector.broadcast %30 : vector<1x32xf32> to vector<16x32xf32>
    %32 = arith.addf %29, %31 : vector<16x32xf32>
    %33 = arith.truncf %32 : vector<16x32xf32> to vector<16x32xbf16>
    %cst_31 = arith.constant dense<0.000000e+00> : vector<16x32xf32>
    %34 = tpu.matmul %13, %20, %cst_31 {dimension_numbers = #tpu.dot_dimension_numbers<[1], [0], [0], [1], [0, 0, 1, 1], [], []>} : vector<16x32xbf16>, vector<32x32xbf16>, vector<16x32xf32> -> vector<16x32xf32>
    %35 = vector.extract_strided_slice %10 {offsets = [2, 0], sizes = [1, 32], strides = [1, 1]} : vector<15x32xf32> to vector<1x32xf32>
    %36 = vector.broadcast %35 : vector<1x32xf32> to vector<16x32xf32>
    %37 = arith.addf %34, %36 : vector<16x32xf32>
    %38 = arith.truncf %37 : vector<16x32xf32> to vector<16x32xbf16>
    %39 = vector.shape_cast %14 : vector<1x8x8xf32> to vector<1x8x8xf32>
    %40 = vector.broadcast %39 : vector<1x8x8xf32> to vector<2x8x8xf32>
    %41 = vector.extract_strided_slice %28 {offsets = [0, 0], sizes = [16, 8], strides = [1, 1]} : vector<16x32xbf16> to vector<16x8xbf16>
    %42 = vector.shape_cast %41 : vector<16x8xbf16> to vector<2x8x8xbf16>
    %43 = vector.extract_strided_slice %33 {offsets = [0, 0], sizes = [16, 8], strides = [1, 1]} : vector<16x32xbf16> to vector<16x8xbf16>
    %44 = vector.shape_cast %43 : vector<16x8xbf16> to vector<2x8x8xbf16>
    %45 = vector.extract_strided_slice %38 {offsets = [0, 0], sizes = [16, 8], strides = [1, 1]} : vector<16x32xbf16> to vector<16x8xbf16>
    %46 = vector.shape_cast %45 : vector<16x8xbf16> to vector<2x8x8xbf16>
    "tpu.trace_start"() <{level = 10 : i32, message = "bqd,bkd->bqk"}> : () -> ()
    %cst_32 = arith.constant dense<0.000000e+00> : vector<2x8x8xf32>
    %47 = tpu.matmul %42, %44, %cst_32 {dimension_numbers = #tpu.dot_dimension_numbers<[2], [2], [1], [1], [0, 0, 0, 1, 1, 1], [0], [0]>} : vector<2x8x8xbf16>, vector<2x8x8xbf16>, vector<2x8x8xf32> -> vector<2x8x8xf32>
    "tpu.trace_stop"() : () -> ()
    %cst_33 = arith.constant 0.353553385 : f32
    %48 = vector.broadcast %cst_33 : f32 to vector<2x8x8xf32>
    %49 = arith.mulf %47, %48 : vector<2x8x8xf32>
    %50 = arith.addf %49, %40 : vector<2x8x8xf32>
    %cst_34 = arith.constant dense<0xFF800000> : vector<2x8xf32>
    %51 = vector.multi_reduction <maximumf>, %50, %cst_34 [2] : vector<2x8x8xf32> to vector<2x8xf32>
    %52 = vector.shape_cast %51 : vector<2x8xf32> to vector<2x8x1xf32>
    %53 = vector.broadcast %52 : vector<2x8x1xf32> to vector<2x8x8xf32>
    %54 = arith.subf %50, %53 : vector<2x8x8xf32>
    %55 = math.exp %54 : vector<2x8x8xf32>
    %cst_35 = arith.constant dense<0.000000e+00> : vector<2x8xf32>
    %56 = vector.multi_reduction <add>, %55, %cst_35 [2] : vector<2x8x8xf32> to vector<2x8xf32>
    %57 = vector.shape_cast %56 : vector<2x8xf32> to vector<2x8x1xf32>
    %58 = tpu.reciprocal %57 {approx = true} : vector<2x8x1xf32> -> vector<2x8x1xf32>
    %59 = vector.broadcast %58 : vector<2x8x1xf32> to vector<2x8x8xf32>
    %60 = arith.mulf %55, %59 : vector<2x8x8xf32>
    %c0_36 = arith.constant 0 : index
    %c0_37 = arith.constant 0 : index
    %c0_38 = arith.constant 0 : index
    %c0_39 = arith.constant 0 : index
    %c0_40 = arith.constant 0 : index
    %61 = vector.load %arg12[%c0_36, %c0_37, %c0_38, %c0_39, %c0_40] : memref<1x4x2x8x8xf32, #tpu.memory_space<vmem>>, vector<1x1x2x8x8xf32>
    %62 = vector.shape_cast %61 : vector<1x1x2x8x8xf32> to vector<2x8x8xf32>
    %63 = vector.shape_cast %60 : vector<2x8x8xf32> to vector<1x1x2x8x8xf32>
    tpu.vector_store %arg12[%c0_36, %c0_37, %c0_38, %c0_39, %c0_40], %63 {strides = array<i32>} : memref<1x4x2x8x8xf32, #tpu.memory_space<vmem>>, vector<1x1x2x8x8xf32>,
    %64 = arith.truncf %60 : vector<2x8x8xf32> to vector<2x8x8xbf16>
    "tpu.trace_start"() <{level = 10 : i32, message = "bqk,bkd->bqd"}> : () -> ()
    %cst_41 = arith.constant dense<0.000000e+00> : vector<2x8x8xf32>
    %65 = tpu.matmul %64, %46, %cst_41 {dimension_numbers = #tpu.dot_dimension_numbers<[2], [1], [1], [2], [0, 0, 0, 1, 1, 2], [0], [0]>} : vector<2x8x8xbf16>, vector<2x8x8xbf16>, vector<2x8x8xf32> -> vector<2x8x8xf32>
    "tpu.trace_stop"() : () -> ()
    %66 = vector.shape_cast %65 : vector<2x8x8xf32> to vector<16x8xf32>
    %67 = vector.extract_strided_slice %28 {offsets = [0, 8], sizes = [16, 8], strides = [1, 1]} : vector<16x32xbf16> to vector<16x8xbf16>
    %68 = vector.shape_cast %67 : vector<16x8xbf16> to vector<2x8x8xbf16>
    %69 = vector.extract_strided_slice %33 {offsets = [0, 8], sizes = [16, 8], strides = [1, 1]} : vector<16x32xbf16> to vector<16x8xbf16>
    %70 = vector.shape_cast %69 : vector<16x8xbf16> to vector<2x8x8xbf16>
    %71 = vector.extract_strided_slice %38 {offsets = [0, 8], sizes = [16, 8], strides = [1, 1]} : vector<16x32xbf16> to vector<16x8xbf16>
    %72 = vector.shape_cast %71 : vector<16x8xbf16> to vector<2x8x8xbf16>
    "tpu.trace_start"() <{level = 10 : i32, message = "bqd,bkd->bqk"}> : () -> ()
    %cst_42 = arith.constant dense<0.000000e+00> : vector<2x8x8xf32>
    %73 = tpu.matmul %68, %70, %cst_42 {dimension_numbers = #tpu.dot_dimension_numbers<[2], [2], [1], [1], [0, 0, 0, 1, 1, 1], [0], [0]>} : vector<2x8x8xbf16>, vector<2x8x8xbf16>, vector<2x8x8xf32> -> vector<2x8x8xf32>
    "tpu.trace_stop"() : () -> ()
    %cst_43 = arith.constant 0.353553385 : f32
    %74 = vector.broadcast %cst_43 : f32 to vector<2x8x8xf32>
    %75 = arith.mulf %73, %74 : vector<2x8x8xf32>
    %76 = arith.addf %75, %40 : vector<2x8x8xf32>
    %cst_44 = arith.constant dense<0xFF800000> : vector<2x8xf32>
    %77 = vector.multi_reduction <maximumf>, %76, %cst_44 [2] : vector<2x8x8xf32> to vector<2x8xf32>
    %78 = vector.shape_cast %77 : vector<2x8xf32> to vector<2x8x1xf32>
    %79 = vector.broadcast %78 : vector<2x8x1xf32> to vector<2x8x8xf32>
    %80 = arith.subf %76, %79 : vector<2x8x8xf32>
    %81 = math.exp %80 : vector<2x8x8xf32>
    %cst_45 = arith.constant dense<0.000000e+00> : vector<2x8xf32>
    %82 = vector.multi_reduction <add>, %81, %cst_45 [2] : vector<2x8x8xf32> to vector<2x8xf32>
    %83 = vector.shape_cast %82 : vector<2x8xf32> to vector<2x8x1xf32>
    %84 = tpu.reciprocal %83 {approx = true} : vector<2x8x1xf32> -> vector<2x8x1xf32>
    %85 = vector.broadcast %84 : vector<2x8x1xf32> to vector<2x8x8xf32>
    %86 = arith.mulf %81, %85 : vector<2x8x8xf32>
    %c0_46 = arith.constant 0 : index
    %c1_47 = arith.constant 1 : index
    %c0_48 = arith.constant 0 : index
    %c0_49 = arith.constant 0 : index
    %c0_50 = arith.constant 0 : index
    %87 = vector.load %arg12[%c0_46, %c1_47, %c0_48, %c0_49, %c0_50] : memref<1x4x2x8x8xf32, #tpu.memory_space<vmem>>, vector<1x1x2x8x8xf32>
    %88 = vector.shape_cast %87 : vector<1x1x2x8x8xf32> to vector<2x8x8xf32>
    %89 = vector.shape_cast %86 : vector<2x8x8xf32> to vector<1x1x2x8x8xf32>
    tpu.vector_store %arg12[%c0_46, %c1_47, %c0_48, %c0_49, %c0_50], %89 {strides = array<i32>} : memref<1x4x2x8x8xf32, #tpu.memory_space<vmem>>, vector<1x1x2x8x8xf32>,
    %90 = arith.truncf %86 : vector<2x8x8xf32> to vector<2x8x8xbf16>
    "tpu.trace_start"() <{level = 10 : i32, message = "bqk,bkd->bqd"}> : () -> ()
    %cst_51 = arith.constant dense<0.000000e+00> : vector<2x8x8xf32>
    %91 = tpu.matmul %90, %72, %cst_51 {dimension_numbers = #tpu.dot_dimension_numbers<[2], [1], [1], [2], [0, 0, 0, 1, 1, 2], [0], [0]>} : vector<2x8x8xbf16>, vector<2x8x8xbf16>, vector<2x8x8xf32> -> vector<2x8x8xf32>
    "tpu.trace_stop"() : () -> ()
    %92 = vector.shape_cast %91 : vector<2x8x8xf32> to vector<16x8xf32>
    %93 = vector.extract_strided_slice %28 {offsets = [0, 16], sizes = [16, 8], strides = [1, 1]} : vector<16x32xbf16> to vector<16x8xbf16>
    %94 = vector.shape_cast %93 : vector<16x8xbf16> to vector<2x8x8xbf16>
    %95 = vector.extract_strided_slice %33 {offsets = [0, 16], sizes = [16, 8], strides = [1, 1]} : vector<16x32xbf16> to vector<16x8xbf16>
    %96 = vector.shape_cast %95 : vector<16x8xbf16> to vector<2x8x8xbf16>
    %97 = vector.extract_strided_slice %38 {offsets = [0, 16], sizes = [16, 8], strides = [1, 1]} : vector<16x32xbf16> to vector<16x8xbf16>
    %98 = vector.shape_cast %97 : vector<16x8xbf16> to vector<2x8x8xbf16>
    "tpu.trace_start"() <{level = 10 : i32, message = "bqd,bkd->bqk"}> : () -> ()
    %cst_52 = arith.constant dense<0.000000e+00> : vector<2x8x8xf32>
    %99 = tpu.matmul %94, %96, %cst_52 {dimension_numbers = #tpu.dot_dimension_numbers<[2], [2], [1], [1], [0, 0, 0, 1, 1, 1], [0], [0]>} : vector<2x8x8xbf16>, vector<2x8x8xbf16>, vector<2x8x8xf32> -> vector<2x8x8xf32>
    "tpu.trace_stop"() : () -> ()
    %cst_53 = arith.constant 0.353553385 : f32
    %100 = vector.broadcast %cst_53 : f32 to vector<2x8x8xf32>
    %101 = arith.mulf %99, %100 : vector<2x8x8xf32>
    %102 = arith.addf %101, %40 : vector<2x8x8xf32>
    %cst_54 = arith.constant dense<0xFF800000> : vector<2x8xf32>
    %103 = vector.multi_reduction <maximumf>, %102, %cst_54 [2] : vector<2x8x8xf32> to vector<2x8xf32>
    %104 = vector.shape_cast %103 : vector<2x8xf32> to vector<2x8x1xf32>
    %105 = vector.broadcast %104 : vector<2x8x1xf32> to vector<2x8x8xf32>
    %106 = arith.subf %102, %105 : vector<2x8x8xf32>
    %107 = math.exp %106 : vector<2x8x8xf32>
    %cst_55 = arith.constant dense<0.000000e+00> : vector<2x8xf32>
    %108 = vector.multi_reduction <add>, %107, %cst_55 [2] : vector<2x8x8xf32> to vector<2x8xf32>
    %109 = vector.shape_cast %108 : vector<2x8xf32> to vector<2x8x1xf32>
    %110 = tpu.reciprocal %109 {approx = true} : vector<2x8x1xf32> -> vector<2x8x1xf32>
    %111 = vector.broadcast %110 : vector<2x8x1xf32> to vector<2x8x8xf32>
    %112 = arith.mulf %107, %111 : vector<2x8x8xf32>
    %c0_56 = arith.constant 0 : index
    %c2_57 = arith.constant 2 : index
    %c0_58 = arith.constant 0 : index
    %c0_59 = arith.constant 0 : index
    %c0_60 = arith.constant 0 : index
    %113 = vector.load %arg12[%c0_56, %c2_57, %c0_58, %c0_59, %c0_60] : memref<1x4x2x8x8xf32, #tpu.memory_space<vmem>>, vector<1x1x2x8x8xf32>
    %114 = vector.shape_cast %113 : vector<1x1x2x8x8xf32> to vector<2x8x8xf32>
    %115 = vector.shape_cast %112 : vector<2x8x8xf32> to vector<1x1x2x8x8xf32>
    tpu.vector_store %arg12[%c0_56, %c2_57, %c0_58, %c0_59, %c0_60], %115 {strides = array<i32>} : memref<1x4x2x8x8xf32, #tpu.memory_space<vmem>>, vector<1x1x2x8x8xf32>,
    %116 = arith.truncf %112 : vector<2x8x8xf32> to vector<2x8x8xbf16>
    "tpu.trace_start"() <{level = 10 : i32, message = "bqk,bkd->bqd"}> : () -> ()
    %cst_61 = arith.constant dense<0.000000e+00> : vector<2x8x8xf32>
    %117 = tpu.matmul %116, %98, %cst_61 {dimension_numbers = #tpu.dot_dimension_numbers<[2], [1], [1], [2], [0, 0, 0, 1, 1, 2], [0], [0]>} : vector<2x8x8xbf16>, vector<2x8x8xbf16>, vector<2x8x8xf32> -> vector<2x8x8xf32>
    "tpu.trace_stop"() : () -> ()
    %118 = vector.shape_cast %117 : vector<2x8x8xf32> to vector<16x8xf32>
    %119 = vector.extract_strided_slice %28 {offsets = [0, 24], sizes = [16, 8], strides = [1, 1]} : vector<16x32xbf16> to vector<16x8xbf16>
    %120 = vector.shape_cast %119 : vector<16x8xbf16> to vector<2x8x8xbf16>
    %121 = vector.extract_strided_slice %33 {offsets = [0, 24], sizes = [16, 8], strides = [1, 1]} : vector<16x32xbf16> to vector<16x8xbf16>
    %122 = vector.shape_cast %121 : vector<16x8xbf16> to vector<2x8x8xbf16>
    %123 = vector.extract_strided_slice %38 {offsets = [0, 24], sizes = [16, 8], strides = [1, 1]} : vector<16x32xbf16> to vector<16x8xbf16>
    %124 = vector.shape_cast %123 : vector<16x8xbf16> to vector<2x8x8xbf16>
    "tpu.trace_start"() <{level = 10 : i32, message = "bqd,bkd->bqk"}> : () -> ()
    %cst_62 = arith.constant dense<0.000000e+00> : vector<2x8x8xf32>
    %125 = tpu.matmul %120, %122, %cst_62 {dimension_numbers = #tpu.dot_dimension_numbers<[2], [2], [1], [1], [0, 0, 0, 1, 1, 1], [0], [0]>} : vector<2x8x8xbf16>, vector<2x8x8xbf16>, vector<2x8x8xf32> -> vector<2x8x8xf32>
    "tpu.trace_stop"() : () -> ()
    %cst_63 = arith.constant 0.353553385 : f32
    %126 = vector.broadcast %cst_63 : f32 to vector<2x8x8xf32>
    %127 = arith.mulf %125, %126 : vector<2x8x8xf32>
    %128 = arith.addf %127, %40 : vector<2x8x8xf32>
    %cst_64 = arith.constant dense<0xFF800000> : vector<2x8xf32>
    %129 = vector.multi_reduction <maximumf>, %128, %cst_64 [2] : vector<2x8x8xf32> to vector<2x8xf32>
    %130 = vector.shape_cast %129 : vector<2x8xf32> to vector<2x8x1xf32>
    %131 = vector.broadcast %130 : vector<2x8x1xf32> to vector<2x8x8xf32>
    %132 = arith.subf %128, %131 : vector<2x8x8xf32>
    %133 = math.exp %132 : vector<2x8x8xf32>
    %cst_65 = arith.constant dense<0.000000e+00> : vector<2x8xf32>
    %134 = vector.multi_reduction <add>, %133, %cst_65 [2] : vector<2x8x8xf32> to vector<2x8xf32>
    %135 = vector.shape_cast %134 : vector<2x8xf32> to vector<2x8x1xf32>
    %136 = tpu.reciprocal %135 {approx = true} : vector<2x8x1xf32> -> vector<2x8x1xf32>
    %137 = vector.broadcast %136 : vector<2x8x1xf32> to vector<2x8x8xf32>
    %138 = arith.mulf %133, %137 : vector<2x8x8xf32>
    %c0_66 = arith.constant 0 : index
    %c3_67 = arith.constant 3 : index
    %c0_68 = arith.constant 0 : index
    %c0_69 = arith.constant 0 : index
    %c0_70 = arith.constant 0 : index
    %139 = vector.load %arg12[%c0_66, %c3_67, %c0_68, %c0_69, %c0_70] : memref<1x4x2x8x8xf32, #tpu.memory_space<vmem>>, vector<1x1x2x8x8xf32>
    %140 = vector.shape_cast %139 : vector<1x1x2x8x8xf32> to vector<2x8x8xf32>
    %141 = vector.shape_cast %138 : vector<2x8x8xf32> to vector<1x1x2x8x8xf32>
    tpu.vector_store %arg12[%c0_66, %c3_67, %c0_68, %c0_69, %c0_70], %141 {strides = array<i32>} : memref<1x4x2x8x8xf32, #tpu.memory_space<vmem>>, vector<1x1x2x8x8xf32>,
    %142 = arith.truncf %138 : vector<2x8x8xf32> to vector<2x8x8xbf16>
    "tpu.trace_start"() <{level = 10 : i32, message = "bqk,bkd->bqd"}> : () -> ()
    %cst_71 = arith.constant dense<0.000000e+00> : vector<2x8x8xf32>
    %143 = tpu.matmul %142, %124, %cst_71 {dimension_numbers = #tpu.dot_dimension_numbers<[2], [1], [1], [2], [0, 0, 0, 1, 1, 2], [0], [0]>} : vector<2x8x8xbf16>, vector<2x8x8xbf16>, vector<2x8x8xf32> -> vector<2x8x8xf32>
    "tpu.trace_stop"() : () -> ()
    %144 = vector.shape_cast %143 : vector<2x8x8xf32> to vector<16x8xf32>
    %145 = tpu.concatenate %66, %92, %118, %144 in 1 : vector<16x8xf32>, vector<16x8xf32>, vector<16x8xf32>, vector<16x8xf32> -> vector<16x32xf32>
    %146 = arith.truncf %145 : vector<16x32xf32> to vector<16x32xbf16>
    %cst_72 = arith.constant dense<0.000000e+00> : vector<16x32xf32>
    %147 = tpu.matmul %146, %22, %cst_72 {dimension_numbers = #tpu.dot_dimension_numbers<[1], [0], [0], [1], [0, 0, 1, 1], [], []>} : vector<16x32xbf16>, vector<32x32xbf16>, vector<16x32xf32> -> vector<16x32xf32>
    %148 = vector.extract_strided_slice %10 {offsets = [3, 0], sizes = [1, 32], strides = [1, 1]} : vector<15x32xf32> to vector<1x32xf32>
    %149 = vector.broadcast %148 : vector<1x32xf32> to vector<16x32xf32>
    %150 = arith.addf %147, %149 : vector<16x32xf32>
    %151 = arith.addf %150, %4 : vector<16x32xf32>
    %152 = vector.extract_strided_slice %10 {offsets = [4, 0], sizes = [1, 32], strides = [1, 1]} : vector<15x32xf32> to vector<1x32xf32>
    %153 = vector.extract_strided_slice %10 {offsets = [5, 0], sizes = [1, 32], strides = [1, 1]} : vector<15x32xf32> to vector<1x32xf32>
    %cst_73 = arith.constant dense<0.000000e+00> : vector<16xf32>
    %154 = vector.multi_reduction <add>, %151, %cst_73 [1] : vector<16x32xf32> to vector<16xf32>
    %155 = vector.shape_cast %154 : vector<16xf32> to vector<16x1xf32>
    %cst_74 = arith.constant 3.200000e+01 : f32
    %156 = vector.broadcast %cst_74 : f32 to vector<16x1xf32>
    %157 = arith.divf %155, %156 : vector<16x1xf32>
    %158 = vector.broadcast %157 : vector<16x1xf32> to vector<16x32xf32>
    %159 = arith.subf %151, %158 : vector<16x32xf32>
    %160 = arith.mulf %159, %159 : vector<16x32xf32>
    %cst_75 = arith.constant dense<0.000000e+00> : vector<16xf32>
    %161 = vector.multi_reduction <add>, %160, %cst_75 [1] : vector<16x32xf32> to vector<16xf32>
    %162 = vector.shape_cast %161 : vector<16xf32> to vector<16x1xf32>
    %cst_76 = arith.constant 3.200000e+01 : f32
    %163 = vector.broadcast %cst_76 : f32 to vector<16x1xf32>
    %164 = arith.divf %162, %163 : vector<16x1xf32>
    %165 = vector.broadcast %157 : vector<16x1xf32> to vector<16x32xf32>
    %166 = arith.subf %151, %165 : vector<16x32xf32>
    %cst_77 = arith.constant 9.99999974E-6 : f32
    %167 = vector.broadcast %cst_77 : f32 to vector<16x1xf32>
    %168 = arith.addf %164, %167 : vector<16x1xf32>
    %169 = math.rsqrt %168 : vector<16x1xf32>
    %170 = vector.broadcast %169 : vector<16x1xf32> to vector<16x32xf32>
    %171 = arith.mulf %166, %170 : vector<16x32xf32>
    %172 = vector.broadcast %152 : vector<1x32xf32> to vector<16x32xf32>
    %173 = arith.mulf %171, %172 : vector<16x32xf32>
    %174 = vector.broadcast %153 : vector<1x32xf32> to vector<16x32xf32>
    %175 = arith.addf %173, %174 : vector<16x32xf32>
    %c0_78 = arith.constant 0 : index
    %c4 = arith.constant 4 : index
    %c0_79 = arith.constant 0 : index
    %c0_80 = arith.constant 0 : index
    %176 = vector.load %arg6[%c0_78, %c4, %c0_79, %c0_80] : memref<1x8x32x32xbf16, #tpu.memory_space<vmem>>, vector<1x1x32x32xbf16>
    %177 = vector.shape_cast %176 : vector<1x1x32x32xbf16> to vector<32x32xbf16>
    %c0_81 = arith.constant 0 : index
    %c5 = arith.constant 5 : index
    %c0_82 = arith.constant 0 : index
    %c0_83 = arith.constant 0 : index
    %178 = vector.load %arg6[%c0_81, %c5, %c0_82, %c0_83] : memref<1x8x32x32xbf16, #tpu.memory_space<vmem>>, vector<1x1x32x32xbf16>
    %179 = vector.shape_cast %178 : vector<1x1x32x32xbf16> to vector<32x32xbf16>
    %c0_84 = arith.constant 0 : index
    %c6 = arith.constant 6 : index
    %c0_85 = arith.constant 0 : index
    %c0_86 = arith.constant 0 : index
    %180 = vector.load %arg6[%c0_84, %c6, %c0_85, %c0_86] : memref<1x8x32x32xbf16, #tpu.memory_space<vmem>>, vector<1x1x32x32xbf16>
    %181 = vector.shape_cast %180 : vector<1x1x32x32xbf16> to vector<32x32xbf16>
    %c0_87 = arith.constant 0 : index
    %c7 = arith.constant 7 : index
    %c0_88 = arith.constant 0 : index
    %c0_89 = arith.constant 0 : index
    %182 = vector.load %arg6[%c0_87, %c7, %c0_88, %c0_89] : memref<1x8x32x32xbf16, #tpu.memory_space<vmem>>, vector<1x1x32x32xbf16>
    %183 = vector.shape_cast %182 : vector<1x1x32x32xbf16> to vector<32x32xbf16>
    %184 = arith.truncf %175 : vector<16x32xf32> to vector<16x32xbf16>
    %cst_90 = arith.constant dense<0.000000e+00> : vector<16x32xf32>
    %185 = tpu.matmul %184, %177, %cst_90 {dimension_numbers = #tpu.dot_dimension_numbers<[1], [0], [0], [1], [0, 0, 1, 1], [], []>} : vector<16x32xbf16>, vector<32x32xbf16>, vector<16x32xf32> -> vector<16x32xf32>
    %186 = vector.extract_strided_slice %10 {offsets = [6, 0], sizes = [1, 32], strides = [1, 1]} : vector<15x32xf32> to vector<1x32xf32>
    %187 = vector.broadcast %186 : vector<1x32xf32> to vector<16x32xf32>
    %188 = arith.addf %185, %187 : vector<16x32xf32>
    %189 = arith.truncf %188 : vector<16x32xf32> to vector<16x32xbf16>
    %cst_91 = arith.constant dense<0.000000e+00> : vector<16x32xf32>
    %190 = tpu.matmul %6, %179, %cst_91 {dimension_numbers = #tpu.dot_dimension_numbers<[1], [0], [0], [1], [0, 0, 1, 1], [], []>} : vector<16x32xbf16>, vector<32x32xbf16>, vector<16x32xf32> -> vector<16x32xf32>
    %191 = vector.extract_strided_slice %10 {offsets = [7, 0], sizes = [1, 32], strides = [1, 1]} : vector<15x32xf32> to vector<1x32xf32>
    %192 = vector.broadcast %191 : vector<1x32xf32> to vector<16x32xf32>
    %193 = arith.addf %190, %192 : vector<16x32xf32>
    %194 = arith.truncf %193 : vector<16x32xf32> to vector<16x32xbf16>
    %cst_92 = arith.constant dense<0.000000e+00> : vector<16x32xf32>
    %195 = tpu.matmul %6, %181, %cst_92 {dimension_numbers = #tpu.dot_dimension_numbers<[1], [0], [0], [1], [0, 0, 1, 1], [], []>} : vector<16x32xbf16>, vector<32x32xbf16>, vector<16x32xf32> -> vector<16x32xf32>
    %196 = vector.extract_strided_slice %10 {offsets = [8, 0], sizes = [1, 32], strides = [1, 1]} : vector<15x32xf32> to vector<1x32xf32>
    %197 = vector.broadcast %196 : vector<1x32xf32> to vector<16x32xf32>
    %198 = arith.addf %195, %197 : vector<16x32xf32>
    %199 = arith.truncf %198 : vector<16x32xf32> to vector<16x32xbf16>
    %200 = vector.shape_cast %8 : vector<2x1x8xf32> to vector<2x1x8xf32>
    %201 = vector.broadcast %200 : vector<2x1x8xf32> to vector<2x8x8xf32>
    %202 = vector.extract_strided_slice %189 {offsets = [0, 0], sizes = [16, 8], strides = [1, 1]} : vector<16x32xbf16> to vector<16x8xbf16>
    %203 = vector.shape_cast %202 : vector<16x8xbf16> to vector<2x8x8xbf16>
    %204 = vector.extract_strided_slice %194 {offsets = [0, 0], sizes = [16, 8], strides = [1, 1]} : vector<16x32xbf16> to vector<16x8xbf16>
    %205 = vector.shape_cast %204 : vector<16x8xbf16> to vector<2x8x8xbf16>
    %206 = vector.extract_strided_slice %199 {offsets = [0, 0], sizes = [16, 8], strides = [1, 1]} : vector<16x32xbf16> to vector<16x8xbf16>
    %207 = vector.shape_cast %206 : vector<16x8xbf16> to vector<2x8x8xbf16>
    "tpu.trace_start"() <{level = 10 : i32, message = "bqd,bkd->bqk"}> : () -> ()
    %cst_93 = arith.constant dense<0.000000e+00> : vector<2x8x8xf32>
    %208 = tpu.matmul %203, %205, %cst_93 {dimension_numbers = #tpu.dot_dimension_numbers<[2], [2], [1], [1], [0, 0, 0, 1, 1, 1], [0], [0]>} : vector<2x8x8xbf16>, vector<2x8x8xbf16>, vector<2x8x8xf32> -> vector<2x8x8xf32>
    "tpu.trace_stop"() : () -> ()
    %cst_94 = arith.constant 0.353553385 : f32
    %209 = vector.broadcast %cst_94 : f32 to vector<2x8x8xf32>
    %210 = arith.mulf %208, %209 : vector<2x8x8xf32>
    %211 = arith.addf %210, %201 : vector<2x8x8xf32>
    %cst_95 = arith.constant dense<0xFF800000> : vector<2x8xf32>
    %212 = vector.multi_reduction <maximumf>, %211, %cst_95 [2] : vector<2x8x8xf32> to vector<2x8xf32>
    %213 = vector.shape_cast %212 : vector<2x8xf32> to vector<2x8x1xf32>
    %214 = vector.broadcast %213 : vector<2x8x1xf32> to vector<2x8x8xf32>
    %215 = arith.subf %211, %214 : vector<2x8x8xf32>
    %216 = math.exp %215 : vector<2x8x8xf32>
    %cst_96 = arith.constant dense<0.000000e+00> : vector<2x8xf32>
    %217 = vector.multi_reduction <add>, %216, %cst_96 [2] : vector<2x8x8xf32> to vector<2x8xf32>
    %218 = vector.shape_cast %217 : vector<2x8xf32> to vector<2x8x1xf32>
    %219 = tpu.reciprocal %218 {approx = true} : vector<2x8x1xf32> -> vector<2x8x1xf32>
    %220 = vector.broadcast %219 : vector<2x8x1xf32> to vector<2x8x8xf32>
    %221 = arith.mulf %216, %220 : vector<2x8x8xf32>
    %c0_97 = arith.constant 0 : index
    %c0_98 = arith.constant 0 : index
    %c0_99 = arith.constant 0 : index
    %c0_100 = arith.constant 0 : index
    %c0_101 = arith.constant 0 : index
    %222 = vector.load %arg13[%c0_97, %c0_98, %c0_99, %c0_100, %c0_101] : memref<1x4x2x8x8xf32, #tpu.memory_space<vmem>>, vector<1x1x2x8x8xf32>
    %223 = vector.shape_cast %222 : vector<1x1x2x8x8xf32> to vector<2x8x8xf32>
    %224 = vector.shape_cast %221 : vector<2x8x8xf32> to vector<1x1x2x8x8xf32>
    tpu.vector_store %arg13[%c0_97, %c0_98, %c0_99, %c0_100, %c0_101], %224 {strides = array<i32>} : memref<1x4x2x8x8xf32, #tpu.memory_space<vmem>>, vector<1x1x2x8x8xf32>,
    %225 = arith.truncf %221 : vector<2x8x8xf32> to vector<2x8x8xbf16>
    "tpu.trace_start"() <{level = 10 : i32, message = "bqk,bkd->bqd"}> : () -> ()
    %cst_102 = arith.constant dense<0.000000e+00> : vector<2x8x8xf32>
    %226 = tpu.matmul %225, %207, %cst_102 {dimension_numbers = #tpu.dot_dimension_numbers<[2], [1], [1], [2], [0, 0, 0, 1, 1, 2], [0], [0]>} : vector<2x8x8xbf16>, vector<2x8x8xbf16>, vector<2x8x8xf32> -> vector<2x8x8xf32>
    "tpu.trace_stop"() : () -> ()
    %227 = vector.shape_cast %226 : vector<2x8x8xf32> to vector<16x8xf32>
    %228 = vector.extract_strided_slice %189 {offsets = [0, 8], sizes = [16, 8], strides = [1, 1]} : vector<16x32xbf16> to vector<16x8xbf16>
    %229 = vector.shape_cast %228 : vector<16x8xbf16> to vector<2x8x8xbf16>
    %230 = vector.extract_strided_slice %194 {offsets = [0, 8], sizes = [16, 8], strides = [1, 1]} : vector<16x32xbf16> to vector<16x8xbf16>
    %231 = vector.shape_cast %230 : vector<16x8xbf16> to vector<2x8x8xbf16>
    %232 = vector.extract_strided_slice %199 {offsets = [0, 8], sizes = [16, 8], strides = [1, 1]} : vector<16x32xbf16> to vector<16x8xbf16>
    %233 = vector.shape_cast %232 : vector<16x8xbf16> to vector<2x8x8xbf16>
    "tpu.trace_start"() <{level = 10 : i32, message = "bqd,bkd->bqk"}> : () -> ()
    %cst_103 = arith.constant dense<0.000000e+00> : vector<2x8x8xf32>
    %234 = tpu.matmul %229, %231, %cst_103 {dimension_numbers = #tpu.dot_dimension_numbers<[2], [2], [1], [1], [0, 0, 0, 1, 1, 1], [0], [0]>} : vector<2x8x8xbf16>, vector<2x8x8xbf16>, vector<2x8x8xf32> -> vector<2x8x8xf32>
    "tpu.trace_stop"() : () -> ()
    %cst_104 = arith.constant 0.353553385 : f32
    %235 = vector.broadcast %cst_104 : f32 to vector<2x8x8xf32>
    %236 = arith.mulf %234, %235 : vector<2x8x8xf32>
    %237 = arith.addf %236, %201 : vector<2x8x8xf32>
    %cst_105 = arith.constant dense<0xFF800000> : vector<2x8xf32>
    %238 = vector.multi_reduction <maximumf>, %237, %cst_105 [2] : vector<2x8x8xf32> to vector<2x8xf32>
    %239 = vector.shape_cast %238 : vector<2x8xf32> to vector<2x8x1xf32>
    %240 = vector.broadcast %239 : vector<2x8x1xf32> to vector<2x8x8xf32>
    %241 = arith.subf %237, %240 : vector<2x8x8xf32>
    %242 = math.exp %241 : vector<2x8x8xf32>
    %cst_106 = arith.constant dense<0.000000e+00> : vector<2x8xf32>
    %243 = vector.multi_reduction <add>, %242, %cst_106 [2] : vector<2x8x8xf32> to vector<2x8xf32>
    %244 = vector.shape_cast %243 : vector<2x8xf32> to vector<2x8x1xf32>
    %245 = tpu.reciprocal %244 {approx = true} : vector<2x8x1xf32> -> vector<2x8x1xf32>
    %246 = vector.broadcast %245 : vector<2x8x1xf32> to vector<2x8x8xf32>
    %247 = arith.mulf %242, %246 : vector<2x8x8xf32>
    %c0_107 = arith.constant 0 : index
    %c1_108 = arith.constant 1 : index
    %c0_109 = arith.constant 0 : index
    %c0_110 = arith.constant 0 : index
    %c0_111 = arith.constant 0 : index
    %248 = vector.load %arg13[%c0_107, %c1_108, %c0_109, %c0_110, %c0_111] : memref<1x4x2x8x8xf32, #tpu.memory_space<vmem>>, vector<1x1x2x8x8xf32>
    %249 = vector.shape_cast %248 : vector<1x1x2x8x8xf32> to vector<2x8x8xf32>
    %250 = vector.shape_cast %247 : vector<2x8x8xf32> to vector<1x1x2x8x8xf32>
    tpu.vector_store %arg13[%c0_107, %c1_108, %c0_109, %c0_110, %c0_111], %250 {strides = array<i32>} : memref<1x4x2x8x8xf32, #tpu.memory_space<vmem>>, vector<1x1x2x8x8xf32>,
    %251 = arith.truncf %247 : vector<2x8x8xf32> to vector<2x8x8xbf16>
    "tpu.trace_start"() <{level = 10 : i32, message = "bqk,bkd->bqd"}> : () -> ()
    %cst_112 = arith.constant dense<0.000000e+00> : vector<2x8x8xf32>
    %252 = tpu.matmul %251, %233, %cst_112 {dimension_numbers = #tpu.dot_dimension_numbers<[2], [1], [1], [2], [0, 0, 0, 1, 1, 2], [0], [0]>} : vector<2x8x8xbf16>, vector<2x8x8xbf16>, vector<2x8x8xf32> -> vector<2x8x8xf32>
    "tpu.trace_stop"() : () -> ()
    %253 = vector.shape_cast %252 : vector<2x8x8xf32> to vector<16x8xf32>
    %254 = vector.extract_strided_slice %189 {offsets = [0, 16], sizes = [16, 8], strides = [1, 1]} : vector<16x32xbf16> to vector<16x8xbf16>
    %255 = vector.shape_cast %254 : vector<16x8xbf16> to vector<2x8x8xbf16>
    %256 = vector.extract_strided_slice %194 {offsets = [0, 16], sizes = [16, 8], strides = [1, 1]} : vector<16x32xbf16> to vector<16x8xbf16>
    %257 = vector.shape_cast %256 : vector<16x8xbf16> to vector<2x8x8xbf16>
    %258 = vector.extract_strided_slice %199 {offsets = [0, 16], sizes = [16, 8], strides = [1, 1]} : vector<16x32xbf16> to vector<16x8xbf16>
    %259 = vector.shape_cast %258 : vector<16x8xbf16> to vector<2x8x8xbf16>
    "tpu.trace_start"() <{level = 10 : i32, message = "bqd,bkd->bqk"}> : () -> ()
    %cst_113 = arith.constant dense<0.000000e+00> : vector<2x8x8xf32>
    %260 = tpu.matmul %255, %257, %cst_113 {dimension_numbers = #tpu.dot_dimension_numbers<[2], [2], [1], [1], [0, 0, 0, 1, 1, 1], [0], [0]>} : vector<2x8x8xbf16>, vector<2x8x8xbf16>, vector<2x8x8xf32> -> vector<2x8x8xf32>
    "tpu.trace_stop"() : () -> ()
    %cst_114 = arith.constant 0.353553385 : f32
    %261 = vector.broadcast %cst_114 : f32 to vector<2x8x8xf32>
    %262 = arith.mulf %260, %261 : vector<2x8x8xf32>
    %263 = arith.addf %262, %201 : vector<2x8x8xf32>
    %cst_115 = arith.constant dense<0xFF800000> : vector<2x8xf32>
    %264 = vector.multi_reduction <maximumf>, %263, %cst_115 [2] : vector<2x8x8xf32> to vector<2x8xf32>
    %265 = vector.shape_cast %264 : vector<2x8xf32> to vector<2x8x1xf32>
    %266 = vector.broadcast %265 : vector<2x8x1xf32> to vector<2x8x8xf32>
    %267 = arith.subf %263, %266 : vector<2x8x8xf32>
    %268 = math.exp %267 : vector<2x8x8xf32>
    %cst_116 = arith.constant dense<0.000000e+00> : vector<2x8xf32>
    %269 = vector.multi_reduction <add>, %268, %cst_116 [2] : vector<2x8x8xf32> to vector<2x8xf32>
    %270 = vector.shape_cast %269 : vector<2x8xf32> to vector<2x8x1xf32>
    %271 = tpu.reciprocal %270 {approx = true} : vector<2x8x1xf32> -> vector<2x8x1xf32>
    %272 = vector.broadcast %271 : vector<2x8x1xf32> to vector<2x8x8xf32>
    %273 = arith.mulf %268, %272 : vector<2x8x8xf32>
    %c0_117 = arith.constant 0 : index
    %c2_118 = arith.constant 2 : index
    %c0_119 = arith.constant 0 : index
    %c0_120 = arith.constant 0 : index
    %c0_121 = arith.constant 0 : index
    %274 = vector.load %arg13[%c0_117, %c2_118, %c0_119, %c0_120, %c0_121] : memref<1x4x2x8x8xf32, #tpu.memory_space<vmem>>, vector<1x1x2x8x8xf32>
    %275 = vector.shape_cast %274 : vector<1x1x2x8x8xf32> to vector<2x8x8xf32>
    %276 = vector.shape_cast %273 : vector<2x8x8xf32> to vector<1x1x2x8x8xf32>
    tpu.vector_store %arg13[%c0_117, %c2_118, %c0_119, %c0_120, %c0_121], %276 {strides = array<i32>} : memref<1x4x2x8x8xf32, #tpu.memory_space<vmem>>, vector<1x1x2x8x8xf32>,
    %277 = arith.truncf %273 : vector<2x8x8xf32> to vector<2x8x8xbf16>
    "tpu.trace_start"() <{level = 10 : i32, message = "bqk,bkd->bqd"}> : () -> ()
    %cst_122 = arith.constant dense<0.000000e+00> : vector<2x8x8xf32>
    %278 = tpu.matmul %277, %259, %cst_122 {dimension_numbers = #tpu.dot_dimension_numbers<[2], [1], [1], [2], [0, 0, 0, 1, 1, 2], [0], [0]>} : vector<2x8x8xbf16>, vector<2x8x8xbf16>, vector<2x8x8xf32> -> vector<2x8x8xf32>
    "tpu.trace_stop"() : () -> ()
    %279 = vector.shape_cast %278 : vector<2x8x8xf32> to vector<16x8xf32>
    %280 = vector.extract_strided_slice %189 {offsets = [0, 24], sizes = [16, 8], strides = [1, 1]} : vector<16x32xbf16> to vector<16x8xbf16>
    %281 = vector.shape_cast %280 : vector<16x8xbf16> to vector<2x8x8xbf16>
    %282 = vector.extract_strided_slice %194 {offsets = [0, 24], sizes = [16, 8], strides = [1, 1]} : vector<16x32xbf16> to vector<16x8xbf16>
    %283 = vector.shape_cast %282 : vector<16x8xbf16> to vector<2x8x8xbf16>
    %284 = vector.extract_strided_slice %199 {offsets = [0, 24], sizes = [16, 8], strides = [1, 1]} : vector<16x32xbf16> to vector<16x8xbf16>
    %285 = vector.shape_cast %284 : vector<16x8xbf16> to vector<2x8x8xbf16>
    "tpu.trace_start"() <{level = 10 : i32, message = "bqd,bkd->bqk"}> : () -> ()
    %cst_123 = arith.constant dense<0.000000e+00> : vector<2x8x8xf32>
    %286 = tpu.matmul %281, %283, %cst_123 {dimension_numbers = #tpu.dot_dimension_numbers<[2], [2], [1], [1], [0, 0, 0, 1, 1, 1], [0], [0]>} : vector<2x8x8xbf16>, vector<2x8x8xbf16>, vector<2x8x8xf32> -> vector<2x8x8xf32>
    "tpu.trace_stop"() : () -> ()
    %cst_124 = arith.constant 0.353553385 : f32
    %287 = vector.broadcast %cst_124 : f32 to vector<2x8x8xf32>
    %288 = arith.mulf %286, %287 : vector<2x8x8xf32>
    %289 = arith.addf %288, %201 : vector<2x8x8xf32>
    %cst_125 = arith.constant dense<0xFF800000> : vector<2x8xf32>
    %290 = vector.multi_reduction <maximumf>, %289, %cst_125 [2] : vector<2x8x8xf32> to vector<2x8xf32>
    %291 = vector.shape_cast %290 : vector<2x8xf32> to vector<2x8x1xf32>
    %292 = vector.broadcast %291 : vector<2x8x1xf32> to vector<2x8x8xf32>
    %293 = arith.subf %289, %292 : vector<2x8x8xf32>
    %294 = math.exp %293 : vector<2x8x8xf32>
    %cst_126 = arith.constant dense<0.000000e+00> : vector<2x8xf32>
    %295 = vector.multi_reduction <add>, %294, %cst_126 [2] : vector<2x8x8xf32> to vector<2x8xf32>
    %296 = vector.shape_cast %295 : vector<2x8xf32> to vector<2x8x1xf32>
    %297 = tpu.reciprocal %296 {approx = true} : vector<2x8x1xf32> -> vector<2x8x1xf32>
    %298 = vector.broadcast %297 : vector<2x8x1xf32> to vector<2x8x8xf32>
    %299 = arith.mulf %294, %298 : vector<2x8x8xf32>
    %c0_127 = arith.constant 0 : index
    %c3_128 = arith.constant 3 : index
    %c0_129 = arith.constant 0 : index
    %c0_130 = arith.constant 0 : index
    %c0_131 = arith.constant 0 : index
    %300 = vector.load %arg13[%c0_127, %c3_128, %c0_129, %c0_130, %c0_131] : memref<1x4x2x8x8xf32, #tpu.memory_space<vmem>>, vector<1x1x2x8x8xf32>
    %301 = vector.shape_cast %300 : vector<1x1x2x8x8xf32> to vector<2x8x8xf32>
    %302 = vector.shape_cast %299 : vector<2x8x8xf32> to vector<1x1x2x8x8xf32>
    tpu.vector_store %arg13[%c0_127, %c3_128, %c0_129, %c0_130, %c0_131], %302 {strides = array<i32>} : memref<1x4x2x8x8xf32, #tpu.memory_space<vmem>>, vector<1x1x2x8x8xf32>,
    %303 = arith.truncf %299 : vector<2x8x8xf32> to vector<2x8x8xbf16>
    "tpu.trace_start"() <{level = 10 : i32, message = "bqk,bkd->bqd"}> : () -> ()
    %cst_132 = arith.constant dense<0.000000e+00> : vector<2x8x8xf32>
    %304 = tpu.matmul %303, %285, %cst_132 {dimension_numbers = #tpu.dot_dimension_numbers<[2], [1], [1], [2], [0, 0, 0, 1, 1, 2], [0], [0]>} : vector<2x8x8xbf16>, vector<2x8x8xbf16>, vector<2x8x8xf32> -> vector<2x8x8xf32>
    "tpu.trace_stop"() : () -> ()
    %305 = vector.shape_cast %304 : vector<2x8x8xf32> to vector<16x8xf32>
    %306 = tpu.concatenate %227, %253, %279, %305 in 1 : vector<16x8xf32>, vector<16x8xf32>, vector<16x8xf32>, vector<16x8xf32> -> vector<16x32xf32>
    %307 = arith.truncf %306 : vector<16x32xf32> to vector<16x32xbf16>
    %cst_133 = arith.constant dense<0.000000e+00> : vector<16x32xf32>
    %308 = tpu.matmul %307, %183, %cst_133 {dimension_numbers = #tpu.dot_dimension_numbers<[1], [0], [0], [1], [0, 0, 1, 1], [], []>} : vector<16x32xbf16>, vector<32x32xbf16>, vector<16x32xf32> -> vector<16x32xf32>
    %309 = vector.extract_strided_slice %10 {offsets = [9, 0], sizes = [1, 32], strides = [1, 1]} : vector<15x32xf32> to vector<1x32xf32>
    %310 = vector.broadcast %309 : vector<1x32xf32> to vector<16x32xf32>
    %311 = arith.addf %308, %310 : vector<16x32xf32>
    %312 = arith.addf %311, %175 : vector<16x32xf32>
    %313 = vector.extract_strided_slice %10 {offsets = [10, 0], sizes = [1, 32], strides = [1, 1]} : vector<15x32xf32> to vector<1x32xf32>
    %314 = vector.extract_strided_slice %10 {offsets = [11, 0], sizes = [1, 32], strides = [1, 1]} : vector<15x32xf32> to vector<1x32xf32>
    %cst_134 = arith.constant dense<0.000000e+00> : vector<16xf32>
    %315 = vector.multi_reduction <add>, %312, %cst_134 [1] : vector<16x32xf32> to vector<16xf32>
    %316 = vector.shape_cast %315 : vector<16xf32> to vector<16x1xf32>
    %cst_135 = arith.constant 3.200000e+01 : f32
    %317 = vector.broadcast %cst_135 : f32 to vector<16x1xf32>
    %318 = arith.divf %316, %317 : vector<16x1xf32>
    %319 = vector.broadcast %318 : vector<16x1xf32> to vector<16x32xf32>
    %320 = arith.subf %312, %319 : vector<16x32xf32>
    %321 = arith.mulf %320, %320 : vector<16x32xf32>
    %cst_136 = arith.constant dense<0.000000e+00> : vector<16xf32>
    %322 = vector.multi_reduction <add>, %321, %cst_136 [1] : vector<16x32xf32> to vector<16xf32>
    %323 = vector.shape_cast %322 : vector<16xf32> to vector<16x1xf32>
    %cst_137 = arith.constant 3.200000e+01 : f32
    %324 = vector.broadcast %cst_137 : f32 to vector<16x1xf32>
    %325 = arith.divf %323, %324 : vector<16x1xf32>
    %326 = vector.broadcast %318 : vector<16x1xf32> to vector<16x32xf32>
    %327 = arith.subf %312, %326 : vector<16x32xf32>
    %cst_138 = arith.constant 9.99999974E-6 : f32
    %328 = vector.broadcast %cst_138 : f32 to vector<16x1xf32>
    %329 = arith.addf %325, %328 : vector<16x1xf32>
    %330 = math.rsqrt %329 : vector<16x1xf32>
    %331 = vector.broadcast %330 : vector<16x1xf32> to vector<16x32xf32>
    %332 = arith.mulf %327, %331 : vector<16x32xf32>
    %333 = vector.broadcast %313 : vector<1x32xf32> to vector<16x32xf32>
    %334 = arith.mulf %332, %333 : vector<16x32xf32>
    %335 = vector.broadcast %314 : vector<1x32xf32> to vector<16x32xf32>
    %336 = arith.addf %334, %335 : vector<16x32xf32>
    %337 = arith.truncf %336 : vector<16x32xf32> to vector<16x32xbf16>
    %c0_139 = arith.constant 0 : index
    %c0_140 = arith.constant 0 : index
    %c0_141 = arith.constant 0 : index
    %338 = vector.load %arg7[%c0_139, %c0_140, %c0_141] : memref<1x32x64xbf16, #tpu.memory_space<vmem>>, vector<1x32x64xbf16>
    %339 = vector.shape_cast %338 : vector<1x32x64xbf16> to vector<32x64xbf16>
    %cst_142 = arith.constant dense<0.000000e+00> : vector<16x64xf32>
    %340 = tpu.matmul %337, %339, %cst_142 {dimension_numbers = #tpu.dot_dimension_numbers<[1], [0], [0], [1], [0, 0, 1, 1], [], []>} : vector<16x32xbf16>, vector<32x64xbf16>, vector<16x64xf32> -> vector<16x64xf32>
    %341 = vector.broadcast %12 : vector<1x64xf32> to vector<16x64xf32>
    %342 = arith.addf %340, %341 : vector<16x64xf32>
    %cst_143 = arith.constant 0.000000e+00 : f32
    %343 = vector.broadcast %cst_143 : f32 to vector<16x64xf32>
    %344 = arith.maximumf %342, %343 : vector<16x64xf32>
    %345 = arith.truncf %344 : vector<16x64xf32> to vector<16x64xbf16>
    %c0_144 = arith.constant 0 : index
    %c0_145 = arith.constant 0 : index
    %c0_146 = arith.constant 0 : index
    %346 = vector.load %arg8[%c0_144, %c0_145, %c0_146] : memref<1x64x32xbf16, #tpu.memory_space<vmem>>, vector<1x64x32xbf16>
    %347 = vector.shape_cast %346 : vector<1x64x32xbf16> to vector<64x32xbf16>
    %cst_147 = arith.constant dense<0.000000e+00> : vector<16x32xf32>
    %348 = tpu.matmul %345, %347, %cst_147 {dimension_numbers = #tpu.dot_dimension_numbers<[1], [0], [0], [1], [0, 0, 1, 1], [], []>} : vector<16x64xbf16>, vector<64x32xbf16>, vector<16x32xf32> -> vector<16x32xf32>
    %349 = vector.extract_strided_slice %10 {offsets = [12, 0], sizes = [1, 32], strides = [1, 1]} : vector<15x32xf32> to vector<1x32xf32>
    %350 = vector.broadcast %349 : vector<1x32xf32> to vector<16x32xf32>
    %351 = arith.addf %348, %350 : vector<16x32xf32>
    %352 = arith.addf %351, %336 : vector<16x32xf32>
    %353 = vector.extract_strided_slice %10 {offsets = [13, 0], sizes = [1, 32], strides = [1, 1]} : vector<15x32xf32> to vector<1x32xf32>
    %354 = vector.extract_strided_slice %10 {offsets = [14, 0], sizes = [1, 32], strides = [1, 1]} : vector<15x32xf32> to vector<1x32xf32>
    %cst_148 = arith.constant dense<0.000000e+00> : vector<16xf32>
    %355 = vector.multi_reduction <add>, %352, %cst_148 [1] : vector<16x32xf32> to vector<16xf32>
    %356 = vector.shape_cast %355 : vector<16xf32> to vector<16x1xf32>
    %cst_149 = arith.constant 3.200000e+01 : f32
    %357 = vector.broadcast %cst_149 : f32 to vector<16x1xf32>
    %358 = arith.divf %356, %357 : vector<16x1xf32>
    %359 = vector.broadcast %358 : vector<16x1xf32> to vector<16x32xf32>
    %360 = arith.subf %352, %359 : vector<16x32xf32>
    %361 = arith.mulf %360, %360 : vector<16x32xf32>
    %cst_150 = arith.constant dense<0.000000e+00> : vector<16xf32>
    %362 = vector.multi_reduction <add>, %361, %cst_150 [1] : vector<16x32xf32> to vector<16xf32>
    %363 = vector.shape_cast %362 : vector<16xf32> to vector<16x1xf32>
    %cst_151 = arith.constant 3.200000e+01 : f32
    %364 = vector.broadcast %cst_151 : f32 to vector<16x1xf32>
    %365 = arith.divf %363, %364 : vector<16x1xf32>
    %366 = vector.broadcast %358 : vector<16x1xf32> to vector<16x32xf32>
    %367 = arith.subf %352, %366 : vector<16x32xf32>
    %cst_152 = arith.constant 9.99999974E-6 : f32
    %368 = vector.broadcast %cst_152 : f32 to vector<16x1xf32>
    %369 = arith.addf %365, %368 : vector<16x1xf32>
    %370 = math.rsqrt %369 : vector<16x1xf32>
    %371 = vector.broadcast %370 : vector<16x1xf32> to vector<16x32xf32>
    %372 = arith.mulf %367, %371 : vector<16x32xf32>
    %373 = vector.broadcast %353 : vector<1x32xf32> to vector<16x32xf32>
    %374 = arith.mulf %372, %373 : vector<16x32xf32>
    %375 = vector.broadcast %354 : vector<1x32xf32> to vector<16x32xf32>
    %376 = arith.addf %374, %375 : vector<16x32xf32>
    %377 = vector.shape_cast %376 : vector<16x32xf32> to vector<2x8x32xf32>
    %c0_153 = arith.constant 0 : index
    %c0_154 = arith.constant 0 : index
    %c0_155 = arith.constant 0 : index
    %378 = vector.load %arg14[%c0_153, %c0_154, %c0_155] : memref<2x8x32xf32, #tpu.memory_space<vmem>>, vector<2x8x32xf32>
    tpu.vector_store %arg14[%c0_153, %c0_154, %c0_155], %377 {strides = array<i32>} : memref<2x8x32xf32, #tpu.memory_space<vmem>>, vector<2x8x32xf32>,
    %c1_i32 = arith.constant 1 : i32
    %379 = arith.cmpi eq, %arg1, %c1_i32 : i32
    %380 = arith.extui %379 : i1 to i32
    %c0_i32_156 = arith.constant 0 : i32
    %381 = arith.cmpi ne, %380, %c0_i32_156 : i32
    scf.if %381 {
      %382 = vector.shape_cast %376 : vector<16x32xf32> to vector<2x8x32xf32>
      %c0_157 = arith.constant 0 : index
      %c0_158 = arith.constant 0 : index
      %c0_159 = arith.constant 0 : index
      %383 = vector.load %arg11[%c0_157, %c0_158, %c0_159] : memref<2x8x32xf32, #tpu.memory_space<vmem>>, vector<2x8x32xf32>
      tpu.vector_store %arg11[%c0_157, %c0_158, %c0_159], %382 {strides = array<i32>} : memref<2x8x32xf32, #tpu.memory_space<vmem>>, vector<2x8x32xf32>,
    } else {
    }
    return
  }
  func.func @transform_0(%arg0: i32, %arg1: i32) -> (i32, i32, i32) {
    %c0_i32 = arith.constant 0 : i32
    %c0_i32_0 = arith.constant 0 : i32
    %c0_i32_1 = arith.constant 0 : i32
    return %arg0, %c0_i32, %c0_i32_0 : i32, i32, i32
  }
  func.func @transform_1(%arg0: i32, %arg1: i32) -> (i32, i32, i32) {
    %c0_i32 = arith.constant 0 : i32
    %c0_i32_0 = arith.constant 0 : i32
    %c0_i32_1 = arith.constant 0 : i32
    return %arg0, %c0_i32, %c0_i32_0 : i32, i32, i32
  }
  func.func @transform_2(%arg0: i32, %arg1: i32) -> (i32, i32) {
    %c0_i32 = arith.constant 0 : i32
    %c0_i32_0 = arith.constant 0 : i32
    %c0_i32_1 = arith.constant 0 : i32
    return %c0_i32, %c0_i32_0 : i32, i32
  }
  func.func @transform_3(%arg0: i32, %arg1: i32) -> (i32, i32, i32) {
    %c0_i32 = arith.constant 0 : i32
    %c0_i32_0 = arith.constant 0 : i32
    %c0_i32_1 = arith.constant 0 : i32
    return %arg0, %c0_i32, %c0_i32_0 : i32, i32, i32
  }
  func.func @transform_4(%arg0: i32, %arg1: i32) -> (i32, i32, i32, i32) {
    %c0_i32 = arith.constant 0 : i32
    %c0_i32_0 = arith.constant 0 : i32
    %c0_i32_1 = arith.constant 0 : i32
    %c0_i32_2 = arith.constant 0 : i32
    return %arg1, %c0_i32, %c0_i32_0, %c0_i32_1 : i32, i32, i32, i32
  }
  func.func @transform_5(%arg0: i32, %arg1: i32) -> (i32, i32, i32) {
    %c0_i32 = arith.constant 0 : i32
    %c0_i32_0 = arith.constant 0 : i32
    %c0_i32_1 = arith.constant 0 : i32
    return %arg1, %c0_i32, %c0_i32_0 : i32, i32, i32
  }
  func.func @transform_6(%arg0: i32, %arg1: i32) -> (i32, i32, i32) {
    %c0_i32 = arith.constant 0 : i32
    %c0_i32_0 = arith.constant 0 : i32
    %c0_i32_1 = arith.constant 0 : i32
    return %arg1, %c0_i32, %c0_i32_0 : i32, i32, i32
  }
  func.func @transform_7(%arg0: i32, %arg1: i32) -> (i32, i32, i32) {
    %c0_i32 = arith.constant 0 : i32
    %c0_i32_0 = arith.constant 0 : i32
    %c0_i32_1 = arith.constant 0 : i32
    return %arg1, %c0_i32, %c0_i32_0 : i32, i32, i32
  }
  func.func @transform_8(%arg0: i32, %arg1: i32) -> (i32, i32, i32) {
    %c0_i32 = arith.constant 0 : i32
    %c0_i32_0 = arith.constant 0 : i32
    %c0_i32_1 = arith.constant 0 : i32
    return %arg1, %c0_i32, %c0_i32_0 : i32, i32, i32
  }
  func.func @transform_9(%arg0: i32, %arg1: i32) -> (i32, i32, i32) {
    %c0_i32 = arith.constant 0 : i32
    %c0_i32_0 = arith.constant 0 : i32
    %c0_i32_1 = arith.constant 0 : i32
    return %arg0, %c0_i32, %c0_i32_0 : i32, i32, i32
  }
  func.func @transform_10(%arg0: i32, %arg1: i32) -> (i32, i32, i32, i32, i32) {
    %c1_i32 = arith.constant 1 : i32
    %0 = arith.muli %arg1, %c1_i32 : i32
    %1 = arith.addi %0, %arg0 : i32
    %c0_i32 = arith.constant 0 : i32
    %c0_i32_0 = arith.constant 0 : i32
    %c0_i32_1 = arith.constant 0 : i32
    %c0_i32_2 = arith.constant 0 : i32
    %c0_i32_3 = arith.constant 0 : i32
    return %1, %c0_i32, %c0_i32_0, %c0_i32_1, %c0_i32_2 : i32, i32, i32, i32, i32
  }
  func.func @transform_11(%arg0: i32, %arg1: i32) -> (i32, i32, i32, i32, i32) {
    %c1_i32 = arith.constant 1 : i32
    %0 = arith.muli %arg1, %c1_i32 : i32
    %1 = arith.addi %0, %arg0 : i32
    %c0_i32 = arith.constant 0 : i32
    %c0_i32_0 = arith.constant 0 : i32
    %c0_i32_1 = arith.constant 0 : i32
    %c0_i32_2 = arith.constant 0 : i32
    %c0_i32_3 = arith.constant 0 : i32
    return %1, %c0_i32, %c0_i32_0, %c0_i32_1, %c0_i32_2 : i32, i32, i32, i32, i32
  }
}

</mosaic_0001>

<bundles_post_ra>
// kernel: decoder_forward.1
= control target key start
LH: loop header
LB: loop body
LE: loop exit
PB: predicated region body
PF: predicated region fallthrough
CT: control target
= control target key end

     0   :  { %s6110_s0 = inlined_call_operand.hbm [shape: f32[2,8,32], index: 0, kind: input, shape index: {}]   ;;  %s6111_s1 = inlined_call_operand.hbm [shape: bf16[2,8,32], index: 1, kind: input, shape index: {}]   ;;  %s6112_s2 = inlined_call_operand.hbm [shape: f32[8,8], index: 2, kind: input, shape index: {}]   ;;  %s6113_s3 = inlined_call_operand.hbm [shape: f32[2,1,8], index: 3, kind: input, shape index: {}]   ;;  %s6114_s4 = inlined_call_operand.hbm [shape: bf16[2,8,32,32], index: 4, kind: input, shape index: {}]   ;;  %s6115_s5 = inlined_call_operand.hbm [shape: bf16[2,32,64], index: 5, kind: input, shape index: {}]   ;;  %s6116_s6 = inlined_call_operand.hbm [shape: bf16[2,64,32], index: 6, kind: input, shape index: {}]   ;;  %s6117_s7 = inlined_call_operand.hbm [shape: f32[2,15,32], index: 7, kind: input, shape index: {}]   ;;  %s6118_s8 = inlined_call_operand.hbm [shape: f32[2,1,64], index: 8, kind: input, shape index: {}]   ;;  %s6119_s9 = inlined_call_operand.hbm [shape: f32[2,8,32], index: 9, kind: output, shape index: {0}]   ;;  %s6120_s10 = inlined_call_operand.hbm [shape: f32[2,4,2,8,8], index: 10, kind: output, shape index: {1}]   ;;  %s6121_s11 = inlined_call_operand.hbm [shape: f32[2,4,2,8,8], index: 11, kind: output, shape index: {2}]  }
   0x1   :  { %6156 = sst [smem:[#allocation33_spill]] %s6110_s0 }
   0x2   :  { %6157 = sst [smem:[#allocation34_spill]] %s6111_s1 }
   0x3   :  { %6158 = sst [smem:[#allocation35_spill]] %s6114_s4 }
   0x4   :  { %6159 = sst [smem:[#allocation36_spill]] %s6115_s5 }
   0x5   :  { %6160 = sst [smem:[#allocation37_spill]] %s6119_s9 }
   0x6   :  { %6161 = sst [smem:[#allocation38_spill]] %s6120_s10 }
   0x7   :  { %6162 = sst [smem:[#allocation39_spill]] %s6121_s11 }
   0x8   :  { %17 = vsyncpa [#allocation4], 0 }
   0x9   :  { %18 = vsyncpa [#allocation7], 0 }
   0xa   :  { %19 = vsyncpa [#allocation10], 0 }
   0xb   :  { %20 = vsyncpa [#allocation5], 0 }
   0xc   :  { %21 = vsyncpa [#allocation18], 0 }
   0xd   :  { %23 = vsyncpa [#allocation18 + $0x1], 0  ;;  %s5017_s17 = smov 0   ;;  %s5019_s18 = smov 0  }
   0xe   :  { %s5021_s19 = smov 0   ;;  %s5023_s20 = smov 0  }
   0xf   :  { %s5025_s21 = smov 0   ;;  %s5027_s22 = smov 0  }
  0x10 LB: > { %6163 = sst [smem:[#allocation26_spill]] %s4912_s18  ;;  %s5046_s23 = sadd.s32 4294967295, %s4928_s22   ;;  %s4928_s22 = sphi %s5027_s22, %s29_s22   ;;  %s4924_s21 = sphi %s5025_s21, %s6233_s21   ;;  %s4920_s20 = sphi %s5023_s20, %s6232_s20   ;;  %s4916_s19 = sphi %s5021_s19, %s6231_s19   ;;  %s4912_s18 = sphi %s5019_s18, %s6230_s18   ;;  %s4908_s17 = sphi %s5017_s17, %s6227_s17  }
  0x11   : > { %6164 = sst [smem:[#allocation27_spill]] %s4920_s20  ;;  %s6122_s24 = sadd.s32 4294967294, %s4928_s22  }
  0x12   : > { %6165 = sst [smem:[#allocation28_spill]] %s5046_s23  ;;  %p154_p0 = scmp.ne.s32.totalorder %s4916_s19, %s4912_s18 }
  0x13   : > { %p155_p1 = scmp.eq.s32.totalorder %s4928_s22, 0  ;;  %p160_p2 = scmp.ne.s32.totalorder %s4912_s18, %s4908_s17 }
  0x14   : > { %p6128_p3 = scmp.eq.s32.totalorder %s5046_s23, 0  ;;  %p6127_p4 = scmp.eq.s32.totalorder %s5046_s23, 1 }
  0x15   : > { %p5056_p5 = por %p155_p1, %p154_p0  ;;  %p322_p6 = scmp.eq.s32.totalorder %s6122_s24, 1 }
  0x16   : > { %p5064_p7 = por %p6128_p3, %p160_p2  ;;  %p5070_p8 = por %p6127_p4, %p154_p0 }
  0x17   : > { %s6166_s26 = scalar_select %p5056_p5, 1, 0 }
  0x18   : > { %s6167_s27 = scalar_select %p5064_p7, 1, 0 }
  0x19   : > { %s6169_s28 = scalar_select %p5070_p8, 1, 0 }
  0x1a   : > { %6168 = sst [smem:[#allocation29_spill]] %s6167_s27  ;;  %p5074_p9 = por %p322_p6, %p160_p2 }
  0x1b   : > { %6170 = sst [smem:[#allocation30_spill]] %s6169_s28  ;;  %p3683_p10 = scmp.ge.s32.totalorder %s4928_s22, 1 }
  0x1c   : > { %s6171_s29 = scalar_select %p5074_p9, 1, 0 }
  0x1d   : > { %p357_p11 = scmp.lt.s32.totalorder %s4928_s22, 3  ;;  %s4930_s12 = smov [#allocation3]  }
  0x1e   : > { %6172 = sst [smem:[#allocation31_spill]] %s6171_s29  ;;  %s372_s13 = sshll.u32 %s4930_s12, 4  ;;  %s373_s13 = int_to_ptr.vmem [resolvable:$true] %s372_s13 }
  0x1f   : > { %p5080_p12 = pnand %p3683_p10, %p357_p11  ;;  %s38_s15 = sadd.s32 1, %s4924_s21 }
  0x20   : > { %p5094_p2 = scmp.ge.s32.totalorder %s38_s15, 2  ;;  %s6176_s0 = sld [smem:[#allocation33_spill]] }
  0x21   : > { %s6173_s30 = scalar_select %p5080_p12, 1, 0 }
  0x22   : > { %p4269_p13 = pneg %p5080_p12 }
  0x23   : > { %s6175_s16 = scalar_select %p5094_p2, 1, 0 }
  0x24   : > { %p5089_p1 = pnand %p4269_p13, %p6128_p3 }
  0x26   : > { %s6174_s14 = scalar_select %p5089_p1, 1, 0 }
  0x27   : > { %s4514_s25 = scalar_lea.hbm %s6176_s0, 256  ;;  %p5106_p10 = pneg %p5089_p1 }
  0x28   : > { %p4515_p6 = scmp.ne.s32.totalorder %s6176_s0, %s4514_s25  ;;  %p4521_p0 = scmp.lt.u32.totalorder %s4514_s25, %s6176_s0 }
  0x29   : > { %s6177_s9 = scalar_select %p5106_p10, 1, 0 }
  0x2a   : > { %p4517_p11 = pnand %p5106_p10, %p4515_p6 }
  0x2c   : > { %p4518_p13 = pneg %p4517_p11 }
  0x2e   : > { %p4523_p4 = pnand %p4521_p0, %p4518_p13 }
  0x30   : > { %4526 = shalt.err (!%p4523_p4)
}
  0x31   : > { %s4527_s24 = scalar_lea.vmem %s373_s13, 256  ;;  %p4535_p7 = scmp.lt.s32.totalorder %s373_s13, %s373_s13 }
  0x32   : > { %p4528_p3 = scmp.ne.s32.totalorder %s373_s13, %s4527_s24  ;;  %p4536_p12 = scmp.lt.s32.totalorder %s4527_s24, %s4527_s24 }
  0x34   : > { %p4530_p9 = pnand %p4528_p3, %p5106_p10  ;;  %p4537_p5 = por %p4536_p12, %p4535_p7 }
  0x36   : > { %p4531_p8 = pneg %p4530_p9 }
  0x38   : > { %p4538_p2 = pnand %p4537_p5, %p4531_p8 }
  0x3a   : > { %4541 = shalt.err (!%p4538_p2)
}
  0x3b   : > { %s6141_s29 = smov 128   ;;  %s6142_s10 = smov 8  }
  0x3c   : > { %4272 = dma.hbm_to_vmem [thread:$0]  (!%p5089_p1), %s6176_s0, 256, %s373_s13, [#allocation4], %s6141_s29, %s6141_s29, %s6142_s10  }
  0x3d   : > { %p6178_p3 = scmp.ne.s32.totalorder %s6175_s16, 0  ;;  %p4309_p4 = scmp.lt.s32.totalorder %s4928_s22, 2 }
  0x3e   : > { %s429_s17 = sand.u32 1, %s4928_s22   ;;  %s5134_s24 = sand.u32 1, %s4916_s19  }
  0x3f   : > { %s6235_s15 = smov (%p6178_p3, %s38_s15), 0  ;;  %s3689_s28 = sshll.u32 %s5134_s24, 7 }
  0x40   : > { %6179 = sst [smem:[#allocation32_spill]] %s6235_s15  ;;  %s144_s12 = ssub.s32 %s4924_s21, %s6235_s15 }
  0x41   : > { %p145_p5 = scmp.eq.s32.totalorder %s144_s12, 0  ;;  %s3845_s20 = sshll.u32 %s4924_s21, 11 }
  0x42   : > { %s6180_s27 = sadd.s32 1, %s4916_s19  ;;  %s6181_s4 = sld [smem:[#allocation35_spill]] }
  0x43   : > { %s5141_s18 = scalar_select %p145_p5, %s4916_s19, %s6180_s27  }
  0x44   : > { %s433_s16 = scalar_lea.vmem [#allocation11], %s3689_s28  ;;  %p6182_p7 = scmp.ne.s32.totalorder %s6166_s26, 0 }
  0x45   : > { %s440_s25 = sshll.u32 %s433_s16, 4  ;;  %s6147_s27 = sshll.u32 %s5134_s24, 4  ;;  %s5154_s25 = int_to_ptr.vmem [resolvable:$true] %s440_s25 }
  0x46   : > { %p5150_p8 = pnand %p4309_p4, %p6182_p7  ;;  %s5157_s29 = scalar_lea.sflag [#allocation4], %s429_s17 }
  0x48   : > { %s5146_s13 = scalar_lea.hbm %s6181_s4, %s3845_s20  ;;  %p5163_p12 = pneg %p5150_p8 }
  0x49   : > { %s6183_s12 = scalar_select %p5150_p8, 1, 0 }
  0x4a   : > { %s4542_s23 = scalar_lea.hbm %s5146_s13, 2048  ;;  %s4547_s11 = scalar_lea.hbm %s6181_s4, 4096 }
  0x4b   : > { %p4543_p9 = scmp.ne.s32.totalorder %s5146_s13, %s4542_s23  ;;  %p4548_p6 = scmp.lt.u32.totalorder %s5146_s13, %s6181_s4 }
  0x4c   : > { %s6184_s20 = scalar_select %p5163_p12, 1, 0 }
  0x4d   : > { %p4545_p0 = pnand %p5163_p12, %p4543_p9  ;;  %p4549_p11 = scmp.lt.u32.totalorder %s4547_s11, %s4542_s23 }
  0x4e   : > { %p4551_p3 = scmp.lt.u32.totalorder %s4542_s23, %s5146_s13 }
  0x4f   : > { %p4546_p2 = pneg %p4545_p0  ;;  %p4550_p13 = por %p4549_p11, %p4548_p6 }
  0x51   : > { %p4552_p4 = por %p4551_p3, %p4550_p13 }
  0x53   : > { %p4553_p5 = pnand %p4552_p4, %p4546_p2 }
  0x55   : > { %4556 = shalt.err (!%p4553_p5)
}
  0x56   : > { %s4557_s17 = scalar_lea.vmem %s5154_s25, 2048  ;;  %s4933_s26 = smov [#allocation11]  }
  0x57   : > { %p4558_p7 = scmp.ne.s32.totalorder %s5154_s25, %s4557_s17  ;;  %s4562_s28 = sshll.u32 %s4933_s26, 4  ;;  %s4563_s28 = int_to_ptr.vmem [resolvable:$false] %s4562_s28 }
  0x58   : > { %s4564_s10 = scalar_lea.vmem %s4563_s28, 4096  ;;  %p4565_p1 = scmp.lt.s32.totalorder %s5154_s25, %s4563_s28 }
  0x59   : > { %p4560_p9 = pnand %p4558_p7, %p5163_p12  ;;  %p4566_p10 = scmp.lt.s32.totalorder %s4564_s10, %s4557_s17 }
  0x5b   : > { %p4561_p0 = pneg %p4560_p9  ;;  %p4567_p6 = por %p4566_p10, %p4565_p1 }
  0x5d   : > { %p4568_p11 = pnand %p4567_p6, %p4561_p0 }
  0x5f   : > { %4571 = shalt.err (!%p4568_p11)
}
  0x60   : > { %s6148_s23 = smov 64   ;;  %s4935_s11 = smov 4  }
  0x61   : > { %4285 = dma.hbm_to_vmem [thread:$0]  (!%p5150_p8), %s5146_s13, 2048, %s5154_s25, %s5157_s29, %s6148_s23, %s6148_s23, %s4935_s11  }
  0x62   : > { %s6150_s16 = sshll.u32 %s4924_s21, 8  ;;  %s454_s17 = scalar_lea.vmem [#allocation12], %s6147_s27 }
  0x63   : > { %s461_s26 = sshll.u32 %s454_s17, 4  ;;  %s6185_s5 = sld [smem:[#allocation36_spill]]  ;;  %s5200_s26 = int_to_ptr.vmem [resolvable:$true] %s461_s26 }
  0x69   : > { %s5198_s0 = scalar_lea.hbm %s6185_s5, %s6150_s16  ;;  %s4577_s17 = scalar_lea.hbm %s6185_s5, 512 }
  0x6a   : > { %s4572_s4 = scalar_lea.hbm %s5198_s0, 256  ;;  %p4578_p13 = scmp.lt.u32.totalorder %s5198_s0, %s6185_s5 }
  0x6b   : > { %p4573_p1 = scmp.ne.s32.totalorder %s5198_s0, %s4572_s4  ;;  %p4579_p3 = scmp.lt.u32.totalorder %s4577_s17, %s4572_s4 }
  0x6c   : > { %p4581_p5 = scmp.lt.u32.totalorder %s4572_s4, %s5198_s0 }
  0x6d   : > { %p4575_p10 = pnand %p4573_p1, %p5163_p12  ;;  %p4580_p4 = por %p4579_p3, %p4578_p13 }
  0x6f   : > { %p4576_p2 = pneg %p4575_p10  ;;  %p4582_p7 = por %p4581_p5, %p4580_p4 }
  0x71   : > { %p4583_p9 = pnand %p4582_p7, %p4576_p2 }
  0x73   : > { %4586 = shalt.err (!%p4583_p9)
}
  0x74   : > { %s4587_s28 = scalar_lea.vmem %s5200_s26, 256  ;;  %s4936_s10 = smov [#allocation12]  }
  0x75   : > { %p4588_p0 = scmp.ne.s32.totalorder %s5200_s26, %s4587_s28  ;;  %s4592_s13 = sshll.u32 %s4936_s10, 4  ;;  %s4593_s13 = int_to_ptr.vmem [resolvable:$false] %s4592_s13 }
  0x76   : > { %s4594_s27 = scalar_lea.vmem %s4593_s13, 512  ;;  %p4595_p1 = scmp.lt.s32.totalorder %s5200_s26, %s4593_s13 }
  0x77   : > { %p4590_p6 = pnand %p4588_p0, %p5163_p12  ;;  %p4596_p10 = scmp.lt.s32.totalorder %s4594_s27, %s4587_s28 }
  0x79   : > { %p4591_p11 = pneg %p4590_p6  ;;  %p4597_p13 = por %p4596_p10, %p4595_p1 }
  0x7b   : > { %p4598_p3 = pnand %p4597_p13, %p4591_p11 }
  0x7d   : > { %4601 = shalt.err (!%p4598_p3)
}
  0x7e   : > { %s6186_s4 = smov 64   ;;  %s3695_s23 = sshll.u32 %s5134_s24, 5 }
  0x7f   : > { %4288 = dma.hbm_to_vmem [thread:$0]  (!%p5150_p8), %s5198_s0, 256, %s5200_s26, %s5157_s29, %s6186_s4, %s6186_s4, %s4935_s11  }
  0x80   : > { %s3847_s25 = sshll.u32 %s4924_s21, 9  ;;  %s475_s13 = scalar_lea.vmem [#allocation13], %s3695_s23 }
  0x81   : > { %s5232_s28 = scalar_lea.hbm %s6116_s6, %s3847_s25  ;;  %s482_s27 = sshll.u32 %s475_s13, 4  ;;  %s5234_s27 = int_to_ptr.vmem [resolvable:$true] %s482_s27 }
  0x82   : > { %s4937_s16 = smov [#allocation6]   ;;  %s4602_s15 = scalar_lea.hbm %s5232_s28, 512 }
  0x83   : > { %s5236_s5 = sshll.u32 %s4937_s16, 4  ;;  %p4603_p2 = scmp.ne.s32.totalorder %s5232_s28, %s4602_s15  ;;  %s389_s5 = int_to_ptr.vmem [resolvable:$true] %s5236_s5 }
  0x84   : > { %s4607_s25 = scalar_lea.hbm %s6116_s6, 1024  ;;  %p4608_p7 = scmp.lt.u32.totalorder %s5232_s28, %s6116_s6 }
  0x85   : > { %p4605_p4 = pnand %p4603_p2, %p5163_p12  ;;  %p4609_p9 = scmp.lt.u32.totalorder %s4607_s25, %s4602_s15 }
  0x86   : > { %p4611_p6 = scmp.lt.u32.totalorder %s4602_s15, %s5232_s28 }
  0x87   : > { %p4606_p5 = pneg %p4605_p4  ;;  %p4610_p0 = por %p4609_p9, %p4608_p7 }
  0x89   : > { %p4612_p11 = por %p4611_p6, %p4610_p0 }
  0x8b   : > { %p4613_p1 = pnand %p4612_p11, %p4606_p5 }
  0x8d   : > { %4616 = shalt.err (!%p4613_p1)
}
  0x8e   : > { %s4617_s16 = scalar_lea.vmem %s5234_s27, 512  ;;  %s4938_s23 = smov [#allocation13]  }
  0x8f   : > { %p4618_p10 = scmp.ne.s32.totalorder %s5234_s27, %s4617_s16  ;;  %s4622_s13 = sshll.u32 %s4938_s23, 4  ;;  %s4623_s13 = int_to_ptr.vmem [resolvable:$false] %s4622_s13 }
  0x90   : > { %s4624_s0 = scalar_lea.vmem %s4623_s13, 1024  ;;  %p4625_p2 = scmp.lt.s32.totalorder %s5234_s27, %s4623_s13 }
  0x91   : > { %p4620_p13 = pnand %p4618_p10, %p5163_p12  ;;  %p4626_p4 = scmp.lt.s32.totalorder %s4624_s0, %s4617_s16 }
  0x93   : > { %p4621_p3 = pneg %p4620_p13  ;;  %p4627_p7 = por %p4626_p4, %p4625_p2 }
  0x95   : > { %p4628_p9 = pnand %p4627_p7, %p4621_p3 }
  0x97   : > { %4631 = shalt.err (!%p4628_p9)
}
  0x98   : > { %4291 = dma.hbm_to_vmem [thread:$0]  (!%p5150_p8), %s5232_s28, 512, %s5234_s27, %s5157_s29, %s6186_s4, %s6186_s4, %s4935_s11  }
  0x99   : > { %s6187_s1 = sld [smem:[#allocation34_spill]]  ;;  %p6188_p0 = scmp.ne.s32.totalorder %s6177_s9, 0 }
  0x9f   : > { %s4632_s25 = scalar_lea.hbm %s6187_s1, 128 }
  0xa0   : > { %p4633_p5 = scmp.ne.s32.totalorder %s6187_s1, %s4632_s25  ;;  %p4639_p1 = scmp.lt.u32.totalorder %s4632_s25, %s6187_s1 }
  0xa2   : > { %p4635_p6 = pnand %p4633_p5, %p6188_p0 }
  0xa4   : > { %p4636_p11 = pneg %p4635_p6 }
  0xa6   : > { %p4641_p10 = pnand %p4639_p1, %p4636_p11 }
  0xa8   : > { %4644 = shalt.err (!%p4641_p10)
}
  0xa9   : > { %s4645_s13 = scalar_lea.vmem %s389_s5, 128  ;;  %p4653_p4 = scmp.lt.s32.totalorder %s389_s5, %s389_s5 }
  0xaa   : > { %p4646_p13 = scmp.ne.s32.totalorder %s389_s5, %s4645_s13  ;;  %p4654_p7 = scmp.lt.s32.totalorder %s4645_s13, %s4645_s13 }
  0xac   : > { %p4648_p3 = pnand %p4646_p13, %p6188_p0  ;;  %p4655_p9 = por %p4654_p7, %p4653_p4 }
  0xae   : > { %p4649_p2 = pneg %p4648_p3 }
  0xb0   : > { %p4656_p8 = pnand %p4655_p9, %p4649_p2 }
  0xb2   : > { %4659 = shalt.err (!%p4656_p8)
}
  0xb3   : > { %p6189_p5 = scmp.ne.s32.totalorder %s6174_s14, 0  ;;  %s6190_s0 = sshll.u32 %s4924_s21, 8 }
  0xb4   : > { %s5290_s25 = scalar_lea.hbm %s6117_s7, %s6190_s0  ;;  %s6191_s17 = sshll.u32 %s5134_s24, 4 }
  0xb5   : > { %4275 = dma.hbm_to_vmem [thread:$0]  (!%p6189_p5), %s6187_s1, 128, %s389_s5, [#allocation7], %s6186_s4, %s6186_s4, %s4935_s11  }
  0xb6   : > { %s496_s10 = scalar_lea.vmem [#allocation14], %s6191_s17  ;;  %s4660_s23 = scalar_lea.hbm %s5290_s25, 256 }
  0xb7   : > { %s503_s16 = sshll.u32 %s496_s10, 4  ;;  %p4661_p8 = scmp.ne.s32.totalorder %s5290_s25, %s4660_s23  ;;  %s5294_s16 = int_to_ptr.vmem [resolvable:$true] %s503_s16 }
  0xb8   : > { %s4665_s4 = scalar_lea.hbm %s6117_s7, 512  ;;  %p4666_p1 = scmp.lt.u32.totalorder %s5290_s25, %s6117_s7 }
  0xb9   : > { %p4663_p6 = pnand %p4661_p8, %p5163_p12  ;;  %p4667_p10 = scmp.lt.u32.totalorder %s4665_s4, %s4660_s23 }
  0xba   : > { %p4669_p3 = scmp.lt.u32.totalorder %s4660_s23, %s5290_s25 }
  0xbb   : > { %p4664_p11 = pneg %p4663_p6  ;;  %p4668_p13 = por %p4667_p10, %p4666_p1 }
  0xbd   : > { %p4670_p2 = por %p4669_p3, %p4668_p13 }
  0xbf   : > { %p4671_p4 = pnand %p4670_p2, %p4664_p11 }
  0xc1   : > { %4674 = shalt.err (!%p4671_p4)
}
  0xc2   : > { %s4675_s27 = scalar_lea.vmem %s5294_s16, 256  ;;  %s4939_s0 = smov [#allocation14]  }
  0xc3   : > { %p4676_p7 = scmp.ne.s32.totalorder %s5294_s16, %s4675_s27  ;;  %s4680_s15 = sshll.u32 %s4939_s0, 4  ;;  %s4681_s15 = int_to_ptr.vmem [resolvable:$false] %s4680_s15 }
  0xc4   : > { %s4682_s26 = scalar_lea.vmem %s4681_s15, 512  ;;  %p4683_p6 = scmp.lt.s32.totalorder %s5294_s16, %s4681_s15 }
  0xc5   : > { %p4678_p9 = pnand %p4676_p7, %p5163_p12  ;;  %p4684_p5 = scmp.lt.s32.totalorder %s4682_s26, %s4675_s27 }
  0xc7   : > { %p4679_p8 = pneg %p4678_p9  ;;  %p4685_p1 = por %p4684_p5, %p4683_p6 }
  0xc9   : > { %p4686_p10 = pnand %p4685_p1, %p4679_p8 }
  0xcb   : > { %4689 = shalt.err (!%p4686_p10)
}
  0xcc   : > { %p6192_p11 = scmp.ne.s32.totalorder %s6183_s12, 0  ;;  %s6193_s17 = smov 8  }
  0xcd   : > { %s6194_s10 = smov 128   ;;  %s4940_s23 = smov [#allocation8]  }
  0xce   : > { %4294 = dma.hbm_to_vmem [thread:$0]  (!%p6192_p11), %s5290_s25, 256, %s5294_s16, %s5157_s29, %s6194_s10, %s6194_s10, %s6193_s17  }
  0xcf   : > { %s402_s5 = sshll.u32 %s4940_s23, 4  ;;  %s4941_s11 = smov [#allocation9]   ;;  %s403_s5 = int_to_ptr.vmem [resolvable:$true] %s402_s5 }
  0xd0   : > { %s415_s4 = sshll.u32 %s4941_s11, 4  ;;  %s4690_s27 = scalar_lea.hbm %s6112_s2, 128  ;;  %s416_s4 = int_to_ptr.vmem [resolvable:$true] %s415_s4 }
  0xd1   : > { %p4691_p5 = scmp.ne.s32.totalorder %s6112_s2, %s4690_s27  ;;  %p4697_p2 = scmp.lt.u32.totalorder %s4690_s27, %s6112_s2 }
  0xd3   : > { %p4693_p13 = pnand %p4691_p5, %p6188_p0 }
  0xd5   : > { %p4694_p3 = pneg %p4693_p13 }
  0xd7   : > { %p4699_p4 = pnand %p4697_p2, %p4694_p3 }
  0xd9   : > { %4702 = shalt.err (!%p4699_p4)
}
  0xda   : > { %s4703_s25 = scalar_lea.vmem %s403_s5, 128  ;;  %p4711_p6 = scmp.lt.s32.totalorder %s403_s5, %s403_s5 }
  0xdb   : > { %p4704_p7 = scmp.ne.s32.totalorder %s403_s5, %s4703_s25  ;;  %p4712_p1 = scmp.lt.s32.totalorder %s4703_s25, %s4703_s25 }
  0xdd   : > { %p4706_p9 = pnand %p4704_p7, %p6188_p0  ;;  %p4713_p10 = por %p4712_p1, %p4711_p6 }
  0xdf   : > { %p4707_p8 = pneg %p4706_p9 }
  0xe1   : > { %p4714_p11 = pnand %p4713_p10, %p4707_p8 }
  0xe3   : > { %4717 = shalt.err (!%p4714_p11)
}
  0xe4   : > { %p6195_p5 = scmp.ne.s32.totalorder %s6174_s14, 0  ;;  %s4718_s23 = scalar_lea.hbm %s6113_s3, 32 }
  0xe5   : > { %p4719_p13 = scmp.ne.s32.totalorder %s6113_s3, %s4718_s23  ;;  %p4725_p11 = scmp.lt.u32.totalorder %s4718_s23, %s6113_s3 }
  0xe6   : > { %4278 = dma.hbm_to_vmem [thread:$0]  (!%p6195_p5), %s6112_s2, 128, %s403_s5, [#allocation7]  }
  0xe7   : > { %p4721_p3 = pnand %p4719_p13, %p6188_p0 }
  0xe9   : > { %p4722_p2 = pneg %p4721_p3 }
  0xeb   : > { %p4727_p4 = pnand %p4725_p11, %p4722_p2 }
  0xed   : > { %4730 = shalt.err (!%p4727_p4)
}
  0xee   : > { %s4731_s0 = scalar_lea.vmem %s416_s4, 32  ;;  %p4739_p6 = scmp.lt.s32.totalorder %s416_s4, %s416_s4 }
  0xef   : > { %p4732_p7 = scmp.ne.s32.totalorder %s416_s4, %s4731_s0  ;;  %p4740_p1 = scmp.lt.s32.totalorder %s4731_s0, %s4731_s0 }
  0xf1   : > { %p4734_p9 = pnand %p4732_p7, %p6188_p0  ;;  %p4741_p10 = por %p4740_p1, %p4739_p6 }
  0xf3   : > { %p4735_p8 = pneg %p4734_p9 }
  0xf5   : > { %p4742_p12 = pnand %p4741_p10, %p4735_p8 }
  0xf7   : > { %4745 = shalt.err (!%p4742_p12)
}
  0xf8   : > { %s4942_s5 = smov 16   ;;  %s4943_s15 = smov 1  }
  0xf9   : > { %4281 = dma.hbm_to_vmem [thread:$0]  (!%p6195_p5), %s6113_s3, 32, %s416_s4, [#allocation10], %s4942_s5, %s4942_s5, %s4943_s15  }
  0xfa   : > { %s3701_s16 = sshll.u32 %s4924_s21, 4  ;;  %s516_s9 = scalar_lea.vmem [#allocation15], %s5134_s24 }
  0xfb   : > { %s523_s17 = sshll.u32 %s516_s9, 4  ;;  %s521_s23 = scalar_lea.hbm %s6118_s8, %s3701_s16  ;;  %s524_s17 = int_to_ptr.vmem [resolvable:$true] %s523_s17 }
  0xfc   : > { %s4746_s11 = scalar_lea.hbm %s521_s23, 16  ;;  %p6196_p0 = scmp.ne.s32.totalorder %s6184_s20, 0 }
  0xfd   : > { %p4747_p12 = scmp.ne.s32.totalorder %s521_s23, %s4746_s11  ;;  %s4751_s14 = scalar_lea.hbm %s6118_s8, 32 }
  0xfe   : > { %p4752_p5 = scmp.lt.u32.totalorder %s521_s23, %s6118_s8  ;;  %p4753_p2 = scmp.lt.u32.totalorder %s4751_s14, %s4746_s11 }
  0xff   : > { %p4749_p13 = pnand %p4747_p12, %p6196_p0  ;;  %p4755_p4 = scmp.lt.u32.totalorder %s4746_s11, %s521_s23 }
 0x100   : > { %p4754_p11 = por %p4753_p2, %p4752_p5 }
 0x101   : > { %p4750_p3 = pneg %p4749_p13 }
 0x102   : > { %p4756_p7 = por %p4755_p4, %p4754_p11 }
 0x104   : > { %p4757_p9 = pnand %p4756_p7, %p4750_p3 }
 0x106   : > { %4760 = shalt.err (!%p4757_p9)
}
 0x107   : > { %s4761_s24 = scalar_lea.vmem %s524_s17, 16  ;;  %s4944_s4 = smov [#allocation15]  }
 0x108   : > { %p4762_p8 = scmp.ne.s32.totalorder %s524_s17, %s4761_s24  ;;  %s4766_s5 = sshll.u32 %s4944_s4, 4  ;;  %s4767_s5 = int_to_ptr.vmem [resolvable:$false] %s4766_s5 }
 0x109   : > { %s4768_s15 = scalar_lea.vmem %s4767_s5, 32  ;;  %p4769_p10 = scmp.lt.s32.totalorder %s524_s17, %s4767_s5 }
 0x10a   : > { %p4764_p6 = pnand %p4762_p8, %p6196_p0  ;;  %p4770_p12 = scmp.lt.s32.totalorder %s4768_s15, %s4761_s24 }
 0x10c   : > { %p4765_p1 = pneg %p4764_p6  ;;  %p4771_p13 = por %p4770_p12, %p4769_p10 }
 0x10e   : > { %p4772_p2 = pnand %p4771_p13, %p4765_p1 }
 0x110   : > { %4775 = shalt.err (!%p4772_p2)
}
 0x111   : > { %p6197_p5 = scmp.ne.s32.totalorder %s6183_s12, 0  ;;  %p6198_p3 = scmp.ne.s32.totalorder %s6173_s30, 0 }
 0x112   : > { %s6199_s26 = sld [smem:[#allocation28_spill]] (!%p6198_p3) }
 0x113   : > { %4297 = dma.hbm_to_vmem [thread:$0]  (!%p6197_p5), %s521_s23, 16, %s524_s17, %s5157_s29  }
 0x114   : > { %532 = sbr.rel (%p6198_p3) target bundleno = 7661 (0x1ded), region = 56 }
 0x118   : > { %p6200_p11 = scmp.eq.s32.totalorder (!%p6198_p3), %s6199_s26, 0 }
 0x11b   : > { %4883 = dma.done.wait (%p6200_p11), [#allocation4], 256   ;;  %p6201_p0 = pmov %p6200_p11 }
 0x11d   : > { %4885 = vsyncadd (%p6201_p0), [#allocation4], 4294967040  ;;  %p6202_p4 = pmov %p6201_p0 }
 0x11e   : > { %p6203_p7 = pmov %p6201_p0 }
 0x11f   : > { %4887 = dma.done.wait (%p6202_p4), [#allocation7], 256  }
 0x120   : > { %4889 = vsyncadd (%p6203_p7), [#allocation7], 4294967040  ;;  %p6204_p9 = pmov %p6201_p0 }
 0x121   : > { %p6205_p8 = pmov %p6201_p0 }
 0x122   : > { %4891 = dma.done.wait (%p6204_p9), [#allocation10], 32  }
 0x123   : > { %4893 = vsyncadd (%p6205_p8), [#allocation10], 4294967264  ;;  %s6206_s30 = sld [smem:[#allocation26_spill]]  ;;  %s6207_s29 = sld [smem:[#allocation29_spill]] }
 0x124   : > { %s550_s12 = sand.u32 1, %s6199_s26  }
 0x125   : > { %s551_s16 = scalar_lea.sflag [#allocation4], %s550_s12 }
 0x129   : > { %s5391_s20 = sand.u32 1, %s6206_s30   ;;  %p6208_p6 = scmp.ne.s32.totalorder %s6207_s29, 0 }
 0x12a   : > { %s3707_s25 = sshll.u32 %s5391_s20, 7 }
 0x12b   : > { %s5396_s9 = scalar_lea.vmem [#allocation11], %s3707_s25 }
 0x12c   : > { %4895 = dma.done.wait (%p6208_p6), %s551_s16, 3088  }
 0x12d   : > { %4897 = vsyncadd (%p6208_p6), %s551_s16, 4294964208  ;;  %s3708_s17 = sshll.u32 %s5391_s20, 4  ;;  %s3709_s1 = sshll.u32 %s5391_s20, 5 }
 0x12e   : > { %s3711_s10 = sshll.u32 %s5391_s20, 6  ;;  %s5405_s23 = scalar_lea.vmem [#allocation12], %s3708_s17 }
 0x12f   : > { %s5407_s11 = scalar_lea.vmem [#allocation13], %s3709_s1  ;;  %s5409_s13 = scalar_lea.vmem [#allocation14], %s3708_s17 }
 0x130   : > { %s589_s28 = scalar_lea.vmem [#allocation15], %s5391_s20  ;;  %s5412_s14 = scalar_lea.vmem [#allocation17], %s3711_s10 }
 0x131   : > { %s5414_s27 = scalar_lea.vmem [#allocation19], %s3711_s10  ;;  %s6209_s0 = sld [smem:[#allocation27_spill]] }
 0x137   : > { %p3713_p1 = scmp.ne.s32.totalorder %s6209_s0, 0 }
 0x138   : > { %v663_v0 = vld [vmem:[#allocation3] sm:$0xff] (!%p3713_p1)  ;;  %vm665_vm0 = vcmask (!%p3713_p1), 261120   ;;  %v664_v1 = vld [vmem:[#allocation3 + $0x8] sm:$0xff] (!%p3713_p1) }
 0x139   : > { %662 = sbr.rel (%p3713_p1) target bundleno = 320 (0x140), region = 96  ;;  %666 = vst.msk [vmem:[#allocation2] sm:$0xff] (!%p3713_p1), %vm665_vm0, %v663_v0  ;;  %667 = vst.msk [vmem:[#allocation2 + $0x8] sm:$0xff] (!%p3713_p1), %vm665_vm0, %v664_v1 }
 0x140 PF: > { %v4415_v2 = vld [vmem:[%s5396_s9 + $0x10] sm:$0xff]   ;;  %v4945_v3 = vmov 0.0   ;;  %v4416_v4 = vld [vmem:[%s5396_s9 + $0x18] sm:$0xff]   ;;  %v4417_v5 = vld [vmem:[%s5396_s9] sm:$0xff]   ;;  %vm4946_vm1 = vmmov 0   ;;  %vm714_vm2 = vcmask 261120   ;;  %v698_v12 = vlaneseq }
 0x141   : > { %3967 = vmatprep.subr.bf16.mxu1 %v4945_v3  ;;  %3959 = vmatprep.subr.bf16.mxu0 %v4945_v3  ;;  %v5425_v6 = vld [vmem:[#allocation2] sm:$0xff]  ;;  %v5427_v7 = vld [vmem:[#allocation2 + $0x8] sm:$0xff]  ;;  %v4419_v10 = vld [vmem:[%s5396_s9 + $0x20] sm:$0xff]   ;;  %vm891_vm3 = vcmask 64512   ;;  %s4947_s24 = smov 120   ;;  %vm1017_vm4 = vcmask 1043456  }
 0x142   : > { %3968 = vmatpush3.bf16.msra.mxu1 %v4415_v2  ;;  %3971 = vmatprep.mubr.msk.bf16.mxu1 %vm4946_vm1, %v4945_v3  ;;  %v4418_v8 = vld [vmem:[%s5396_s9 + $0x8] sm:$0xff]   ;;  %v678_v9 = vpack.c.bf16 %v5427_v7, %v5425_v6  ;;  %v5450_v13 = vshrl.u32 %v698_v12, 7  ;;  %v5454_v15 = vld [vmem:[%s5409_s13] sm:$0xff]  ;;  %s4948_s4 = smov 112   ;;  %s4949_s5 = smov 104   ;;  %vm1814_vm5 = vcmask 130048  }
 0x143   : > { %3969 = vmatprep.subr.bf16.mxu1 %v4945_v3  ;;  %3963 = vmatprep.mubr.msk.bf16.mxu0 %vm4946_vm1, %v4945_v3  ;;  %v4420_v11 = vld [vmem:[%s5396_s9 + $0x28] sm:$0xff]   ;;  %v5501_v50 = vld [vmem:[#allocation8] sm:$0xff]  ;;  %s4950_s15 = smov 8   ;;  %s4951_s26 = smov 16   ;;  %vm1817_vm6 = vcmask 195584   ;;  %vm3287_vm7 = vcmask 523264  }
 0x144   : > { %3960 = vmatpush3.bf16.msra.mxu0 %v4417_v5  ;;  %v762_v14 = vsub.s32 1, %v5450_v13  ;;  %v700_v17 = vsub.s32 0, %v5450_v13  ;;  %v820_v41 = vsub.s32 2, %v5450_v13  ;;  %s4952_s30 = smov 24   ;;  %s6210_s29 = sld [smem:[#allocation27_spill]] }
 0x145   : > { %3961 = vmatprep.subr.bf16.mxu0 %v4945_v3 }
 0x146   : > { %3970 = vmatpush3.bf16.msra.mxu1 %v4416_v4  ;;  %v763_v16 = vrot.slane %v5454_v15, %v762_v14  ;;  %v701_v21 = vrot.slane %v5454_v15, %v700_v17  ;;  %v821_v42 = vrot.slane %v5454_v15, %v820_v41 }
 0x147   : > { %3983 = vmatprep.subr.bf16.mxu1 %v4945_v3 }
 0x148   : > { %3962 = vmatpush3.bf16.msra.mxu0 %v4418_v8 }
 0x149   : > { %3972 = vmatmul.mubr.msk.bf16.vlgmr.msra.gmra.mrb[0].mxu1 %vm714_vm2, %v678_v9  ;;  %3975 = vmatprep.subr.bf16.mxu0 %v4945_v3 }
 0x14a   : > { %3985 = vmatprep.mubr.msk.bf16.mxu1 %vm4946_vm1, %v4945_v3  ;;  %p3834_p10 = scmp.ne.s32.totalorder %s6210_s29, 1 }
 0x14b   : > { %3964 = vmatmul.mubr.msk.bf16.vlgmr.msra.gmra.mrb[0].mxu0 %vm714_vm2, %v678_v9 }
 0x14c   : > { %3976 = vmatpush3.bf16.msra.mxu0 %v4419_v10  ;;  %3979 = vmatprep.mubr.msk.bf16.mxu0 %vm4946_vm1, %v4945_v3 }
 0x14d   : > { %3977 = vmatprep.subr.bf16.mxu0 %v4945_v3 }
 0x150   : > { %3978 = vmatpush3.bf16.msra.mxu0 %v4420_v11 }
 0x151   : > { %3989 = vmatprep.subr.bf16.mxu0 %v4945_v3 }
 0x153   : > { %3980 = vmatmul.mubr.msk.bf16.vlgmr.msra.gmra.mrb[4].mxu0 %vm714_vm2, %v678_v9 }
 0x154   : > { %3991 = vmatprep.mubr.msk.bf16.mxu0 %vm4946_vm1, %v4945_v3 }
 0x21c   : > { %v810_v18 = vpop.f32.mrb[0].mxu1 }
 0x21d   : > { %v811_v19 = vadd.f32 %v810_v18, %v763_v16  ;;  %v3973_v20 = vpop.f32.mrb[1].mxu1 }
 0x21e   : > { %v813_v22 = vpop.f32.mrb[2].mxu1  ;;  %v752_v23 = vpop.f32.mrb[0].mxu0 }
 0x21f   : > { %v5463_v24 = vpack.c.bf16 %v811_v19, %v811_v19  ;;  %v814_v25 = vadd.f32 %v813_v22, %v763_v16  ;;  %v3974_v26 = vpop.f32.mrb[3].mxu1  ;;  %v3965_v27 = vpop.f32.mrb[1].mxu0  ;;  %v753_v30 = vadd.f32 %v752_v23, %v701_v21 }
 0x220   : > { %v755_v28 = vpop.f32.mrb[2].mxu0 }
 0x221   : > { %v5465_v29 = vpack.c.bf16 %v814_v25, %v814_v25  ;;  %v896_v31 = vsel %vm891_vm3, %v5463_v24, 0  ;;  %v3966_v32 = vpop.f32.mrb[3].mxu0  ;;  %v5474_v34 = vpack.c.bf16 %v753_v30, %v753_v30  ;;  %v756_v35 = vadd.f32 %v755_v28, %v701_v21 }
 0x222   : > { %3984 = vmatpush3.bf16.xpose.msra.mxu1 %v896_v31 }
 0x223   : > { %1159 = vrot.lane.b32.xlu1 %v5465_v29, %s4947_s24  ;;  %v942_v33 = vsel %vm891_vm3, %v5465_v29, 0  ;;  %3995 = vmatprep.subr.bf16.mxu1 %v4945_v3  ;;  %v5477_v39 = vpack.c.bf16 %v756_v35, %v756_v35 }
 0x224   : > { %3990 = vmatpush3.bf16.xpose.msra.mxu0 %v942_v33 }
 0x225   : > { %4001 = vmatprep.subr.bf16.mxu0 %v4945_v3 }
 0x226   : > { %v868_v36 = vpop.f32.mrb[4].mxu0 }
 0x227   : > { %v3981_v37 = vpop.f32.mrb[5].mxu0  ;;  %v869_v43 = vadd.f32 %v868_v36, %v821_v42 }
 0x228   : > { %v871_v38 = vpop.f32.mrb[6].mxu0 }
 0x229   : > { %3986 = vmatmul.mubr.msk.bf16.vlgmr.msra.gmra.mrb[4].mxu1 %vm891_vm3, %v5474_v34  ;;  %v3982_v40 = vpop.f32.mrb[7].mxu0  ;;  %v872_v44 = vadd.f32 %v871_v38, %v821_v42  ;;  %v5491_v45 = vpack.c.bf16 %v869_v43, %v869_v43 }
 0x22a   : > { %3997 = vmatprep.mubr.msk.bf16.mxu1 %vm4946_vm1, %v4945_v3 }
 0x22b   : > { %3992 = vmatmul.mubr.msk.bf16.vlgmr.msra.gmra.mrb[8].mxu0 %vm891_vm3, %v5477_v39  ;;  %v5493_v46 = vpack.c.bf16 %v872_v44, %v872_v44  ;;  %v1019_v47 = vsel %vm1017_vm4, %v5491_v45, 0 }
 0x22c   : > { %4003 = vmatprep.mubr.msk.bf16.mxu0 %vm4946_vm1, %v4945_v3  ;;  %3996 = vmatpush3.bf16.msra.mxu1 %v1019_v47 }
 0x22d   : > { %v1065_v48 = vsel %vm1017_vm4, %v5493_v46, 0  ;;  %4007 = vmatprep.subr.bf16.mxu1 %v4945_v3 }
 0x22e   : > { %4002 = vmatpush3.bf16.msra.mxu0 %v1065_v48 }
 0x22f   : > { %4013 = vmatprep.subr.bf16.mxu0 %v4945_v3 }
 0x295   : > { %v1160_v16 = vpop.permute.xlu1 %1159 }
 0x296   : > { %v1165_v30 = vsel %vm891_vm3, %v1160_v16, 0 }
 0x2fc   : > { %v932_v49 = vpop.f32.mrb[4].mxu1 }
 0x2fd   : > { %v984_v51 = vmul.f32 0.35355338, %v932_v49  ;;  %v3987_v52 = vpop.f32.mrb[5].mxu1 }
 0x2fe   : > { %v935_v53 = vpop.f32.mrb[6].mxu1  ;;  %v978_v54 = vpop.f32.mrb[8].mxu0 }
 0x2ff   : > { %v985_v55 = vmul.f32 0.35355338, %v978_v54  ;;  %v3988_v56 = vpop.f32.mrb[7].mxu1  ;;  %v3993_v57 = vpop.f32.mrb[9].mxu0  ;;  %v986_v58 = vadd.f32 %v984_v51, %v5501_v50 }
 0x300   : > { %v981_v59 = vpop.f32.mrb[10].mxu0 }
 0x301   : > { %v3994_v60 = vpop.f32.mrb[11].mxu0  ;;  %v988_v61 = vsel %vm891_vm3, %v986_v58, -inf  ;;  %v987_v62 = vadd.f32 %v985_v55, %v5501_v50 }
 0x302   : > { %989 = vmax.xlane.f32.xlu0 %v988_v61 }
 0x303   : > { %v991_v63 = vsel %vm891_vm3, %v987_v62, -inf }
 0x306   : > { %992 = vmax.xlane.f32.xlu0 %v991_v63 }
 0x31c   : > { %1109 = vrot.lane.b32.xlu0 %v5463_v24, %s4947_s24 }
 0x38f   : > { %v990_v0 = vpop.xlane.xlu0 %989 }
 0x390   : > { %v994_v1 = vsub.f32 %v986_v58, %v990_v0 }
 0x392   : > { %v996_v2 = vmul.f32 1.442695, %v994_v1 }
 0x393   : > { %v993_v4 = vpop.xlane.xlu0 %992 }
 0x394   : > { %4438 = vpow2.f32 %v996_v2  ;;  %v995_v5 = vsub.f32 %v987_v62, %v993_v4 }
 0x396   : > { %v998_v8 = vmul.f32 1.442695, %v995_v5 }
 0x397   : > { %v1110_v22 = vpop.permute.xlu0 %1109 }
 0x398   : > { %4440 = vpow2.f32 %v998_v8  ;;  %v1115_v26 = vsel %vm891_vm3, %v1110_v22, 0 }
 0x39e   : > { %v4439_v9 = vpop.eup %4438 }
 0x39f   : > { %v1000_v10 = vsel %vm891_vm3, %v4439_v9, 0.0 }
 0x3a0   : > { %1001 = vadd.xlane.f32.xlu1 %v1000_v10 }
 0x3a2   : > { %v4441_v11 = vpop.eup %4440 }
 0x3a3   : > { %v1003_v12 = vsel %vm891_vm3, %v4441_v11, 0.0 }
 0x3a4   : > { %1004 = vadd.xlane.f32.xlu1 %v1003_v12 }
 0x3b5   : > { %1107 = vrot.lane.b32.xlu1 %v5474_v34, %s4947_s24 }
 0x3b9   : > { %1157 = vrot.lane.b32.xlu1 %v5477_v39, %s4947_s24 }
 0x42d   : > { %v1002_v18 = vpop.xlane.xlu1 %1001 }
 0x42e   : > { %4442 = vrcp.f32 %v1002_v18 }
 0x431   : > { %v1005_v19 = vpop.xlane.xlu1 %1004 }
 0x432   : > { %4444 = vrcp.f32 %v1005_v19 }
 0x435   : > { %v1108_v31 = vpop.permute.xlu1 %1107 }
 0x438   : > { %v4443_v20 = vpop.eup %4442 }
 0x439   : > { %v1008_v21 = vmul.f32 %v4443_v20, %v4439_v9  ;;  %v1158_v32 = vpop.permute.xlu1 %1157 }
 0x43b   : > { %1010 = vst.msk [vmem:[%s5412_s14] sm:$0xff] %vm891_vm3, %v1008_v21  ;;  %v1012_v23 = vpack.c.bf16 %v1008_v21, %v1008_v21 }
 0x43c   : > { %v4445_v25 = vpop.eup %4444 }
 0x43d   : > { %v1009_v27 = vmul.f32 %v4445_v25, %v4441_v11  ;;  %3998 = vmatmul.mubr.msk.bf16.vlgmr.msra.gmra.mrb[8].mxu1 %vm891_vm3, %v1012_v23 }
 0x43e   : > { %4008 = vmatpush3.bf16.xpose.msra.mxu1 %v1115_v26  ;;  %4009 = vmatprep.mubr.msk.bf16.mxu1 %vm4946_vm1, %v4945_v3 }
 0x43f   : > { %1011 = vst.msk [vmem:[%s5412_s14 + $0x8] sm:$0xff] %vm891_vm3, %v1009_v27  ;;  %v1013_v28 = vpack.c.bf16 %v1009_v27, %v1009_v27  ;;  %4019 = vmatprep.subr.bf16.mxu1 %v4945_v3 }
 0x441   : > { %4004 = vmatmul.mubr.msk.bf16.vlgmr.msra.gmra.mrb[12].mxu0 %vm891_vm3, %v1013_v28 }
 0x442   : > { %4014 = vmatpush3.bf16.xpose.msra.mxu0 %v1165_v30  ;;  %4015 = vmatprep.mubr.msk.bf16.mxu0 %vm4946_vm1, %v4945_v3 }
 0x443   : > { %4025 = vmatprep.subr.bf16.mxu0 %v4945_v3 }
 0x445   : > { %4010 = vmatmul.mubr.msk.bf16.vlgmr.msra.gmra.mrb[12].mxu1 %vm891_vm3, %v1108_v31 }
 0x446   : > { %4021 = vmatprep.mubr.msk.bf16.mxu1 %vm4946_vm1, %v4945_v3 }
 0x449   : > { %4016 = vmatmul.mubr.msk.bf16.vlgmr.msra.gmra.mrb[16].mxu0 %vm891_vm3, %v1158_v32 }
 0x44a   : > { %4027 = vmatprep.mubr.msk.bf16.mxu0 %vm4946_vm1, %v4945_v3 }
 0x510   : > { %v5535_v33 = vpop.f32.mrb[8].mxu1 }
 0x511   : > { %v3999_v35 = vpop.f32.mrb[9].mxu1 }
 0x512   : > { %v1058_v36 = vpop.f32.mrb[10].mxu1 }
 0x513   : > { %v4000_v37 = vpop.f32.mrb[11].mxu1 }
 0x514   : > { %v5537_v38 = vpop.f32.mrb[12].mxu0 }
 0x515   : > { %v4005_v40 = vpop.f32.mrb[13].mxu0 }
 0x516   : > { %v1104_v42 = vpop.f32.mrb[14].mxu0 }
 0x517   : > { %v4006_v43 = vpop.f32.mrb[15].mxu0 }
 0x518   : > { %v1151_v44 = vpop.f32.mrb[12].mxu1 }
 0x519   : > { %v1207_v47 = vmul.f32 0.35355338, %v1151_v44  ;;  %v4011_v48 = vpop.f32.mrb[13].mxu1 }
 0x51a   : > { %v1154_v49 = vpop.f32.mrb[14].mxu1 }
 0x51b   : > { %v4012_v51 = vpop.f32.mrb[15].mxu1  ;;  %v1209_v52 = vadd.f32 %v1207_v47, %v5501_v50 }
 0x51c   : > { %v1201_v53 = vpop.f32.mrb[16].mxu0 }
 0x51d   : > { %v1208_v54 = vmul.f32 0.35355338, %v1201_v53  ;;  %v4017_v55 = vpop.f32.mrb[17].mxu0  ;;  %v1211_v56 = vsel %vm891_vm3, %v1209_v52, -inf }
 0x51e   : > { %1212 = vmax.xlane.f32.xlu0 %v1211_v56  ;;  %v1204_v57 = vpop.f32.mrb[18].mxu0 }
 0x51f   : > { %v4018_v58 = vpop.f32.mrb[19].mxu0  ;;  %v1210_v59 = vadd.f32 %v1208_v54, %v5501_v50 }
 0x521   : > { %v1214_v60 = vsel %vm891_vm3, %v1210_v59, -inf }
 0x522   : > { %1215 = vmax.xlane.f32.xlu1 %v1214_v60 }
 0x533   : > { %1286 = vrot.lane.b32.xlu1 %v5493_v46, %s4947_s24 }
 0x537   : > { %1336 = vrot.lane.b32.xlu1 %v5463_v24, %s4948_s4 }
 0x53b   : > { %1386 = vrot.lane.b32.xlu1 %v5465_v29, %s4948_s4 }
 0x53f   : > { %1384 = vrot.lane.b32.xlu1 %v5477_v39, %s4948_s4 }
 0x5ab   : > { %v1213_v61 = vpop.xlane.xlu0 %1212 }
 0x5ac   : > { %v1217_v62 = vsub.f32 %v1209_v52, %v1213_v61 }
 0x5ae   : > { %v1219_v63 = vmul.f32 1.442695, %v1217_v62 }
 0x5af   : > { %v1216_v0 = vpop.xlane.xlu1 %1215 }
 0x5b0   : > { %4446 = vpow2.f32 %v1219_v63  ;;  %v1218_v1 = vsub.f32 %v1210_v59, %v1216_v0 }
 0x5b2   : > { %v1221_v2 = vmul.f32 1.442695, %v1218_v1 }
 0x5b3   : > { %v1287_v4 = vpop.permute.xlu1 %1286 }
 0x5b4   : > { %4448 = vpow2.f32 %v1221_v2  ;;  %v1292_v5 = vsel %vm1017_vm4, %v1287_v4, 0 }
 0x5b5   : > { %4026 = vmatpush3.bf16.msra.mxu0 %v1292_v5 }
 0x5b6   : > { %4037 = vmatprep.subr.bf16.mxu0 %v4945_v3 }
 0x5b7   : > { %v1337_v21 = vpop.permute.xlu1 %1336 }
 0x5b8   : > { %v1342_v28 = vsel %vm891_vm3, %v1337_v21, 0 }
 0x5ba   : > { %v4447_v8 = vpop.eup %4446 }
 0x5bb   : > { %v1223_v9 = vsel %vm891_vm3, %v4447_v8, 0.0  ;;  %v1387_v27 = vpop.permute.xlu1 %1386 }
 0x5bc   : > { %1224 = vadd.xlane.f32.xlu0 %v1223_v9  ;;  %v1392_v31 = vsel %vm891_vm3, %v1387_v27, 0 }
 0x5be   : > { %v4449_v10 = vpop.eup %4448 }
 0x5bf   : > { %v1226_v11 = vsel %vm891_vm3, %v4449_v10, 0.0  ;;  %v1385_v35 = vpop.permute.xlu1 %1384 }
 0x5c0   : > { %1227 = vadd.xlane.f32.xlu0 %v1226_v11 }
 0x5d6   : > { %1238 = vrot.lane.b32.xlu0 %v5491_v45, %s4947_s24 }
 0x5da   : > { %1334 = vrot.lane.b32.xlu0 %v5474_v34, %s4948_s4 }
 0x649   : > { %v1225_v12 = vpop.xlane.xlu0 %1224 }
 0x64a   : > { %4450 = vrcp.f32 %v1225_v12 }
 0x64d   : > { %v1228_v16 = vpop.xlane.xlu0 %1227 }
 0x64e   : > { %4452 = vrcp.f32 %v1228_v16 }
 0x651   : > { %v1239_v18 = vpop.permute.xlu0 %1238 }
 0x652   : > { %v1244_v19 = vsel %vm1017_vm4, %v1239_v18, 0 }
 0x653   : > { %4020 = vmatpush3.bf16.msra.mxu1 %v1244_v19 }
 0x654   : > { %v4451_v20 = vpop.eup %4450  ;;  %4031 = vmatprep.subr.bf16.mxu1 %v4945_v3 }
 0x655   : > { %v1231_v22 = vmul.f32 %v4451_v20, %v4447_v8  ;;  %v1335_v32 = vpop.permute.xlu0 %1334 }
 0x657   : > { %3747 = vst.msk [vmem:[%s5412_s14 + $0x10] sm:$0xff] %vm891_vm3, %v1231_v22  ;;  %v1236_v23 = vpack.c.bf16 %v1231_v22, %v1231_v22 }
 0x658   : > { %v4453_v25 = vpop.eup %4452 }
 0x659   : > { %v1232_v26 = vmul.f32 %v4453_v25, %v4449_v10  ;;  %4022 = vmatmul.mubr.msk.bf16.vlgmr.msra.gmra.mrb[16].mxu1 %vm891_vm3, %v1236_v23 }
 0x65a   : > { %4033 = vmatprep.mubr.msk.bf16.mxu1 %vm4946_vm1, %v4945_v3 }
 0x65b   : > { %3748 = vst.msk [vmem:[%s5412_s14 + $0x18] sm:$0xff] %vm891_vm3, %v1232_v26  ;;  %v1237_v30 = vpack.c.bf16 %v1232_v26, %v1232_v26 }
 0x65c   : > { %4032 = vmatpush3.bf16.xpose.msra.mxu1 %v1342_v28 }
 0x65d   : > { %4028 = vmatmul.mubr.msk.bf16.vlgmr.msra.gmra.mrb[20].mxu0 %vm891_vm3, %v1237_v30  ;;  %4043 = vmatprep.subr.bf16.mxu1 %v4945_v3 }
 0x65e   : > { %4038 = vmatpush3.bf16.xpose.msra.mxu0 %v1392_v31  ;;  %4039 = vmatprep.mubr.msk.bf16.mxu0 %vm4946_vm1, %v4945_v3 }
 0x65f   : > { %4049 = vmatprep.subr.bf16.mxu0 %v4945_v3 }
 0x663   : > { %4034 = vmatmul.mubr.msk.bf16.vlgmr.msra.gmra.mrb[20].mxu1 %vm891_vm3, %v1335_v32 }
 0x664   : > { %4045 = vmatprep.mubr.msk.bf16.mxu1 %vm4946_vm1, %v4945_v3 }
 0x665   : > { %4040 = vmatmul.mubr.msk.bf16.vlgmr.msra.gmra.mrb[24].mxu0 %vm891_vm3, %v1385_v35 }
 0x666   : > { %4051 = vmatprep.mubr.msk.bf16.mxu0 %vm4946_vm1, %v4945_v3 }
 0x72c   : > { %v5581_v36 = vpop.f32.mrb[16].mxu1 }
 0x72d   : > { %v4023_v37 = vpop.f32.mrb[17].mxu1 }
 0x72e   : > { %v1283_v40 = vpop.f32.mrb[18].mxu1 }
 0x72f   : > { %v4024_v42 = vpop.f32.mrb[19].mxu1 }
 0x730   : > { %v5583_v43 = vpop.f32.mrb[20].mxu0 }
 0x731   : > { %v4385_v44 = vpack.i.bf16 %v5583_v43, %v5581_v36  ;;  %v4029_v47 = vpop.f32.mrb[21].mxu0 }
 0x732   : > { %v1331_v48 = vpop.f32.mrb[22].mxu0 }
 0x733   : > { %v4030_v49 = vpop.f32.mrb[23].mxu0 }
 0x736   : > { %v1378_v51 = vpop.f32.mrb[20].mxu1 }
 0x737   : > { %v1434_v52 = vmul.f32 0.35355338, %v1378_v51  ;;  %v4035_v53 = vpop.f32.mrb[21].mxu1 }
 0x738   : > { %v1381_v54 = vpop.f32.mrb[22].mxu1  ;;  %v1428_v55 = vpop.f32.mrb[24].mxu0 }
 0x739   : > { %v1435_v56 = vmul.f32 0.35355338, %v1428_v55  ;;  %v4036_v57 = vpop.f32.mrb[23].mxu1  ;;  %v4041_v58 = vpop.f32.mrb[25].mxu0  ;;  %v1436_v59 = vadd.f32 %v1434_v52, %v5501_v50 }
 0x73a   : > { %v1431_v60 = vpop.f32.mrb[26].mxu0 }
 0x73b   : > { %v4042_v61 = vpop.f32.mrb[27].mxu0  ;;  %v1438_v62 = vsel %vm891_vm3, %v1436_v59, -inf  ;;  %v1437_v63 = vadd.f32 %v1435_v56, %v5501_v50 }
 0x73c   : > { %1439 = vmax.xlane.f32.xlu0 %v1438_v62 }
 0x73d   : > { %v1441_v0 = vsel %vm891_vm3, %v1437_v63, -inf }
 0x73e   : > { %1442 = vmax.xlane.f32.xlu1 %v1441_v0 }
 0x74f   : > { %1513 = vrot.lane.b32.xlu1 %v5493_v46, %s4948_s4 }
 0x753   : > { %1563 = vrot.lane.b32.xlu1 %v5463_v24, %s4949_s5 }
 0x757   : > { %1613 = vrot.lane.b32.xlu1 %v5465_v29, %s4949_s5 }
 0x75b   : > { %1611 = vrot.lane.b32.xlu1 %v5477_v39, %s4949_s5 }
 0x7c9   : > { %v1440_v1 = vpop.xlane.xlu0 %1439 }
 0x7ca   : > { %v1444_v2 = vsub.f32 %v1436_v59, %v1440_v1 }
 0x7cb   : > { %v1443_v4 = vpop.xlane.xlu1 %1442 }
 0x7cc   : > { %v1446_v5 = vmul.f32 1.442695, %v1444_v2  ;;  %v1445_v8 = vsub.f32 %v1437_v63, %v1443_v4 }
 0x7ce   : > { %4454 = vpow2.f32 %v1446_v5  ;;  %v1448_v9 = vmul.f32 1.442695, %v1445_v8 }
 0x7cf   : > { %v1514_v10 = vpop.permute.xlu1 %1513 }
 0x7d0   : > { %4456 = vpow2.f32 %v1448_v9  ;;  %v1519_v11 = vsel %vm1017_vm4, %v1514_v10, 0 }
 0x7d1   : > { %4050 = vmatpush3.bf16.msra.mxu0 %v1519_v11 }
 0x7d2   : > { %4061 = vmatprep.subr.bf16.mxu0 %v4945_v3 }
 0x7d3   : > { %v1564_v22 = vpop.permute.xlu1 %1563 }
 0x7d4   : > { %v1569_v28 = vsel %vm891_vm3, %v1564_v22, 0 }
 0x7d8   : > { %v4455_v24 = vpop.eup %4454 }
 0x7d9   : > { %v1450_v29 = vsel %vm891_vm3, %v4455_v24, 0.0 }
 0x7da   : > { %v4457_v12 = vpop.eup %4456  ;;  %1451 = vadd.xlane.f32.xlu0 %v1450_v29 }
 0x7db   : > { %v1453_v39 = vsel %vm891_vm3, %v4457_v12, 0.0 }
 0x7de   : > { %1454 = vadd.xlane.f32.xlu0 %v1453_v39 }
 0x7f4   : > { %1465 = vrot.lane.b32.xlu0 %v5491_v45, %s4948_s4 }
 0x7f8   : > { %1561 = vrot.lane.b32.xlu0 %v5474_v34, %s4949_s5  ;;  %v1614_v34 = vpop.permute.xlu1 %1613 }
 0x7f9   : > { %v1619_v31 = vsel %vm891_vm3, %v1614_v34, 0 }
 0x7fc   : > { %v1612_v35 = vpop.permute.xlu1 %1611 }
 0x867   : > { %v1452_v16 = vpop.xlane.xlu0 %1451 }
 0x868   : > { %4458 = vrcp.f32 %v1452_v16 }
 0x86b   : > { %v1455_v18 = vpop.xlane.xlu0 %1454 }
 0x86c   : > { %4460 = vrcp.f32 %v1455_v18 }
 0x86f   : > { %v1466_v19 = vpop.permute.xlu0 %1465 }
 0x870   : > { %v1471_v20 = vsel %vm1017_vm4, %v1466_v19, 0 }
 0x871   : > { %4044 = vmatpush3.bf16.msra.mxu1 %v1471_v20 }
 0x872   : > { %v4459_v21 = vpop.eup %4458  ;;  %4055 = vmatprep.subr.bf16.mxu1 %v4945_v3 }
 0x873   : > { %v1458_v23 = vmul.f32 %v4459_v21, %v4455_v24  ;;  %v1562_v32 = vpop.permute.xlu0 %1561 }
 0x875   : > { %3753 = vst.msk [vmem:[%s5412_s14 + $0x20] sm:$0xff] %vm891_vm3, %v1458_v23  ;;  %v1463_v25 = vpack.c.bf16 %v1458_v23, %v1458_v23 }
 0x876   : > { %v4461_v26 = vpop.eup %4460 }
 0x877   : > { %v1459_v27 = vmul.f32 %v4461_v26, %v4457_v12  ;;  %4046 = vmatmul.mubr.msk.bf16.vlgmr.msra.gmra.mrb[24].mxu1 %vm891_vm3, %v1463_v25  ;;  %v4421_v25 = vld [vmem:[%s5396_s9 + $0x30] sm:$0xff]   ;;  %v4422_v26 = vld [vmem:[%s5396_s9 + $0x38] sm:$0xff]  }
 0x878   : > { %4057 = vmatprep.mubr.msk.bf16.mxu1 %vm4946_vm1, %v4945_v3 }
 0x879   : > { %3754 = vst.msk [vmem:[%s5412_s14 + $0x28] sm:$0xff] %vm891_vm3, %v1459_v27  ;;  %v1464_v30 = vpack.c.bf16 %v1459_v27, %v1459_v27 }
 0x87a   : > { %4056 = vmatpush3.bf16.xpose.msra.mxu1 %v1569_v28 }
 0x87b   : > { %4052 = vmatmul.mubr.msk.bf16.vlgmr.msra.gmra.mrb[28].mxu0 %vm891_vm3, %v1464_v30  ;;  %4067 = vmatprep.subr.bf16.mxu1 %v4945_v3 }
 0x87c   : > { %4062 = vmatpush3.bf16.xpose.msra.mxu0 %v1619_v31  ;;  %4063 = vmatprep.mubr.msk.bf16.mxu0 %vm4946_vm1, %v4945_v3 }
 0x87d   : > { %4073 = vmatprep.subr.bf16.mxu0 %v4945_v3 }
 0x881   : > { %4058 = vmatmul.mubr.msk.bf16.vlgmr.msra.gmra.mrb[28].mxu1 %vm891_vm3, %v1562_v32 }
 0x882   : > { %4069 = vmatprep.mubr.msk.bf16.mxu1 %vm4946_vm1, %v4945_v3 }
 0x883   : > { %4064 = vmatmul.mubr.msk.bf16.vlgmr.msra.gmra.mrb[32].mxu0 %vm891_vm3, %v1612_v35 }
 0x884   : > { %4075 = vmatprep.mubr.msk.bf16.mxu0 %vm4946_vm1, %v4945_v3 }
 0x94a   : > { %v1507_v37 = vpop.f32.mrb[24].mxu1 }
 0x94b   : > { %v4047_v40 = vpop.f32.mrb[25].mxu1 }
 0x94c   : > { %v1510_v42 = vpop.f32.mrb[26].mxu1 }
 0x94d   : > { %v4048_v47 = vpop.f32.mrb[27].mxu1 }
 0x94e   : > { %v1555_v48 = vpop.f32.mrb[28].mxu0 }
 0x94f   : > { %v4390_v49 = vpack.i.bf16 %v1555_v48, %v1507_v37  ;;  %v4053_v51 = vpop.f32.mrb[29].mxu0 }
 0x950   : > { %v1558_v52 = vpop.f32.mrb[30].mxu0 }
 0x951   : > { %v4054_v53 = vpop.f32.mrb[31].mxu0 }
 0x954   : > { %v1605_v54 = vpop.f32.mrb[28].mxu1 }
 0x955   : > { %v1661_v55 = vmul.f32 0.35355338, %v1605_v54  ;;  %v4059_v56 = vpop.f32.mrb[29].mxu1 }
 0x956   : > { %v1608_v57 = vpop.f32.mrb[30].mxu1  ;;  %v1655_v58 = vpop.f32.mrb[32].mxu0 }
 0x957   : > { %v1662_v59 = vmul.f32 0.35355338, %v1655_v58  ;;  %v4060_v60 = vpop.f32.mrb[31].mxu1  ;;  %v4065_v61 = vpop.f32.mrb[33].mxu0  ;;  %v1663_v62 = vadd.f32 %v1661_v55, %v5501_v50 }
 0x958   : > { %v1658_v63 = vpop.f32.mrb[34].mxu0 }
 0x959   : > { %v4066_v0 = vpop.f32.mrb[35].mxu0  ;;  %v1665_v1 = vsel %vm891_vm3, %v1663_v62, -inf  ;;  %v1664_v2 = vadd.f32 %v1662_v59, %v5501_v50 }
 0x95a   : > { %1666 = vmax.xlane.f32.xlu0 %v1665_v1 }
 0x95b   : > { %v1668_v4 = vsel %vm891_vm3, %v1664_v2, -inf }
 0x95c   : > { %1669 = vmax.xlane.f32.xlu1 %v1668_v4 }
 0x96d   : > { %1740 = vrot.lane.b32.xlu1 %v5493_v46, %s4949_s5 }
 0x971   : > { %4386 = vrot.lane.b32.xlu1 %v4385_v44, %s4950_s15 }
 0x975   : > { %4391 = vrot.lane.b32.xlu1 %v4390_v49, %s4951_s26 }
 0x9e7   : > { %v1667_v5 = vpop.xlane.xlu0 %1666 }
 0x9e8   : > { %v1671_v8 = vsub.f32 %v1663_v62, %v1667_v5 }
 0x9e9   : > { %v1670_v9 = vpop.xlane.xlu1 %1669 }
 0x9ea   : > { %v1673_v50 = vmul.f32 1.442695, %v1671_v8  ;;  %v1672_v10 = vsub.f32 %v1664_v2, %v1670_v9 }
 0x9ec   : > { %4462 = vpow2.f32 %v1673_v50  ;;  %v1675_v11 = vmul.f32 1.442695, %v1672_v10 }
 0x9ed   : > { %v1741_v24 = vpop.permute.xlu1 %1740 }
 0x9ee   : > { %4464 = vpow2.f32 %v1675_v11  ;;  %v1746_v46 = vsel %vm1017_vm4, %v1741_v24, 0 }
 0x9ef   : > { %4074 = vmatpush3.bf16.msra.mxu0 %v1746_v46 }
 0x9f0   : > { %4087 = vmatprep.subr.bf16.mxu0 %v4945_v3 }
 0x9f1   : > { %v4387_v42 = vpop.permute.xlu1 %4386 }
 0x9f2   : > { %v4389_v48 = vunpack.i.h.bf16 %v4387_v42  ;;  %v4388_v49 = vunpack.i.l.bf16 %v4387_v42 }
 0x9f4   : > { %v1813_v54 = vsel %vm891_vm3, %v5537_v38, %v4389_v48  ;;  %v1812_v55 = vsel %vm891_vm3, %v5535_v33, %v4388_v49  ;;  %v1823_v38 = vsub.s32 3, %v5450_v13  ;;  %v4428_v49 = vld [vmem:[%s5396_s9 + $0x60] sm:$0xff]  }
 0x9f5   : > { %v4392_v47 = vpop.permute.xlu1 %4391 }
 0x9f6   : > { %v4463_v29 = vpop.eup %4462  ;;  %v4394_v51 = vunpack.i.h.bf16 %v4392_v47  ;;  %v4393_v52 = vunpack.i.l.bf16 %v4392_v47  ;;  %v1824_v33 = vrot.slane %v5454_v15, %v1823_v38 }
 0x9f7   : > { %v1677_v36 = vsel %vm891_vm3, %v4463_v29, 0.0 }
 0x9f8   : > { %v4465_v43 = vpop.eup %4464  ;;  %1678 = vadd.xlane.f32.xlu0 %v1677_v36  ;;  %v1815_v58 = vsel %vm1814_vm5, %v1812_v55, %v4393_v52  ;;  %v1816_v59 = vsel %vm1814_vm5, %v1813_v54, %v4394_v51  ;;  %v4429_v52 = vld [vmem:[%s5396_s9 + $0x68] sm:$0xff]  }
 0x9f9   : > { %v1680_v44 = vsel %vm891_vm3, %v4465_v43, 0.0 }
 0x9fc   : > { %1681 = vadd.xlane.f32.xlu0 %v1680_v44 }
 0xa12   : > { %1692 = vrot.lane.b32.xlu0 %v5491_v45, %s4949_s5 }
 0xa85   : > { %v1679_v12 = vpop.xlane.xlu0 %1678 }
 0xa86   : > { %4466 = vrcp.f32 %v1679_v12 }
 0xa89   : > { %v1682_v39 = vpop.xlane.xlu0 %1681 }
 0xa8a   : > { %4468 = vrcp.f32 %v1682_v39  ;;  %v4423_v39 = vld [vmem:[%s5396_s9 + $0x50] sm:$0xff]  }
 0xa8d   : > { %v1693_v16 = vpop.permute.xlu0 %1692 }
 0xa8e   : > { %v1698_v18 = vsel %vm1017_vm4, %v1693_v16, 0  ;;  %v4424_v16 = vld [vmem:[%s5396_s9 + $0x58] sm:$0xff]  }
 0xa8f   : > { %4068 = vmatpush3.bf16.msra.mxu1 %v1698_v18  ;;  %v4425_v18 = vld [vmem:[#allocation6] sm:$0xff]  }
 0xa90   : > { %v4467_v19 = vpop.eup %4466  ;;  %4079 = vmatprep.subr.bf16.mxu1 %v4945_v3 }
 0xa91   : > { %v1685_v20 = vmul.f32 %v4467_v19, %v4463_v29  ;;  %v4426_v19 = vld [vmem:[%s5396_s9 + $0x40] sm:$0xff]  }
 0xa93   : > { %3759 = vst.msk [vmem:[%s5412_s14 + $0x30] sm:$0xff] %vm891_vm3, %v1685_v20  ;;  %v1690_v21 = vpack.c.bf16 %v1685_v20, %v1685_v20  ;;  %v4427_v20 = vld [vmem:[%s5396_s9 + $0x48] sm:$0xff]  }
 0xa94   : > { %v4469_v22 = vpop.eup %4468 }
 0xa95   : > { %v1686_v45 = vmul.f32 %v4469_v22, %v4465_v43  ;;  %4070 = vmatmul.mubr.msk.bf16.vlgmr.msra.gmra.mrb[32].mxu1 %vm891_vm3, %v1690_v21 }
 0xa96   : > { %4083 = vmatprep.mubr.msk.bf16.mxu1 %vm4946_vm1, %v4945_v3  ;;  %4080 = vmatpush3.bf16.msra.mxu1 %v4421_v25 }
 0xa97   : > { %3760 = vst.msk [vmem:[%s5412_s14 + $0x38] sm:$0xff] %vm891_vm3, %v1686_v45  ;;  %v1691_v23 = vpack.c.bf16 %v1686_v45, %v1686_v45  ;;  %4081 = vmatprep.subr.bf16.mxu1 %v4945_v3 }
 0xa99   : > { %4076 = vmatmul.mubr.msk.bf16.vlgmr.msra.gmra.mrb[36].mxu0 %vm891_vm3, %v1691_v23 }
 0xa9a   : > { %4091 = vmatprep.mubr.msk.bf16.mxu0 %vm4946_vm1, %v4945_v3  ;;  %4082 = vmatpush3.bf16.msra.mxu1 %v4422_v26 }
 0xa9b   : > { %4095 = vmatprep.subr.bf16.mxu1 %v4945_v3  ;;  %4088 = vmatpush3.bf16.msra.mxu0 %v4426_v19 }
 0xa9c   : > { %4089 = vmatprep.subr.bf16.mxu0 %v4945_v3 }
 0xa9f   : > { %4090 = vmatpush3.bf16.msra.mxu0 %v4427_v20 }
 0xaa0   : > { %4103 = vmatprep.subr.bf16.mxu0 %v4945_v3 }
 0xb68   : > { %v1734_v27 = vpop.f32.mrb[32].mxu1 }
 0xb69   : > { %v4071_v34 = vpop.f32.mrb[33].mxu1 }
 0xb6a   : > { %v1737_v28 = vpop.f32.mrb[34].mxu1 }
 0xb6b   : > { %v4072_v30 = vpop.f32.mrb[35].mxu1 }
 0xb6c   : > { %v1782_v31 = vpop.f32.mrb[36].mxu0 }
 0xb6d   : > { %v4395_v32 = vpack.i.bf16 %v1782_v31, %v1734_v27  ;;  %v4077_v35 = vpop.f32.mrb[37].mxu0  ;;  %v1912_v27 = vsub.s32 4, %v5450_v13  ;;  %v1918_v31 = vsub.s32 5, %v5450_v13 }
 0xb6e   : > { %v1785_v37 = vpop.f32.mrb[38].mxu0 }
 0xb6f   : > { %4396 = vrot.lane.b32.xlu0 %v4395_v32, %s4952_s30  ;;  %v4078_v40 = vpop.f32.mrb[39].mxu0  ;;  %v1913_v28 = vrot.slane %v5454_v15, %v1912_v27 }
 0xb70   : > { %v1919_v40 = vrot.slane %v5454_v15, %v1918_v31 }
 0xbe1   : > { %v4397_v53 = vpop.permute.xlu0 %4396 }
 0xbe2   : > { %v4399_v56 = vunpack.i.h.bf16 %v4397_v53  ;;  %v4398_v57 = vunpack.i.l.bf16 %v4397_v53  ;;  %v2006_v53 = vsub.s32 7, %v5450_v13 }
 0xbe4   : > { %v1819_v60 = vsel %vm1817_vm6, %v1816_v59, %v4399_v56  ;;  %v1818_v61 = vsel %vm1817_vm6, %v1815_v58, %v4398_v57  ;;  %v2007_v54 = vrot.slane %v5454_v15, %v2006_v53 }
 0xbe5   : > { %v1820_v62 = vpack.c.bf16 %v1819_v60, %v1818_v61 }
 0xbe7   : > { %4084 = vmatmul.mubr.msk.bf16.vlgmr.msra.gmra.mrb[36].mxu1 %vm714_vm2, %v1820_v62 }
 0xbe8   : > { %4099 = vmatprep.mubr.msk.bf16.mxu1 %vm4946_vm1, %v4945_v3  ;;  %4096 = vmatpush3.bf16.msra.mxu1 %v4423_v39 }
 0xbe9   : > { %4097 = vmatprep.subr.bf16.mxu1 %v4945_v3 }
 0xbec   : > { %4098 = vmatpush3.bf16.msra.mxu1 %v4424_v16 }
 0xbed   : > { %4111 = vmatprep.subr.bf16.mxu1 %v4945_v3 }
 0xbef   : > { %4100 = vmatmul.mubr.msk.bf16.vlgmr.msra.gmra.mrb[40].mxu1 %vm714_vm2, %v4425_v18 }
 0xbf0   : > { %4113 = vmatprep.mubr.msk.bf16.mxu1 %vm4946_vm1, %v4945_v3 }
 0xcba   : > { %v1874_v63 = vpop.f32.mrb[36].mxu1 }
 0xcbb   : > { %v1875_v0 = vadd.f32 %v1874_v63, %v1824_v33  ;;  %v4085_v1 = vpop.f32.mrb[37].mxu1 }
 0xcbc   : > { %v1877_v2 = vpop.f32.mrb[38].mxu1 }
 0xcbd   : > { %v1878_v4 = vadd.f32 %v1877_v2, %v1824_v33  ;;  %v4086_v5 = vpop.f32.mrb[39].mxu1  ;;  %v1881_v8 = vadd.f32 %v1875_v0, %v5425_v6  ;;  %v1945_v0 = vsub.s32 6, %v5450_v13 }
 0xcbf   : > { %v1883_v9 = vsel %vm714_vm2, %v1881_v8, 0.0  ;;  %v1882_v50 = vadd.f32 %v1878_v4, %v5427_v7  ;;  %v1946_v1 = vrot.slane %v5454_v15, %v1945_v0 }
 0xcc0   : > { %1884 = vadd.xlane.f32.xlu1 %v1883_v9 }
 0xcc1   : > { %v1886_v10 = vsel %vm714_vm2, %v1882_v50, 0.0 }
 0xcc2   : > { %1887 = vadd.xlane.f32.xlu0 %v1886_v10  ;;  %v2062_v55 = vpop.f32.mrb[40].mxu1 }
 0xcc3   : > { %v2063_v56 = vadd.f32 %v2062_v55, %v2007_v54  ;;  %v4101_v57 = vpop.f32.mrb[41].mxu1 }
 0xcc4   : > { %v2065_v58 = vpop.f32.mrb[42].mxu1 }
 0xcc5   : > { %v5721_v59 = vpack.c.bf16 %v2063_v56, %v2063_v56  ;;  %v2066_v60 = vadd.f32 %v2065_v58, %v2007_v54  ;;  %v4102_v61 = vpop.f32.mrb[43].mxu1 }
 0xcc7   : > { %v5723_v62 = vpack.c.bf16 %v2066_v60, %v2066_v60  ;;  %v2159_v33 = vsel %vm891_vm3, %v5721_v59, 0 }
 0xcc8   : > { %4112 = vmatpush3.bf16.xpose.msra.mxu1 %v2159_v33 }
 0xcc9   : > { %v2205_v63 = vsel %vm891_vm3, %v5723_v62, 0  ;;  %4123 = vmatprep.subr.bf16.mxu1 %v4945_v3 }
 0xd4d   : > { %v1885_v11 = vpop.xlane.xlu1 %1884 }
 0xd4e   : > { %v1890_v24 = vmul.f32 0.03125, %v1885_v11 }
 0xd4f   : > { %v1888_v46 = vpop.xlane.xlu0 %1887 }
 0xd50   : > { %v1892_v29 = vsub.f32 %v1881_v8, %v1890_v24  ;;  %v1891_v36 = vmul.f32 0.03125, %v1888_v46 }
 0xd52   : > { %v1893_v43 = vsub.f32 %v1882_v50, %v1891_v36  ;;  %v1894_v44 = vmul.f32 %v1892_v29, %v1892_v29  ;;  %v5748_v36 = vld [vmem:[%s5409_s13 + $0x8] sm:$0x7f] }
 0xd54   : > { %v1896_v6 = vsel %vm714_vm2, %v1894_v44, 0.0  ;;  %v1895_v12 = vmul.f32 %v1893_v43, %v1893_v43 }
 0xd55   : > { %1897 = vadd.xlane.f32.xlu0 %v1896_v6 }
 0xd56   : > { %v1899_v7 = vsel %vm714_vm2, %v1895_v12, 0.0 }
 0xd59   : > { %1900 = vadd.xlane.f32.xlu0 %v1899_v7 }
 0xde2   : > { %v1898_v21 = vpop.xlane.xlu0 %1897 }
 0xde3   : > { %v1902_v22 = vmul.f32 0.03125, %v1898_v21 }
 0xde5   : > { %v1904_v45 = vadd.f32 1e-05, %v1902_v22 }
 0xde6   : > { %v1901_v23 = vpop.xlane.xlu0 %1900 }
 0xde7   : > { %4470 = vrsqrt.f32 %v1904_v45  ;;  %v1903_v25 = vmul.f32 0.03125, %v1901_v23  ;;  %v5765_v45 = vld [vmem:[#allocation9 + $0x1] ss:$0 sm:$0xff] }
 0xde9   : > { %v1905_v26 = vadd.f32 1e-05, %v1903_v25 }
 0xdeb   : > { %4472 = vrsqrt.f32 %v1905_v26 }
 0xdf1   : > { %v4471_v34 = vpop.eup %4470 }
 0xdf2   : > { %v1908_v30 = vmul.f32 %v4471_v34, %v1892_v29 }
 0xdf4   : > { %v1914_v35 = vmul.f32 %v1913_v28, %v1908_v30 }
 0xdf5   : > { %v4473_v32 = vpop.eup %4472 }
 0xdf6   : > { %v1909_v37 = vmul.f32 %v4473_v32, %v1893_v43  ;;  %v5703_v47 = vadd.f32 %v1919_v40, %v1914_v35  ;;  %v2073_v43 = vrot.slane %v5748_v36, %v700_v17  ;;  %v5763_v17 = vld [vmem:[#allocation9] ss:$0 sm:$0xff] }
 0xdf8   : > { %v1915_v42 = vmul.f32 %v1913_v28, %v1909_v37 }
 0xdfa   : > { %v5705_v48 = vadd.f32 %v1919_v40, %v1915_v42 }
 0xdfc   : > { %v1942_v51 = vpack.c.bf16 %v5705_v48, %v5703_v47 }
 0xdfe   : > { %4092 = vmatmul.mubr.msk.bf16.vlgmr.msra.gmra.mrb[40].mxu0 %vm714_vm2, %v1942_v51 }
 0xdff   : > { %4104 = vmatpush3.bf16.msra.mxu0 %v4428_v49  ;;  %4107 = vmatprep.mubr.msk.bf16.mxu0 %vm4946_vm1, %v4945_v3 }
 0xe00   : > { %4105 = vmatprep.subr.bf16.mxu0 %v4945_v3 }
 0xe03   : > { %4106 = vmatpush3.bf16.msra.mxu0 %v4429_v52 }
 0xe04   : > { %4117 = vmatprep.subr.bf16.mxu0 %v4945_v3 }
 0xe06   : > { %4108 = vmatmul.mubr.msk.bf16.vlgmr.msra.gmra.mrb[44].mxu0 %vm714_vm2, %v4425_v18 }
 0xe07   : > { %4119 = vmatprep.mubr.msk.bf16.mxu0 %vm4946_vm1, %v4945_v3 }
 0xe0c   : > { %4118 = vmatpush3.bf16.xpose.msra.mxu0 %v2205_v63 }
 0xe0d   : > { %4129 = vmatprep.subr.bf16.mxu0 %v4945_v3 }
 0xed1   : > { %v1996_v2 = vpop.f32.mrb[40].mxu0 }
 0xed2   : > { %v1997_v4 = vadd.f32 %v1996_v2, %v1946_v1  ;;  %v4093_v5 = vpop.f32.mrb[41].mxu0 }
 0xed3   : > { %v1999_v8 = vpop.f32.mrb[42].mxu0 }
 0xed4   : > { %v5735_v9 = vpack.c.bf16 %v1997_v4, %v1997_v4  ;;  %v2000_v50 = vadd.f32 %v1999_v8, %v1946_v1  ;;  %v4094_v10 = vpop.f32.mrb[43].mxu0 }
 0xed6   : > { %v5737_v11 = vpack.c.bf16 %v2000_v50, %v2000_v50  ;;  %4114 = vmatmul.mubr.msk.bf16.vlgmr.msra.gmra.mrb[44].mxu1 %vm891_vm3, %v5735_v9 }
 0xed7   : > { %4125 = vmatprep.mubr.msk.bf16.mxu1 %vm4946_vm1, %v4945_v3 }
 0xed8   : > { %4120 = vmatmul.mubr.msk.bf16.vlgmr.msra.gmra.mrb[48].mxu0 %vm891_vm3, %v5737_v11 }
 0xed9   : > { %v2120_v15 = vpop.f32.mrb[44].mxu0  ;;  %4131 = vmatprep.mubr.msk.bf16.mxu0 %vm4946_vm1, %v4945_v3 }
 0xeda   : > { %v4109_v24 = vpop.f32.mrb[45].mxu0  ;;  %v2121_v44 = vadd.f32 %v2120_v15, %v2073_v43 }
 0xedb   : > { %v2123_v46 = vpop.f32.mrb[46].mxu0 }
 0xedc   : > { %v4110_v29 = vpop.f32.mrb[47].mxu0  ;;  %v2124_v6 = vadd.f32 %v2123_v46, %v2073_v43  ;;  %v5753_v12 = vpack.c.bf16 %v2121_v44, %v2121_v44 }
 0xede   : > { %v5755_v7 = vpack.c.bf16 %v2124_v6, %v2124_v6  ;;  %v2281_v39 = vsel %vm1017_vm4, %v5753_v12, 0 }
 0xedf   : > { %4124 = vmatpush3.bf16.msra.mxu1 %v2281_v39 }
 0xee0   : > { %v2327_v16 = vsel %vm1017_vm4, %v5755_v7, 0  ;;  %4135 = vmatprep.subr.bf16.mxu1 %v4945_v3 }
 0xee1   : > { %4130 = vmatpush3.bf16.msra.mxu0 %v2327_v16 }
 0xee2   : > { %4141 = vmatprep.subr.bf16.mxu0 %v4945_v3 }
 0xfa9   : > { %v2195_v18 = vpop.f32.mrb[44].mxu1 }
 0xfaa   : > { %v2247_v19 = vmul.f32 0.35355338, %v2195_v18  ;;  %v4115_v20 = vpop.f32.mrb[45].mxu1 }
 0xfab   : > { %v2198_v21 = vpop.f32.mrb[46].mxu1  ;;  %v2241_v22 = vpop.f32.mrb[48].mxu0 }
 0xfac   : > { %v2248_v23 = vmul.f32 0.35355338, %v2241_v22  ;;  %v4116_v25 = vpop.f32.mrb[47].mxu1  ;;  %v4121_v26 = vpop.f32.mrb[49].mxu0  ;;  %v2249_v34 = vadd.f32 %v5763_v17, %v2247_v19 }
 0xfad   : > { %v2244_v28 = vpop.f32.mrb[50].mxu0 }
 0xfae   : > { %v4122_v30 = vpop.f32.mrb[51].mxu0  ;;  %v2251_v32 = vsel %vm891_vm3, %v2249_v34, -inf  ;;  %v2250_v35 = vadd.f32 %v5765_v45, %v2248_v23 }
 0xfaf   : > { %2252 = vmax.xlane.f32.xlu1 %v2251_v32 }
 0xfb0   : > { %v2254_v37 = vsel %vm891_vm3, %v2250_v35, -inf }
 0xfb1   : > { %2255 = vmax.xlane.f32.xlu0 %v2254_v37 }
 0xfc0   : > { %2371 = vrot.lane.b32.xlu1 %v5721_v59, %s4947_s24 }
0x103c   : > { %v2253_v40 = vpop.xlane.xlu1 %2252 }
0x103d   : > { %v2257_v42 = vsub.f32 %v2249_v34, %v2253_v40 }
0x103e   : > { %v2256_v49 = vpop.xlane.xlu0 %2255 }
0x103f   : > { %v2259_v51 = vmul.f32 1.442695, %v2257_v42  ;;  %v2258_v52 = vsub.f32 %v2250_v35, %v2256_v49 }
0x1040   : > { %v2372_v58 = vpop.permute.xlu1 %2371 }
0x1041   : > { %4474 = vpow2.f32 %v2259_v51  ;;  %v2261_v53 = vmul.f32 1.442695, %v2258_v52  ;;  %v2377_v8 = vsel %vm891_vm3, %v2372_v58, 0 }
0x1043   : > { %4476 = vpow2.f32 %v2261_v53 }
0x104b   : > { %v4475_v54 = vpop.eup %4474 }
0x104c   : > { %v2263_v55 = vsel %vm891_vm3, %v4475_v54, 0.0 }
0x104d   : > { %v4477_v56 = vpop.eup %4476  ;;  %2264 = vadd.xlane.f32.xlu1 %v2263_v55 }
0x104e   : > { %v2266_v57 = vsel %vm891_vm3, %v4477_v56, 0.0 }
0x104f   : > { %2267 = vadd.xlane.f32.xlu0 %v2266_v57 }
0x105e   : > { %2369 = vrot.lane.b32.xlu1 %v5735_v9, %s4947_s24 }
0x1062   : > { %2419 = vrot.lane.b32.xlu1 %v5737_v11, %s4947_s24 }
0x1065   : > { %2421 = vrot.lane.b32.xlu0 %v5723_v62, %s4947_s24 }
0x10da   : > { %v2265_v60 = vpop.xlane.xlu1 %2264 }
0x10db   : > { %4478 = vrcp.f32 %v2265_v60 }
0x10dc   : > { %v2268_v61 = vpop.xlane.xlu0 %2267 }
0x10dd   : > { %4480 = vrcp.f32 %v2268_v61 }
0x10de   : > { %v2370_v15 = vpop.permute.xlu1 %2369 }
0x10e0   : > { %v2422_v5 = vpop.permute.xlu0 %2421 }
0x10e1   : > { %v2427_v10 = vsel %vm891_vm3, %v2422_v5, 0 }
0x10e2   : > { %v2420_v24 = vpop.permute.xlu1 %2419 }
0x10e5   : > { %v4479_v33 = vpop.eup %4478 }
0x10e6   : > { %v2271_v63 = vmul.f32 %v4479_v33, %v4475_v54 }
0x10e7   : > { %v4481_v1 = vpop.eup %4480 }
0x10e8   : > { %2273 = vst.msk [vmem:[%s5414_s27] sm:$0xff] %vm891_vm3, %v2271_v63  ;;  %v2272_v2 = vmul.f32 %v4481_v1, %v4477_v56  ;;  %v2275_v4 = vpack.c.bf16 %v2271_v63, %v2271_v63 }
0x10ea   : > { %2274 = vst.msk [vmem:[%s5414_s27 + $0x8] sm:$0xff] %vm891_vm3, %v2272_v2  ;;  %4126 = vmatmul.mubr.msk.bf16.vlgmr.msra.gmra.mrb[48].mxu1 %vm891_vm3, %v2275_v4  ;;  %v2276_v50 = vpack.c.bf16 %v2272_v2, %v2272_v2 }
0x10eb   : > { %4136 = vmatpush3.bf16.xpose.msra.mxu1 %v2377_v8  ;;  %4137 = vmatprep.mubr.msk.bf16.mxu1 %vm4946_vm1, %v4945_v3 }
0x10ec   : > { %4132 = vmatmul.mubr.msk.bf16.vlgmr.msra.gmra.mrb[52].mxu0 %vm891_vm3, %v2276_v50  ;;  %4147 = vmatprep.subr.bf16.mxu1 %v4945_v3 }
0x10ed   : > { %4142 = vmatpush3.bf16.xpose.msra.mxu0 %v2427_v10  ;;  %4143 = vmatprep.mubr.msk.bf16.mxu0 %vm4946_vm1, %v4945_v3 }
0x10ee   : > { %4153 = vmatprep.subr.bf16.mxu0 %v4945_v3 }
0x10f2   : > { %4138 = vmatmul.mubr.msk.bf16.vlgmr.msra.gmra.mrb[52].mxu1 %vm891_vm3, %v2370_v15 }
0x10f3   : > { %4149 = vmatprep.mubr.msk.bf16.mxu1 %vm4946_vm1, %v4945_v3 }
0x10f4   : > { %4144 = vmatmul.mubr.msk.bf16.vlgmr.msra.gmra.mrb[56].mxu0 %vm891_vm3, %v2420_v24 }
0x10f5   : > { %4155 = vmatprep.mubr.msk.bf16.mxu0 %vm4946_vm1, %v4945_v3 }
0x11bd   : > { %v5801_v46 = vpop.f32.mrb[48].mxu1 }
0x11be   : > { %v4127_v29 = vpop.f32.mrb[49].mxu1 }
0x11bf   : > { %v2320_v43 = vpop.f32.mrb[50].mxu1  ;;  %v5803_v44 = vpop.f32.mrb[52].mxu0 }
0x11c0   : > { %v4128_v6 = vpop.f32.mrb[51].mxu1  ;;  %v4133_v39 = vpop.f32.mrb[53].mxu0 }
0x11c1   : > { %v2366_v16 = vpop.f32.mrb[54].mxu0 }
0x11c2   : > { %v4134_v18 = vpop.f32.mrb[55].mxu0 }
0x11c5   : > { %v2413_v19 = vpop.f32.mrb[52].mxu1 }
0x11c6   : > { %v2469_v20 = vmul.f32 0.35355338, %v2413_v19  ;;  %v4139_v21 = vpop.f32.mrb[53].mxu1 }
0x11c7   : > { %v2416_v22 = vpop.f32.mrb[54].mxu1  ;;  %v2463_v23 = vpop.f32.mrb[56].mxu0 }
0x11c8   : > { %v2470_v25 = vmul.f32 0.35355338, %v2463_v23  ;;  %v4140_v26 = vpop.f32.mrb[55].mxu1  ;;  %v4145_v34 = vpop.f32.mrb[57].mxu0  ;;  %v2471_v28 = vadd.f32 %v5763_v17, %v2469_v20 }
0x11c9   : > { %v2466_v30 = vpop.f32.mrb[58].mxu0 }
0x11ca   : > { %v4146_v32 = vpop.f32.mrb[59].mxu0  ;;  %v2473_v35 = vsel %vm891_vm3, %v2471_v28, -inf  ;;  %v2472_v37 = vadd.f32 %v5765_v45, %v2470_v25 }
0x11cb   : > { %2474 = vmax.xlane.f32.xlu1 %v2473_v35 }
0x11cc   : > { %v2476_v40 = vsel %vm891_vm3, %v2472_v37, -inf }
0x11cd   : > { %2477 = vmax.xlane.f32.xlu0 %v2476_v40 }
0x11dc   : > { %2500 = vrot.lane.b32.xlu1 %v5753_v12, %s4947_s24 }
0x11e0   : > { %2598 = vrot.lane.b32.xlu1 %v5721_v59, %s4948_s4 }
0x11e4   : > { %2648 = vrot.lane.b32.xlu1 %v5723_v62, %s4948_s4 }
0x11e8   : > { %2596 = vrot.lane.b32.xlu1 %v5735_v9, %s4948_s4 }
0x1258   : > { %v2475_v42 = vpop.xlane.xlu1 %2474 }
0x1259   : > { %v2479_v49 = vsub.f32 %v2471_v28, %v2475_v42 }
0x125a   : > { %v2478_v51 = vpop.xlane.xlu0 %2477 }
0x125b   : > { %v2481_v52 = vmul.f32 1.442695, %v2479_v49  ;;  %v2480_v53 = vsub.f32 %v2472_v37, %v2478_v51 }
0x125c   : > { %v2501_v54 = vpop.permute.xlu1 %2500 }
0x125d   : > { %4482 = vpow2.f32 %v2481_v52  ;;  %v2483_v55 = vmul.f32 1.442695, %v2480_v53  ;;  %v2506_v56 = vsel %vm1017_vm4, %v2501_v54, 0 }
0x125e   : > { %4148 = vmatpush3.bf16.msra.mxu1 %v2506_v56 }
0x125f   : > { %4484 = vpow2.f32 %v2483_v55  ;;  %4159 = vmatprep.subr.bf16.mxu1 %v4945_v3 }
0x1260   : > { %v2599_v5 = vpop.permute.xlu1 %2598 }
0x1261   : > { %v2604_v15 = vsel %vm891_vm3, %v2599_v5, 0 }
0x1264   : > { %v2649_v29 = vpop.permute.xlu1 %2648 }
0x1265   : > { %v2654_v6 = vsel %vm891_vm3, %v2649_v29, 0 }
0x1267   : > { %v4483_v57 = vpop.eup %4482 }
0x1268   : > { %v2485_v58 = vsel %vm891_vm3, %v4483_v57, 0.0  ;;  %v2597_v39 = vpop.permute.xlu1 %2596 }
0x1269   : > { %v4485_v60 = vpop.eup %4484  ;;  %2486 = vadd.xlane.f32.xlu0 %v2485_v58 }
0x126a   : > { %v2488_v61 = vsel %vm891_vm3, %v4485_v60, 0.0 }
0x126d   : > { %2489 = vadd.xlane.f32.xlu0 %v2488_v61 }
0x1283   : > { %2548 = vrot.lane.b32.xlu0 %v5755_v7, %s4947_s24 }
0x1287   : > { %2646 = vrot.lane.b32.xlu0 %v5737_v11, %s4948_s4 }
0x12f6   : > { %v2487_v33 = vpop.xlane.xlu0 %2486 }
0x12f7   : > { %4486 = vrcp.f32 %v2487_v33 }
0x12fa   : > { %v2490_v63 = vpop.xlane.xlu0 %2489 }
0x12fb   : > { %4488 = vrcp.f32 %v2490_v63 }
0x12fe   : > { %v2549_v1 = vpop.permute.xlu0 %2548 }
0x12ff   : > { %v2554_v2 = vsel %vm1017_vm4, %v2549_v1, 0 }
0x1300   : > { %4154 = vmatpush3.bf16.msra.mxu0 %v2554_v2 }
0x1301   : > { %v4487_v4 = vpop.eup %4486  ;;  %4165 = vmatprep.subr.bf16.mxu0 %v4945_v3 }
0x1302   : > { %v2493_v8 = vmul.f32 %v4487_v4, %v4483_v57  ;;  %v2647_v16 = vpop.permute.xlu0 %2646 }
0x1304   : > { %3806 = vst.msk [vmem:[%s5414_s27 + $0x10] sm:$0xff] %vm891_vm3, %v2493_v8  ;;  %v2498_v50 = vpack.c.bf16 %v2493_v8, %v2493_v8 }
0x1305   : > { %v4489_v10 = vpop.eup %4488 }
0x1306   : > { %v2494_v24 = vmul.f32 %v4489_v10, %v4485_v60  ;;  %4150 = vmatmul.mubr.msk.bf16.vlgmr.msra.gmra.mrb[56].mxu1 %vm891_vm3, %v2498_v50 }
0x1307   : > { %4160 = vmatpush3.bf16.xpose.msra.mxu1 %v2604_v15  ;;  %4161 = vmatprep.mubr.msk.bf16.mxu1 %vm4946_vm1, %v4945_v3 }
0x1308   : > { %3807 = vst.msk [vmem:[%s5414_s27 + $0x18] sm:$0xff] %vm891_vm3, %v2494_v24  ;;  %v2499_v43 = vpack.c.bf16 %v2494_v24, %v2494_v24  ;;  %4171 = vmatprep.subr.bf16.mxu1 %v4945_v3 }
0x130a   : > { %4156 = vmatmul.mubr.msk.bf16.vlgmr.msra.gmra.mrb[60].mxu0 %vm891_vm3, %v2499_v43 }
0x130b   : > { %4166 = vmatpush3.bf16.xpose.msra.mxu0 %v2654_v6  ;;  %4167 = vmatprep.mubr.msk.bf16.mxu0 %vm4946_vm1, %v4945_v3 }
0x130c   : > { %4177 = vmatprep.subr.bf16.mxu0 %v4945_v3 }
0x130e   : > { %4162 = vmatmul.mubr.msk.bf16.vlgmr.msra.gmra.mrb[60].mxu1 %vm891_vm3, %v2597_v39 }
0x130f   : > { %4173 = vmatprep.mubr.msk.bf16.mxu1 %vm4946_vm1, %v4945_v3 }
0x1312   : > { %4168 = vmatmul.mubr.msk.bf16.vlgmr.msra.gmra.mrb[64].mxu0 %vm891_vm3, %v2647_v16 }
0x1313   : > { %4179 = vmatprep.mubr.msk.bf16.mxu0 %vm4946_vm1, %v4945_v3 }
0x13d9   : > { %v5847_v18 = vpop.f32.mrb[56].mxu1 }
0x13da   : > { %v4151_v19 = vpop.f32.mrb[57].mxu1 }
0x13db   : > { %v2545_v20 = vpop.f32.mrb[58].mxu1 }
0x13dc   : > { %v4152_v21 = vpop.f32.mrb[59].mxu1 }
0x13dd   : > { %v5849_v22 = vpop.f32.mrb[60].mxu0 }
0x13de   : > { %v4400_v23 = vpack.i.bf16 %v5849_v22, %v5847_v18  ;;  %v4157_v25 = vpop.f32.mrb[61].mxu0 }
0x13df   : > { %v2593_v26 = vpop.f32.mrb[62].mxu0 }
0x13e0   : > { %v4158_v34 = vpop.f32.mrb[63].mxu0 }
0x13e1   : > { %v2640_v28 = vpop.f32.mrb[60].mxu1 }
0x13e2   : > { %v2696_v30 = vmul.f32 0.35355338, %v2640_v28  ;;  %v4163_v32 = vpop.f32.mrb[61].mxu1 }
0x13e3   : > { %v2643_v35 = vpop.f32.mrb[62].mxu1 }
0x13e4   : > { %v4164_v37 = vpop.f32.mrb[63].mxu1  ;;  %v2698_v40 = vadd.f32 %v5763_v17, %v2696_v30 }
0x13e5   : > { %v2690_v42 = vpop.f32.mrb[64].mxu0 }
0x13e6   : > { %v2697_v49 = vmul.f32 0.35355338, %v2690_v42  ;;  %v4169_v51 = vpop.f32.mrb[65].mxu0  ;;  %v2700_v52 = vsel %vm891_vm3, %v2698_v40, -inf }
0x13e7   : > { %2701 = vmax.xlane.f32.xlu1 %v2700_v52  ;;  %v2693_v53 = vpop.f32.mrb[66].mxu0 }
0x13e8   : > { %v4170_v54 = vpop.f32.mrb[67].mxu0  ;;  %v2699_v55 = vadd.f32 %v5765_v45, %v2697_v49 }
0x13ea   : > { %v2703_v56 = vsel %vm891_vm3, %v2699_v55, -inf }
0x13eb   : > { %2704 = vmax.xlane.f32.xlu0 %v2703_v56 }
0x13f8   : > { %2727 = vrot.lane.b32.xlu1 %v5753_v12, %s4948_s4 }
0x13fc   : > { %2825 = vrot.lane.b32.xlu1 %v5721_v59, %s4949_s5 }
0x1400   : > { %2875 = vrot.lane.b32.xlu1 %v5723_v62, %s4949_s5 }
0x1404   : > { %2823 = vrot.lane.b32.xlu1 %v5735_v9, %s4949_s5 }
0x1474   : > { %v2702_v57 = vpop.xlane.xlu1 %2701 }
0x1475   : > { %v2706_v58 = vsub.f32 %v2698_v40, %v2702_v57 }
0x1477   : > { %v2708_v60 = vmul.f32 1.442695, %v2706_v58 }
0x1478   : > { %v2728_v61 = vpop.permute.xlu1 %2727  ;;  %v2705_v33 = vpop.xlane.xlu0 %2704 }
0x1479   : > { %4490 = vpow2.f32 %v2708_v60  ;;  %v2733_v63 = vsel %vm1017_vm4, %v2728_v61, 0  ;;  %v2707_v1 = vsub.f32 %v2699_v55, %v2705_v33 }
0x147a   : > { %4172 = vmatpush3.bf16.msra.mxu1 %v2733_v63 }
0x147b   : > { %v2710_v2 = vmul.f32 1.442695, %v2707_v1  ;;  %4183 = vmatprep.subr.bf16.mxu1 %v4945_v3 }
0x147c   : > { %v2826_v24 = vpop.permute.xlu1 %2825 }
0x147d   : > { %4492 = vpow2.f32 %v2710_v2 }
0x1480   : > { %v2876_v16 = vpop.permute.xlu1 %2875 }
0x1481   : > { %v2881_v20 = vsel %vm891_vm3, %v2876_v16, 0  ;;  %v4431_v16 = vld [vmem:[%s5396_s9 + $0x78] sm:$0xff]  }
0x1483   : > { %v4491_v59 = vpop.eup %4490 }
0x1484   : > { %v2712_v62 = vsel %vm891_vm3, %v4491_v59, 0.0  ;;  %v2824_v21 = vpop.permute.xlu1 %2823 }
0x1485   : > { %2713 = vadd.xlane.f32.xlu0 %v2712_v62 }
0x1487   : > { %v4493_v4 = vpop.eup %4492 }
0x1488   : > { %v2715_v9 = vsel %vm891_vm3, %v4493_v4, 0.0 }
0x1489   : > { %2716 = vadd.xlane.f32.xlu0 %v2715_v9 }
0x149f   : > { %2775 = vrot.lane.b32.xlu0 %v5755_v7, %s4948_s4 }
0x14a3   : > { %2873 = vrot.lane.b32.xlu0 %v5737_v11, %s4949_s5  ;;  %v2831_v11 = vsel %vm891_vm3, %v2826_v24, 0 }
0x1512   : > { %v2714_v5 = vpop.xlane.xlu0 %2713 }
0x1513   : > { %4494 = vrcp.f32 %v2714_v5 }
0x1516   : > { %v2717_v8 = vpop.xlane.xlu0 %2716 }
0x1517   : > { %4496 = vrcp.f32 %v2717_v8 }
0x151a   : > { %v2776_v50 = vpop.permute.xlu0 %2775 }
0x151b   : > { %v2781_v10 = vsel %vm1017_vm4, %v2776_v50, 0 }
0x151c   : > { %4178 = vmatpush3.bf16.msra.mxu0 %v2781_v10 }
0x151d   : > { %v4495_v15 = vpop.eup %4494  ;;  %4189 = vmatprep.subr.bf16.mxu0 %v4945_v3 }
0x151e   : > { %v2720_v29 = vmul.f32 %v4495_v15, %v4491_v59  ;;  %v2874_v25 = vpop.permute.xlu0 %2873 }
0x1520   : > { %3812 = vst.msk [vmem:[%s5414_s27 + $0x20] sm:$0xff] %vm891_vm3, %v2720_v29  ;;  %v2725_v43 = vpack.c.bf16 %v2720_v29, %v2720_v29 }
0x1521   : > { %v4497_v6 = vpop.eup %4496 }
0x1522   : > { %v2721_v39 = vmul.f32 %v4497_v6, %v4493_v4  ;;  %4174 = vmatmul.mubr.msk.bf16.vlgmr.msra.gmra.mrb[64].mxu1 %vm891_vm3, %v2725_v43 }
0x1523   : > { %4184 = vmatpush3.bf16.xpose.msra.mxu1 %v2831_v11  ;;  %4185 = vmatprep.mubr.msk.bf16.mxu1 %vm4946_vm1, %v4945_v3 }
0x1524   : > { %3813 = vst.msk [vmem:[%s5414_s27 + $0x28] sm:$0xff] %vm891_vm3, %v2721_v39  ;;  %v2726_v19 = vpack.c.bf16 %v2721_v39, %v2721_v39  ;;  %4195 = vmatprep.subr.bf16.mxu1 %v4945_v3  ;;  %v4430_v39 = vld [vmem:[%s5396_s9 + $0x70] sm:$0xff]  }
0x1526   : > { %4180 = vmatmul.mubr.msk.bf16.vlgmr.msra.gmra.mrb[68].mxu0 %vm891_vm3, %v2726_v19 }
0x1527   : > { %4190 = vmatpush3.bf16.xpose.msra.mxu0 %v2881_v20  ;;  %4191 = vmatprep.mubr.msk.bf16.mxu0 %vm4946_vm1, %v4945_v3 }
0x1528   : > { %4201 = vmatprep.subr.bf16.mxu0 %v4945_v3 }
0x152a   : > { %4186 = vmatmul.mubr.msk.bf16.vlgmr.msra.gmra.mrb[68].mxu1 %vm891_vm3, %v2824_v21 }
0x152b   : > { %4197 = vmatprep.mubr.msk.bf16.mxu1 %vm4946_vm1, %v4945_v3 }
0x152e   : > { %4192 = vmatmul.mubr.msk.bf16.vlgmr.msra.gmra.mrb[72].mxu0 %vm891_vm3, %v2874_v25 }
0x152f   : > { %4203 = vmatprep.mubr.msk.bf16.mxu0 %vm4946_vm1, %v4945_v3 }
0x15f5   : > { %v2769_v26 = vpop.f32.mrb[64].mxu1 }
0x15f6   : > { %v4175_v34 = vpop.f32.mrb[65].mxu1 }
0x15f7   : > { %v2772_v28 = vpop.f32.mrb[66].mxu1 }
0x15f8   : > { %v4176_v30 = vpop.f32.mrb[67].mxu1 }
0x15f9   : > { %v2817_v32 = vpop.f32.mrb[68].mxu0 }
0x15fa   : > { %v4405_v35 = vpack.i.bf16 %v2817_v32, %v2769_v26  ;;  %v4181_v37 = vpop.f32.mrb[69].mxu0 }
0x15fb   : > { %v2820_v40 = vpop.f32.mrb[70].mxu0 }
0x15fc   : > { %v4182_v42 = vpop.f32.mrb[71].mxu0 }
0x15fd   : > { %v2867_v49 = vpop.f32.mrb[68].mxu1 }
0x15fe   : > { %v2923_v51 = vmul.f32 0.35355338, %v2867_v49  ;;  %v4187_v52 = vpop.f32.mrb[69].mxu1 }
0x15ff   : > { %v2870_v53 = vpop.f32.mrb[70].mxu1 }
0x1600   : > { %v4188_v54 = vpop.f32.mrb[71].mxu1  ;;  %v2925_v55 = vadd.f32 %v5763_v17, %v2923_v51 }
0x1601   : > { %v2917_v56 = vpop.f32.mrb[72].mxu0 }
0x1602   : > { %v2924_v57 = vmul.f32 0.35355338, %v2917_v56  ;;  %v4193_v58 = vpop.f32.mrb[73].mxu0  ;;  %v2927_v60 = vsel %vm891_vm3, %v2925_v55, -inf }
0x1603   : > { %2928 = vmax.xlane.f32.xlu1 %v2927_v60  ;;  %v2920_v61 = vpop.f32.mrb[74].mxu0 }
0x1604   : > { %v4194_v33 = vpop.f32.mrb[75].mxu0  ;;  %v2926_v63 = vadd.f32 %v5765_v45, %v2924_v57 }
0x1606   : > { %v2930_v1 = vsel %vm891_vm3, %v2926_v63, -inf }
0x1607   : > { %2931 = vmax.xlane.f32.xlu0 %v2930_v1 }
0x1614   : > { %2954 = vrot.lane.b32.xlu1 %v5753_v12, %s4949_s5 }
0x1618   : > { %4401 = vrot.lane.b32.xlu1 %v4400_v23, %s4950_s15 }
0x161c   : > { %4406 = vrot.lane.b32.xlu1 %v4405_v35, %s4951_s26 }
0x1690   : > { %v2929_v17 = vpop.xlane.xlu1 %2928 }
0x1691   : > { %v2933_v2 = vsub.f32 %v2925_v55, %v2929_v17 }
0x1693   : > { %v2935_v59 = vmul.f32 1.442695, %v2933_v2 }
0x1694   : > { %v2955_v62 = vpop.permute.xlu1 %2954  ;;  %v2932_v4 = vpop.xlane.xlu0 %2931 }
0x1695   : > { %4498 = vpow2.f32 %v2935_v59  ;;  %v2960_v45 = vsel %vm1017_vm4, %v2955_v62, 0  ;;  %v2934_v9 = vsub.f32 %v2926_v63, %v2932_v4 }
0x1696   : > { %4196 = vmatpush3.bf16.msra.mxu1 %v2960_v45 }
0x1697   : > { %v2937_v5 = vmul.f32 1.442695, %v2934_v9  ;;  %4207 = vmatprep.subr.bf16.mxu1 %v4945_v3 }
0x1698   : > { %v4402_v35 = vpop.permute.xlu1 %4401 }
0x1699   : > { %4500 = vpow2.f32 %v2937_v5  ;;  %v4404_v40 = vunpack.i.h.bf16 %v4402_v35  ;;  %v4403_v42 = vunpack.i.l.bf16 %v4402_v35 }
0x169b   : > { %v3075_v53 = vsel %vm891_vm3, %v5803_v44, %v4404_v40  ;;  %v3074_v54 = vsel %vm891_vm3, %v5801_v46, %v4403_v42  ;;  %v3084_v46 = vrot.slane %v5748_v36, %v762_v14  ;;  %v4436_v40 = vld [vmem:[%s5407_s11 + $0x10] sm:$0xff]   ;;  %v3825_v42 = vld [vmem:[%s589_s28] ss:$0 sm:$0xff] }
0x169c   : > { %v4407_v37 = vpop.permute.xlu1 %4406 }
0x169d   : > { %v4409_v49 = vunpack.i.h.bf16 %v4407_v37  ;;  %v4408_v51 = vunpack.i.l.bf16 %v4407_v37 }
0x169f   : > { %v4499_v12 = vpop.eup %4498  ;;  %v3077_v57 = vsel %vm1814_vm5, %v3075_v53, %v4409_v49  ;;  %v3076_v58 = vsel %vm1814_vm5, %v3074_v54, %v4408_v51 }
0x16a0   : > { %v2939_v18 = vsel %vm891_vm3, %v4499_v12, 0.0 }
0x16a1   : > { %2940 = vadd.xlane.f32.xlu0 %v2939_v18 }
0x16a3   : > { %v4501_v22 = vpop.eup %4500 }
0x16a4   : > { %v2942_v23 = vsel %vm891_vm3, %v4501_v22, 0.0 }
0x16a5   : > { %2943 = vadd.xlane.f32.xlu0 %v2942_v23 }
0x16bb   : > { %3002 = vrot.lane.b32.xlu0 %v5755_v7, %s4949_s5 }
0x172e   : > { %v2941_v8 = vpop.xlane.xlu0 %2940 }
0x172f   : > { %4502 = vrcp.f32 %v2941_v8 }
0x1732   : > { %v2944_v50 = vpop.xlane.xlu0 %2943 }
0x1733   : > { %4504 = vrcp.f32 %v2944_v50 }
0x1736   : > { %v3003_v10 = vpop.permute.xlu0 %3002 }
0x1737   : > { %v3008_v15 = vsel %vm1017_vm4, %v3003_v10, 0  ;;  %v4432_v10 = vld [vmem:[%s5405_s23] sm:$0xff]  }
0x1738   : > { %4202 = vmatpush3.bf16.msra.mxu0 %v3008_v15  ;;  %v4433_v15 = vld [vmem:[%s5405_s23 + $0x8] sm:$0xff]  }
0x1739   : > { %v4503_v24 = vpop.eup %4502  ;;  %4215 = vmatprep.subr.bf16.mxu0 %v4945_v3 }
0x173a   : > { %v2947_v29 = vmul.f32 %v4503_v24, %v4499_v12  ;;  %v4434_v24 = vld [vmem:[%s5407_s11] sm:$0xff]  }
0x173c   : > { %3818 = vst.msk [vmem:[%s5414_s27 + $0x30] sm:$0xff] %vm891_vm3, %v2947_v29  ;;  %v2952_v43 = vpack.c.bf16 %v2947_v29, %v2947_v29  ;;  %v4435_v29 = vld [vmem:[%s5407_s11 + $0x8] sm:$0xff]  }
0x173d   : > { %v4505_v6 = vpop.eup %4504 }
0x173e   : > { %v2948_v7 = vmul.f32 %v4505_v6, %v4501_v22  ;;  %4198 = vmatmul.mubr.msk.bf16.vlgmr.msra.gmra.mrb[72].mxu1 %vm891_vm3, %v2952_v43 }
0x173f   : > { %4211 = vmatprep.mubr.msk.bf16.mxu1 %vm4946_vm1, %v4945_v3  ;;  %4208 = vmatpush3.bf16.msra.mxu1 %v4430_v39 }
0x1740   : > { %3819 = vst.msk [vmem:[%s5414_s27 + $0x38] sm:$0xff] %vm891_vm3, %v2948_v7  ;;  %v2953_v11 = vpack.c.bf16 %v2948_v7, %v2948_v7  ;;  %4209 = vmatprep.subr.bf16.mxu1 %v4945_v3 }
0x1742   : > { %4204 = vmatmul.mubr.msk.bf16.vlgmr.msra.gmra.mrb[76].mxu0 %vm891_vm3, %v2953_v11 }
0x1743   : > { %4219 = vmatprep.mubr.msk.bf16.mxu0 %vm4946_vm1, %v4945_v3  ;;  %4210 = vmatpush3.bf16.msra.mxu1 %v4431_v16 }
0x1744   : > { %4223 = vmatprep.subr.bf16.mxu1 %v4945_v3  ;;  %4216 = vmatpush3.bf16.msra.mxu0 %v4432_v10  ;;  %v3363_v10 = vrot.slane %v5748_v36, %v1918_v31 }
0x1745   : > { %4217 = vmatprep.subr.bf16.mxu0 %v4945_v3 }
0x1748   : > { %4218 = vmatpush3.bf16.msra.mxu0 %v4433_v15 }
0x1811   : > { %v2996_v19 = vpop.f32.mrb[72].mxu1 }
0x1812   : > { %v4199_v20 = vpop.f32.mrb[73].mxu1 }
0x1813   : > { %v2999_v21 = vpop.f32.mrb[74].mxu1  ;;  %v3172_v20 = vrot.slane %v5748_v36, %v820_v41  ;;  %v4437_v41 = vld [vmem:[%s5407_s11 + $0x18] sm:$0xff]  }
0x1814   : > { %v4200_v25 = vpop.f32.mrb[75].mxu1 }
0x1815   : > { %v3044_v26 = vpop.f32.mrb[76].mxu0 }
0x1816   : > { %v4410_v34 = vpack.i.bf16 %v3044_v26, %v2996_v19  ;;  %v4205_v28 = vpop.f32.mrb[77].mxu0  ;;  %v3178_v26 = vrot.slane %v5748_v36, %v1823_v38 }
0x1817   : > { %v3047_v30 = vpop.f32.mrb[78].mxu0 }
0x1818   : > { %4411 = vrot.lane.b32.xlu1 %v4410_v34, %s4952_s30  ;;  %v4206_v32 = vpop.f32.mrb[79].mxu0 }
0x188a   : > { %v4412_v52 = vpop.permute.xlu1 %4411 }
0x188b   : > { %v4414_v55 = vunpack.i.h.bf16 %v4412_v52  ;;  %v4413_v56 = vunpack.i.l.bf16 %v4412_v52 }
0x188d   : > { %v3079_v60 = vsel %vm1817_vm6, %v3077_v57, %v4414_v55  ;;  %v3078_v61 = vsel %vm1817_vm6, %v3076_v58, %v4413_v56  ;;  %v3262_v58 = vrot.slane %v5748_v36, %v1912_v27 }
0x188e   : > { %v3080_v33 = vpack.c.bf16 %v3079_v60, %v3078_v61 }
0x1890   : > { %4212 = vmatmul.mubr.msk.bf16.vlgmr.msra.gmra.mrb[76].mxu1 %vm714_vm2, %v3080_v33 }
0x1891   : > { %4231 = vmatprep.mubr.msk.bf16.mxu1 %vm4946_vm1, %v4945_v3  ;;  %4224 = vmatpush3.bf16.msra.mxu1 %v4434_v24  ;;  %v3369_v24 = vrot.slane %v5748_v36, %v1945_v0 }
0x1892   : > { %4225 = vmatprep.subr.bf16.mxu1 %v4945_v3 }
0x1895   : > { %4226 = vmatpush3.bf16.msra.mxu1 %v4435_v29 }
0x1896   : > { %4227 = vmatprep.subr.bf16.mxu1 %v4945_v3 }
0x1899   : > { %4228 = vmatpush3.bf16.msra.mxu1 %v4436_v40 }
0x189a   : > { %4229 = vmatprep.subr.bf16.mxu1 %v4945_v3 }
0x189d   : > { %4230 = vmatpush3.bf16.msra.mxu1 %v4437_v41 }
0x1963   : > { %v3134_v44 = vpop.f32.mrb[76].mxu1 }
0x1964   : > { %v3135_v63 = vadd.f32 %v3134_v44, %v3084_v46  ;;  %v4213_v1 = vpop.f32.mrb[77].mxu1 }
0x1965   : > { %v3137_v17 = vpop.f32.mrb[78].mxu1 }
0x1966   : > { %v3138_v2 = vadd.f32 %v3137_v17, %v3084_v46  ;;  %v4214_v59 = vpop.f32.mrb[79].mxu1  ;;  %v3141_v62 = vadd.f32 %v3135_v63, %v5703_v47 }
0x1968   : > { %v3143_v4 = vsel %vm714_vm2, %v3141_v62, 0.0  ;;  %v3142_v45 = vadd.f32 %v3138_v2, %v5705_v48 }
0x1969   : > { %3144 = vadd.xlane.f32.xlu0 %v3143_v4 }
0x196a   : > { %v3146_v9 = vsel %vm714_vm2, %v3142_v45, 0.0 }
0x196b   : > { %3147 = vadd.xlane.f32.xlu1 %v3146_v9 }
0x19f6   : > { %v3145_v5 = vpop.xlane.xlu0 %3144 }
0x19f7   : > { %v3149_v14 = vmul.f32 0.03125, %v3145_v5 }
0x19f8   : > { %v3148_v12 = vpop.xlane.xlu1 %3147 }
0x19f9   : > { %v3151_v18 = vsub.f32 %v3141_v62, %v3149_v14  ;;  %v3150_v22 = vmul.f32 0.03125, %v3148_v12 }
0x19fb   : > { %v3152_v23 = vsub.f32 %v3142_v45, %v3150_v22  ;;  %v3153_v8 = vmul.f32 %v3151_v18, %v3151_v18 }
0x19fd   : > { %v3155_v47 = vsel %vm714_vm2, %v3153_v8, 0.0  ;;  %v3154_v50 = vmul.f32 %v3152_v23, %v3152_v23 }
0x19fe   : > { %3156 = vadd.xlane.f32.xlu0 %v3155_v47 }
0x19ff   : > { %v3158_v48 = vsel %vm714_vm2, %v3154_v50, 0.0 }
0x1a02   : > { %3159 = vadd.xlane.f32.xlu0 %v3158_v48 }
0x1a8b   : > { %v3157_v43 = vpop.xlane.xlu0 %3156 }
0x1a8c   : > { %v3161_v6 = vmul.f32 0.03125, %v3157_v43 }
0x1a8e   : > { %v3163_v7 = vadd.f32 1e-05, %v3161_v6 }
0x1a8f   : > { %v3160_v11 = vpop.xlane.xlu0 %3159 }
0x1a90   : > { %4506 = vrsqrt.f32 %v3163_v7  ;;  %v3162_v39 = vmul.f32 0.03125, %v3160_v11 }
0x1a92   : > { %v3164_v16 = vadd.f32 1e-05, %v3162_v39 }
0x1a94   : > { %4508 = vrsqrt.f32 %v3164_v16 }
0x1a9a   : > { %v4507_v19 = vpop.eup %4506 }
0x1a9b   : > { %v3167_v21 = vmul.f32 %v4507_v19, %v3151_v18 }
0x1a9d   : > { %v3173_v34 = vmul.f32 %v3172_v20, %v3167_v21 }
0x1a9e   : > { %v4509_v25 = vpop.eup %4508 }
0x1a9f   : > { %v3168_v28 = vmul.f32 %v4509_v25, %v3152_v23  ;;  %v3179_v32 = vadd.f32 %v3178_v26, %v3173_v34 }
0x1aa1   : > { %v3174_v30 = vmul.f32 %v3172_v20, %v3168_v28 }
0x1aa3   : > { %v3180_v35 = vadd.f32 %v3178_v26, %v3174_v30 }
0x1aa5   : > { %v3181_v37 = vpack.c.bf16 %v3180_v35, %v3179_v32 }
0x1aa7   : > { %4220 = vmatmul.mubr.msk.bf16.vlgmr.msra.gmra.mrb[80].mxu0 %vm714_vm2, %v3181_v37 }
0x1b7a   : > { %v3241_v49 = vpop.f32.mrb[80].mxu0 }
0x1b7b   : > { %v3242_v51 = vadd.f32 %v3825_v42, %v3241_v49  ;;  %v4221_v52 = vpop.f32.mrb[81].mxu0 }
0x1b7c   : > { %v3244_v38 = vpop.f32.mrb[82].mxu0 }
0x1b7d   : > { %v3245_v53 = vadd.f32 %v3825_v42, %v3244_v38  ;;  %v4222_v54 = vpop.f32.mrb[83].mxu0  ;;  %v3248_v55 = vmax.f32 %v3242_v51, 0.0 }
0x1b7f   : > { %v3249_v56 = vmax.f32 %v3245_v53, 0.0 }
0x1b81   : > { %v3250_v57 = vpack.c.bf16 %v3249_v56, %v3248_v55 }
0x1b83   : > { %4232 = vmatmul.mubr.msk.bf16.vlgmr.msra.gmra.mrb[80].mxu1 %vm3287_vm7, %v3250_v57 }
0x1c56   : > { %v3325_v3 = vpop.f32.mrb[80].mxu1 }
0x1c57   : > { %v3326_v60 = vadd.f32 %v3325_v3, %v3262_v58  ;;  %v4233_v61 = vpop.f32.mrb[81].mxu1 }
0x1c58   : > { %v3328_v33 = vpop.f32.mrb[82].mxu1 }
0x1c59   : > { %v3329_v46 = vadd.f32 %v3328_v33, %v3262_v58  ;;  %v4234_v44 = vpop.f32.mrb[83].mxu1  ;;  %v3332_v63 = vadd.f32 %v3326_v60, %v3179_v32 }
0x1c5b   : > { %v3334_v1 = vsel %vm714_vm2, %v3332_v63, 0.0  ;;  %v3333_v17 = vadd.f32 %v3329_v46, %v3180_v35 }
0x1c5c   : > { %3335 = vadd.xlane.f32.xlu0 %v3334_v1 }
0x1c5d   : > { %v3337_v2 = vsel %vm714_vm2, %v3333_v17, 0.0 }
0x1c5e   : > { %3338 = vadd.xlane.f32.xlu1 %v3337_v2 }
0x1ce9   : > { %v3336_v59 = vpop.xlane.xlu0 %3335 }
0x1cea   : > { %v3340_v62 = vmul.f32 0.03125, %v3336_v59 }
0x1ceb   : > { %v3339_v4 = vpop.xlane.xlu1 %3338 }
0x1cec   : > { %v3342_v45 = vsub.f32 %v3332_v63, %v3340_v62  ;;  %v3341_v9 = vmul.f32 0.03125, %v3339_v4 }
0x1cee   : > { %v3343_v27 = vsub.f32 %v3333_v17, %v3341_v9  ;;  %v3344_v5 = vmul.f32 %v3342_v45, %v3342_v45 }
0x1cf0   : > { %v3346_v14 = vsel %vm714_vm2, %v3344_v5, 0.0  ;;  %v3345_v12 = vmul.f32 %v3343_v27, %v3343_v27 }
0x1cf1   : > { %3347 = vadd.xlane.f32.xlu0 %v3346_v14 }
0x1cf2   : > { %v3349_v18 = vsel %vm714_vm2, %v3345_v12, 0.0 }
0x1cf3   : > { %3350 = vadd.xlane.f32.xlu1 %v3349_v18 }
0x1d7e   : > { %v3348_v22 = vpop.xlane.xlu0 %3347 }
0x1d7f   : > { %v3352_v23 = vmul.f32 0.03125, %v3348_v22 }
0x1d80   : > { %v3351_v8 = vpop.xlane.xlu1 %3350 }
0x1d81   : > { %v3354_v47 = vadd.f32 1e-05, %v3352_v23  ;;  %v3353_v50 = vmul.f32 0.03125, %v3351_v8 }
0x1d83   : > { %4510 = vrsqrt.f32 %v3354_v47  ;;  %v3355_v48 = vadd.f32 1e-05, %v3353_v50 }
0x1d85   : > { %4512 = vrsqrt.f32 %v3355_v48 }
0x1d8d   : > { %v4511_v15 = vpop.eup %4510 }
0x1d8e   : > { %v3358_v29 = vmul.f32 %v4511_v15, %v3342_v45 }
0x1d8f   : > { %v4513_v43 = vpop.eup %4512 }
0x1d90   : > { %v3364_v6 = vmul.f32 %v3363_v10, %v3358_v29  ;;  %v3359_v7 = vmul.f32 %v4513_v43, %v3343_v27  ;;  %3377 = sbr.rel (%p3834_p10) target bundleno = 7575 (0x1d97), region = 100 }
0x1d92   : > { %v3370_v11 = vadd.f32 %v3369_v24, %v3364_v6  ;;  %v3365_v39 = vmul.f32 %v3363_v10, %v3359_v7 }
0x1d94   : > { %3372 = vst.msk [vmem:[#allocation2] sm:$0xff] %vm714_vm2, %v3370_v11  ;;  %v3371_v16 = vadd.f32 %v3369_v24, %v3365_v39  ;;  %3378 = vst.msk [vmem:[#allocation16] sm:$0xff] (!%p3834_p10), %vm714_vm2, %v3370_v11 }
0x1d96   : > { %3373 = vst.msk [vmem:[#allocation2 + $0x8] sm:$0xff] %vm714_vm2, %v3371_v16  ;;  %3379 = vst.msk [vmem:[#allocation16 + $0x8] sm:$0xff] (!%p3834_p10), %vm714_vm2, %v3371_v16 }
0x1d97 PF: > { %s6211_s20 = sld [smem:[#allocation27_spill]]  ;;  %s6212_s25 = sld [smem:[#allocation28_spill]] }
0x1d98   : > { %s6213_s16 = sld [smem:[#allocation30_spill]]  ;;  %s3416_s17 = sshll.u32 %s5412_s14, 4  ;;  %s5995_s17 = int_to_ptr.vmem [resolvable:$true] %s3416_s17 }
0x1d99   : > { %s6214_s23 = sld [smem:[#allocation38_spill]]  ;;  %s5999_s13 = scalar_lea.sflag [#allocation18], %s550_s12 }
0x1d9a   : > { %s4776_s28 = scalar_lea.vmem %s5995_s17, 1024  ;;  %s4953_s14 = smov [#allocation17]  }
0x1d9b   : > { %p4777_p12 = scmp.ne.s32.totalorder %s5995_s17, %s4776_s28  ;;  %s4780_s0 = sshll.u32 %s4953_s14, 4  ;;  %s4781_s0 = int_to_ptr.vmem [resolvable:$false] %s4780_s0 }
0x1d9c   : > { %s4782_s24 = scalar_lea.vmem %s4781_s0, 2048  ;;  %p4783_p3 = scmp.lt.s32.totalorder %s5995_s17, %s4781_s0 }
0x1d9d   : > { %s3861_s9 = sshll.u32 %s6211_s20, 10  ;;  %p4784_p11 = scmp.lt.s32.totalorder %s4782_s24, %s4776_s28 }
0x1d9e   : > { %p6215_p13 = scmp.ne.s32.totalorder %s6213_s16, 0 }
0x1d9f   : > { %s5993_s11 = scalar_lea.hbm %s6214_s23, %s3861_s9  ;;  %p4785_p0 = por %p4784_p11, %p4783_p3 }
0x1da0   : > { %p4778_p2 = pnand %p4777_p12, %p6215_p13 }
0x1da2   : > { %p4779_p5 = pneg %p4778_p2 }
0x1da4   : > { %p4786_p4 = pnand %p4785_p0, %p4779_p5 }
0x1da6   : > { %4789 = shalt.err (!%p4786_p4)
}
0x1da7   : > { %s4790_s12 = scalar_lea.hbm %s5993_s11, 1024  ;;  %s4794_s26 = scalar_lea.hbm %s6214_s23, 2048 }
0x1da8   : > { %p4791_p7 = scmp.ne.s32.totalorder %s5993_s11, %s4790_s12  ;;  %p4795_p6 = scmp.lt.u32.totalorder %s5993_s11, %s6214_s23 }
0x1da9   : > { %p4796_p1 = scmp.lt.u32.totalorder %s4794_s26, %s4790_s12  ;;  %p4798_p12 = scmp.lt.u32.totalorder %s4790_s12, %s5993_s11 }
0x1daa   : > { %p4792_p9 = pnand %p4791_p7, %p6215_p13 }
0x1dab   : > { %p4797_p10 = por %p4796_p1, %p4795_p6 }
0x1dac   : > { %p4793_p8 = pneg %p4792_p9 }
0x1dad   : > { %p4799_p2 = por %p4798_p12, %p4797_p10 }
0x1daf   : > { %p4800_p5 = pnand %p4799_p2, %p4793_p8 }
0x1db1   : > { %4803 = shalt.err (!%p4800_p5)
}
0x1db2   : > { %s4954_s1 = smov 128   ;;  %s6216_s14 = sld [smem:[#allocation39_spill]] }
0x1db3   : > { %4263 = dma.vmem_to_hbm [thread:$0]  (%p6215_p13), %s5995_s17, 1024, %s5993_s11, %s5999_s13, %s4954_s1, %s4954_s1, %s4950_s15  }
0x1db4   : > { %s3433_s24 = sshll.u32 %s5414_s27, 4  ;;  %s4955_s12 = smov [#allocation16]   ;;  %s6034_s24 = int_to_ptr.vmem [resolvable:$true] %s3433_s24 }
0x1db5   : > { %s3399_s4 = sshll.u32 %s4955_s12, 4  ;;  %p6217_p11 = scmp.eq.s32.totalorder %s6212_s25, 1  ;;  %s3400_s4 = int_to_ptr.vmem [resolvable:$true] %s3399_s4 }
0x1db6   : > { %s4804_s5 = scalar_lea.vmem %s3400_s4, 256  ;;  %p4811_p7 = scmp.lt.s32.totalorder %s3400_s4, %s3400_s4 }
0x1db7   : > { %p4805_p3 = scmp.ne.s32.totalorder %s3400_s4, %s4804_s5  ;;  %p4812_p9 = scmp.lt.s32.totalorder %s4804_s5, %s4804_s5 }
0x1db8   : > { %s6031_s0 = scalar_lea.hbm %s6216_s14, %s3861_s9 }
0x1db9   : > { %p4806_p0 = pnand %p4805_p3, %p6217_p11  ;;  %p4813_p8 = por %p4812_p9, %p4811_p7 }
0x1dbb   : > { %p4807_p4 = pneg %p4806_p0 }
0x1dbd   : > { %p4814_p6 = pnand %p4813_p8, %p4807_p4 }
0x1dbf   : > { %4817 = shalt.err (!%p4814_p6)
}
0x1dc0   : > { %s6218_s9 = sld [smem:[#allocation37_spill]]  ;;  %p6219_p10 = pmov %p6217_p11 }
0x1dc6   : > { %s4818_s27 = scalar_lea.hbm %s6218_s9, 256 }
0x1dc7   : > { %p4819_p1 = scmp.ne.s32.totalorder %s6218_s9, %s4818_s27  ;;  %p4824_p5 = scmp.lt.u32.totalorder %s4818_s27, %s6218_s9 }
0x1dc9   : > { %p4820_p12 = pnand %p4819_p1, %p6219_p10 }
0x1dcb   : > { %p4821_p2 = pneg %p4820_p12 }
0x1dcd   : > { %p4826_p3 = pnand %p4824_p5, %p4821_p2 }
0x1dcf   : > { %4829 = shalt.err (!%p4826_p3)
}
0x1dd0   : > { %p6220_p11 = pmov %p6219_p10  ;;  %s4830_s12 = scalar_lea.vmem %s6034_s24, 1024 }
0x1dd1   : > { %p4831_p0 = scmp.ne.s32.totalorder %s6034_s24, %s4830_s12  ;;  %s4956_s5 = smov [#allocation19]  }
0x1dd2   : > { %4262 = dma.vmem_to_hbm [thread:$0]  (%p6220_p11), %s3400_s4, 256, %s6218_s9, [#allocation5], %s4954_s1, %s4954_s1, %s4950_s15  }
0x1dd3   : > { %p4832_p4 = pnand %p4831_p0, %p6215_p13  ;;  %s4834_s20 = sshll.u32 %s4956_s5, 4  ;;  %s4835_s20 = int_to_ptr.vmem [resolvable:$false] %s4834_s20 }
0x1dd4   : > { %s4836_s17 = scalar_lea.vmem %s4835_s20, 2048  ;;  %p4837_p9 = scmp.lt.s32.totalorder %s6034_s24, %s4835_s20 }
0x1dd5   : > { %p4833_p7 = pneg %p4832_p4  ;;  %p4838_p8 = scmp.lt.s32.totalorder %s4836_s17, %s4830_s12 }
0x1dd7   : > { %p4839_p6 = por %p4838_p8, %p4837_p9 }
0x1dd9   : > { %p4840_p1 = pnand %p4839_p6, %p4833_p7 }
0x1ddb   : > { %4843 = shalt.err (!%p4840_p1)
}
0x1ddc   : > { %s4844_s4 = scalar_lea.hbm %s6031_s0, 1024  ;;  %s4848_s26 = scalar_lea.hbm %s6216_s14, 2048 }
0x1ddd   : > { %p4845_p10 = scmp.ne.s32.totalorder %s6031_s0, %s4844_s4  ;;  %p4849_p5 = scmp.lt.u32.totalorder %s6031_s0, %s6216_s14 }
0x1dde   : > { %p4850_p3 = scmp.lt.u32.totalorder %s4848_s26, %s4844_s4  ;;  %p4852_p0 = scmp.lt.u32.totalorder %s4844_s4, %s6031_s0 }
0x1ddf   : > { %p4846_p12 = pnand %p4845_p10, %p6215_p13 }
0x1de0   : > { %p4851_p11 = por %p4850_p3, %p4849_p5 }
0x1de1   : > { %p4847_p2 = pneg %p4846_p12 }
0x1de2   : > { %p4853_p4 = por %p4852_p0, %p4851_p11 }
0x1de4   : > { %p4854_p7 = pnand %p4853_p4, %p4847_p2 }
0x1de6   : > { %4857 = shalt.err (!%p4854_p7)
}
0x1de7   : > { %4264 = dma.vmem_to_hbm [thread:$0]  (%p6215_p13), %s6034_s24, 1024, %s6031_s0, %s5999_s13, %s4954_s1, %s4954_s1, %s4950_s15  }
0x1de8   : > { %p6221_p9 = scmp.eq.s32.totalorder %s6212_s25, 1 }
0x1dea   : > { %4899 = dma.done.wait (%p6221_p9), [#allocation5], 256   ;;  %p6222_p8 = pmov %p6221_p9 }
0x1dec   : > { %4901 = vsyncadd (%p6222_p8), [#allocation5], 4294967040 }
0x1ded PF: > { %s6223_s10 = sadd.s32 4294967294, %s4928_s22   ;;  %s6224_s28 = sld [smem:[#allocation31_spill]] }
0x1dee   : > { %s3452_s12 = sand.u32 1, %s6223_s10   ;;  %p6226_p1 = scmp.ge.s32.totalorder %s4928_s22, 2 }
0x1def   : > { %s3453_s16 = scalar_lea.sflag [#allocation18], %s3452_s12 }
0x1df3   : > { %p6225_p6 = scmp.ne.s32.totalorder %s6224_s28, 0 }
0x1df5   : > { %p4299_p10 = pnand %p6226_p1, %p6225_p6 }
0x1df7   : > { %4903 = dma.done.wait (!%p4299_p10), %s3453_s16, 2048  }
0x1df8   : > { %4905 = vsyncadd (!%p4299_p10), %s3453_s16, 4294965248  ;;  %s29_s22 = sadd.s32 1, %s4928_s22   ;;  %s6227_s17 = sld [smem:[#allocation26_spill]] }
0x1df9   : > { %p26_p13 = scmp.ge.s32.totalorder %s29_s22, 4   ;;  %s6228_s15 = smov %s5141_s18 }
0x1dfa   : > { %s6229_s25 = sld [smem:[#allocation32_spill]]  ;;  %s6230_s18 = smov %s4916_s19 }
0x1dfb   : > { %s6231_s19 = smov %s6228_s15  ;;  %s6232_s20 = smov %s4924_s21 }
0x1dfc   :  { %28 = sbr.rel (!%p26_p13) target bundleno = 16 (0x10), region = 209 }
0x1e00   : > { %s6233_s21 = smov %s6229_s25 }
0x1e03   :  { %3467 = vsyncpa [#allocation4], 1 }
0x1e04   :  { %3469 = vsyncpa [#allocation4 + $0x1], 1 }
0x1e05   :  { %3470 = vsyncpa [#allocation7], 1 }
0x1e06   :  { %3471 = vsyncpa [#allocation10], 1 }
0x1e07   :  { %3472 = vsyncpa [#allocation5], 1 }
0x1e08   :  { %3474 = vsyncpa [#allocation5 + $0x1], 1 }
0x1e09   :  { %3475 = vsyncpa [#allocation18], 1 }
0x1e0a   :  { %3477 = vsyncpa [#allocation18 + $0x1], 1 }

</bundles_post_ra>
